<compile_context>
chip_gen: v5e
topology: v5e:2x2
jax: 0.10.0
libtpu: 0.0.40
codegen_flags: <defaults>
</compile_context>

<pallas_src>
import functools

import jax
import jax.numpy as jnp
from jax.experimental import pallas as pl
from jax.experimental.pallas import tpu as pltpu

F32 = jnp.float32
# MXU operand dtype (accumulation stays f32 via preferred_element_type).
MXU_DTYPE = jnp.bfloat16

_LAYER_KEYS = ("ln1_g", "ln1_b", "wqkv", "wo", "bo",
               "ln2_g", "ln2_b", "w1", "b1", "w2", "b2")


# ----------------------------- in-kernel helpers ----------------------------

def _ln(x, g, b, eps=1e-5):
    mu = jnp.mean(x, axis=-1, keepdims=True)
    var = jnp.mean((x - mu) ** 2, axis=-1, keepdims=True)
    return (x - mu) * jax.lax.rsqrt(var + eps) * g + b


def _mm(a, b):
    return jnp.dot(a.astype(MXU_DTYPE), b.astype(MXU_DTYPE),
                   preferred_element_type=jnp.float32)


def _bmm(eq, a, b):
    return jnp.einsum(eq, a.astype(MXU_DTYPE), b.astype(MXU_DTYPE),
                      preferred_element_type=jnp.float32)


def _mm_nt_f32(a, b):
    # a @ b.T in full f32 (VQ distance path: keep the argmin exact).
    return jax.lax.dot_general(a, b, (((1,), (1,)), ((), ())),
                               preferred_element_type=jnp.float32)


def _mm_f32(a, b):
    return jax.lax.dot_general(a, b, (((1,), (0,)), ((), ())),
                               preferred_element_type=jnp.float32)


def _transformer_layer(x, ln1_g, ln1_b, wqkv, wo, bo, ln2_g, ln2_b,
                       w1, b1, w2, b2, *, heads, scale, slopes):
    """One x-transformers Encoder layer: pre-LN attn (+ALiBi) + pre-LN FFN."""
    n, d = x.shape

    # ---- attention ----
    h = _ln(x, ln1_g, ln1_b)
    # head-major batched QKV projection: (3*heads, n, dim_head); no lane slicing.
    hb = jnp.broadcast_to(h, (3 * heads, n, d))
    qkv = _bmm('zmd,zdk->zmk', hb, wqkv)
    q, k, v = qkv[:heads], qkv[heads:2 * heads], qkv[2 * heads:]

    s = _bmm('hqd,hkd->hqk', q, k) * scale              # (heads, n, n)

    # ALiBi bias built in-kernel from a 2-D iota; per-head slopes are Python
    # float splat constants (matches x-transformers for power-of-2 num heads).
    qi = jax.lax.broadcasted_iota(jnp.int32, (n, n), 0)
    kj = jax.lax.broadcasted_iota(jnp.int32, (n, n), 1)
    rel = -jnp.abs(kj - qi).astype(jnp.float32)         # (n, n)
    bias = jnp.concatenate([rel[None] * sl for sl in slopes], axis=0)
    s = s + bias

    s = s - jnp.max(s, axis=-1, keepdims=True)
    p = jnp.exp(s)
    p = p * pl.reciprocal(jnp.sum(p, axis=-1, keepdims=True), approx=True)

    attn = _bmm('hqk,hkd->hqd', p, v)                   # (heads, n, dim_head)
    oh = _bmm('hqd,hde->hqe', attn, wo)                 # (heads, n, d)
    x = x + jnp.sum(oh, axis=0) + bo                    # == concat(heads) @ Wo

    # ---- feed-forward ----
    h = _ln(x, ln2_g, ln2_b)
    h = _mm(h, w1) + b1
    # TODO(synk): PyTorch nn.GELU defaults to exact erf; tanh approximation used.
    h = jax.nn.gelu(h, approximate=True)
    return x + _mm(h, w2) + b2


# ------------------------------- Pallas kernels ------------------------------

def _encoder_vq_kernel(motion_ref, tokw_ref, tokb_ref,
                       ln1g_ref, ln1b_ref, wqkv_ref, wo_ref, bo_ref,
                       ln2g_ref, ln2b_ref, w1_ref, b1_ref, w2_ref, b2_ref,
                       fing_ref, finb_ref, nrmg_ref, nrmb_ref,
                       cb_ref, cb2_ref,
                       q_ref, idx_ref, loss_ref, x_scr,
                       *, heads, scale, slopes, inv_total):
    l = pl.program_id(1)

    @pl.when(l == 0)
    def _():
        # token_emb (LinearEmbedding); pos_emb == 0 (use_abs_pos_emb=False),
        # post_emb_norm / project_emb are identity, dropout is a no-op here.
        x_scr[...] = _mm(motion_ref[0], tokw_ref[...]) + tokb_ref[...]

    x = _transformer_layer(
        x_scr[...],
        ln1g_ref[0], ln1b_ref[0], wqkv_ref[0], wo_ref[0], bo_ref[0],
        ln2g_ref[0], ln2b_ref[0], w1_ref[0], b1_ref[0], w2_ref[0], b2_ref[0],
        heads=heads, scale=scale, slopes=slopes)
    x_scr[...] = x

    @pl.when(l == pl.num_programs(1) - 1)
    def _():
        # Encoder final LN + MotionTransformer LN, then nearest-codebook VQ.
        h = _ln(x, fing_ref[...], finb_ref[...])
        h = _ln(h, nrmg_ref[...], nrmb_ref[...])
        cb = cb_ref[...]                                 # (c, dim) codebook
        c = cb.shape[0]
        # argmin_j ||h_i - cb_j||^2 ; |h_i|^2 is row-constant -> dropped.
        # Distance path kept in f32 (bf16 could flip argmin for close codes).
        xe = _mm_nt_f32(h, cb)                           # (n, c)
        d2 = cb2_ref[...] - 2.0 * xe
        dmin = jnp.min(d2, axis=-1, keepdims=True)
        col = jax.lax.broadcasted_iota(jnp.int32, d2.shape, 1)
        # first index achieving the minimum (matches torch argmin tie-breaking)
        idx = jnp.min(jnp.where(d2 <= dmin, col, c), axis=-1, keepdims=True)
        idx_ref[0] = idx

        onehot = (col == idx).astype(jnp.float32)
        quant = _mm_f32(onehot, cb)                      # exact codebook rows
        q_ref[0] = quant

        # Commit loss partial for this batch element (mean over b*n*dim after
        # the wrapper-side sum; F.mse_loss default reduction='mean').
        diff = quant - h
        loss_ref[0] = jnp.sum(jnp.sum(diff * diff, axis=-1, keepdims=True),
                              axis=0, keepdims=True) * inv_total


def _decoder_kernel(qin_ref,
                    ln1g_ref, ln1b_ref, wqkv_ref, wo_ref, bo_ref,
                    ln2g_ref, ln2b_ref, w1_ref, b1_ref, w2_ref, b2_ref,
                    fing_ref, finb_ref, logw_ref, logb_ref,
                    out_ref, x_scr,
                    *, heads, scale, slopes):
    l = pl.program_id(1)

    @pl.when(l == 0)
    def _():
        x_scr[...] = qin_ref[0]

    x = _transformer_layer(
        x_scr[...],
        ln1g_ref[0], ln1b_ref[0], wqkv_ref[0], wo_ref[0], bo_ref[0],
        ln2g_ref[0], ln2b_ref[0], w1_ref[0], b1_ref[0], w2_ref[0], b2_ref[0],
        heads=heads, scale=scale, slopes=slopes)
    x_scr[...] = x

    @pl.when(l == pl.num_programs(1) - 1)
    def _():
        # Decoder's Encoder final LN fused with to_logit.
        h = _ln(x, fing_ref[...], finb_ref[...])
        out_ref[0] = _mm(h, logw_ref[...]) + logb_ref[...]


# ------------------------------ BlockSpec helpers ----------------------------

def _cspec(shape):
    """Full-array block, constant index (weight residency across grid steps)."""
    nd = len(shape)
    return pl.BlockSpec(tuple(shape), lambda bi, l, _n=nd: (0,) * _n)


def _lspec(shape):
    """Stacked-per-layer weight: block (1, rest...), indexed by the layer axis."""
    rest = tuple(shape[1:])
    nd = len(rest)
    return pl.BlockSpec((1,) + rest, lambda bi, l, _n=nd: (l,) + (0,) * _n)


def _bspec(shape):
    """Per-batch activation block: (1, rest...), indexed by the batch axis."""
    rest = tuple(shape[1:])
    nd = len(rest)
    return pl.BlockSpec((1,) + rest, lambda bi, l, _n=nd: (bi,) + (0,) * _n)


# ----------------------------- model forward pass ----------------------------

def alibi_slopes(heads, alibi_num_heads):
    # x-transformers AlibiPositionalBias slopes (exact for power-of-two
    # alibi_num_heads); zero bias on non-ALiBi heads.
    s = [2.0 ** (-8.0 / alibi_num_heads * (i + 1)) for i in range(alibi_num_heads)]
    return tuple(s + [0.0] * (heads - alibi_num_heads))


def vq_motion_model_forward(motion, params, *, heads, dim_head, alibi_num_heads):
    """Mirrors VQMotionModelPositional.forward(motion, mask=None)."""
    b, n, d_in = motion.shape
    dim = params["token_w"].shape[1]
    enc, dec = params["enc"], params["dec"]
    depth_e = enc["wqkv"].shape[0]
    depth_d = dec["wqkv"].shape[0]
    scale = dim_head ** -0.5
    slopes = alibi_slopes(heads, alibi_num_heads)

    cb = params["codebook"]
    csize = cb.shape[0]
    # codebook squared norms precomputed once (keeps the VQ kernel lean).
    cb2 = jnp.sum(cb * cb, axis=-1)[None, :]             # (1, c)

    cparams = pltpu.CompilerParams(
        dimension_semantics=("parallel", "arbitrary"))

    # --- MotionEncoder + VectorQuantization (one fused pallas_call) ---
    # TODO(synk): EMA decay, kmeans init and dead-code expiry are training-time
    # codebook-state updates with no forward-pass compute; not implemented.
    enc_kern = functools.partial(
        _encoder_vq_kernel, heads=heads, scale=scale, slopes=slopes,
        inv_total=1.0 / float(b * n * dim))
    quant, idx, loss_part = pl.pallas_call(
        enc_kern,
        out_shape=(jax.ShapeDtypeStruct((b, n, dim), F32),
                   jax.ShapeDtypeStruct((b, n, 1), jnp.int32),
                   jax.ShapeDtypeStruct((b, 1, 1), F32)),
        grid=(b, depth_e),
        in_specs=[_bspec((b, n, d_in)),
                  _cspec((d_in, dim)), _cspec((1, dim))]
                 + [_lspec(enc[k].shape) for k in _LAYER_KEYS]
                 + [_cspec((1, dim))] * 4
                 + [_cspec((csize, dim)), _cspec((1, csize))],
        out_specs=(_bspec((b, n, dim)), _bspec((b, n, 1)), _bspec((b, 1, 1))),
        scratch_shapes=[pltpu.VMEM((n, dim), F32)],
        compiler_params=cparams,
    )(motion, params["token_w"], params["token_b"],
      *[enc[k] for k in _LAYER_KEYS],
      params["enc_final_g"], params["enc_final_b"],
      params["enc_norm_g"], params["enc_norm_b"],
      cb, cb2)

    # --- MotionDecoder (one fused pallas_call) ---
    dec_kern = functools.partial(_decoder_kernel, heads=heads, scale=scale,
                                 slopes=slopes)
    logits = pl.pallas_call(
        dec_kern,
        out_shape=jax.ShapeDtypeStruct((b, n, d_in), F32),
        grid=(b, depth_d),
        in_specs=[_bspec((b, n, dim))]
                 + [_lspec(dec[k].shape) for k in _LAYER_KEYS]
                 + [_cspec((1, dim)), _cspec((1, dim)),
                    _cspec((dim, d_in)), _cspec((1, d_in))],
        out_specs=_bspec((b, n, d_in)),
        scratch_shapes=[pltpu.VMEM((n, dim), F32)],
        compiler_params=cparams,
    )(quant, *[dec[k] for k in _LAYER_KEYS],
      params["dec_final_g"], params["dec_final_b"],
      params["logit_w"], params["logit_b"])

    # forward() returns (decoded, indices, commit_loss.sum())
    return logits, idx[..., 0], jnp.sum(loss_part)


# --------------------------------- Param init --------------------------------

def init_layer_stack(key, depth, dim, heads, dim_head, ff_mult, std=0.02):
    hidden = dim * ff_mult
    ks = jax.random.split(key, 4)
    return dict(
        ln1_g=jnp.ones((depth, 1, dim), F32), ln1_b=jnp.zeros((depth, 1, dim), F32),
        # q|k|v projection weights, head-major: (depth, 3*heads, dim, dim_head)
        wqkv=jax.random.normal(ks[0], (depth, 3 * heads, dim, dim_head), F32) * std,
        # per-head output projection: (depth, heads, dim_head, dim)
        wo=jax.random.normal(ks[1], (depth, heads, dim_head, dim), F32) * std,
        bo=jnp.zeros((depth, 1, dim), F32),
        ln2_g=jnp.ones((depth, 1, dim), F32), ln2_b=jnp.zeros((depth, 1, dim), F32),
        w1=jax.random.normal(ks[2], (depth, dim, hidden), F32) * std,
        b1=jnp.zeros((depth, 1, hidden), F32),
        w2=jax.random.normal(ks[3], (depth, hidden, dim), F32) * std,
        b2=jnp.zeros((depth, 1, dim), F32),
    )


if __name__ == "__main__":
    # Small synthetic config (args.*): motion_dim=8, max_seq_length=16,
    # enc_dec_dim=32, depth=2, heads=4 (alibi_num_heads=4),
    # codebook_dim=32 (== enc_dec_dim), codebook_size=64.
    B, N = 2, 16
    motion_dim = 8
    dim = 32
    depth = 2
    heads = 4
    dim_head = 16
    alibi_num_heads = 4
    ff_mult = 4
    codebook_size = 64

    key = jax.random.PRNGKey(0)
    k_in, k_tok, k_enc, k_dec, k_cb, k_log = jax.random.split(key, 6)

    motion = jax.random.normal(k_in, (B, N, motion_dim), F32)

    params = dict(
        # token_emb: kaiming_normal_ (fan_in = motion_dim)
        token_w=jax.random.normal(k_tok, (motion_dim, dim), F32)
                * (2.0 / motion_dim) ** 0.5,
        token_b=jnp.zeros((1, dim), F32),
        enc=init_layer_stack(k_enc, depth, dim, heads, dim_head, ff_mult),
        enc_final_g=jnp.ones((1, dim), F32), enc_final_b=jnp.zeros((1, dim), F32),
        enc_norm_g=jnp.ones((1, dim), F32), enc_norm_b=jnp.zeros((1, dim), F32),
        codebook=jax.random.normal(k_cb, (codebook_size, dim), F32),
        dec=init_layer_stack(k_dec, depth, dim, heads, dim_head, ff_mult),
        dec_final_g=jnp.ones((1, dim), F32), dec_final_b=jnp.zeros((1, dim), F32),
        logit_w=jax.random.normal(k_log, (dim, motion_dim), F32) * 0.02,
        logit_b=jnp.zeros((1, motion_dim), F32),
    )

    fwd = jax.jit(functools.partial(vq_motion_model_forward, heads=heads,
                                    dim_head=dim_head,
                                    alibi_num_heads=alibi_num_heads))
    decoded, indices, commit_loss = fwd(motion, params)
    jax.block_until_ready((decoded, indices, commit_loss))

    assert decoded.shape == (B, N, motion_dim)
    assert indices.shape == (B, N)
    assert commit_loss.shape == ()
    print("KERNEL_OK")
</pallas_src>

<mosaic_0001>
module attributes {stable_mosaic.version = 11 : i64} {
  func.func @_encoder_vq_kernel(%arg0: i32, %arg1: i32, %arg2: memref<1x16x8xf32, #tpu.memory_space<vmem>>, %arg3: memref<8x32xf32, #tpu.memory_space<vmem>>, %arg4: memref<1x32xf32, #tpu.memory_space<vmem>>, %arg5: memref<1x1x32xf32, #tpu.memory_space<vmem>>, %arg6: memref<1x1x32xf32, #tpu.memory_space<vmem>>, %arg7: memref<1x12x32x16xf32, #tpu.memory_space<vmem>>, %arg8: memref<1x4x16x32xf32, #tpu.memory_space<vmem>>, %arg9: memref<1x1x32xf32, #tpu.memory_space<vmem>>, %arg10: memref<1x1x32xf32, #tpu.memory_space<vmem>>, %arg11: memref<1x1x32xf32, #tpu.memory_space<vmem>>, %arg12: memref<1x32x128xf32, #tpu.memory_space<vmem>>, %arg13: memref<1x1x128xf32, #tpu.memory_space<vmem>>, %arg14: memref<1x128x32xf32, #tpu.memory_space<vmem>>, %arg15: memref<1x1x32xf32, #tpu.memory_space<vmem>>, %arg16: memref<1x32xf32, #tpu.memory_space<vmem>>, %arg17: memref<1x32xf32, #tpu.memory_space<vmem>>, %arg18: memref<1x32xf32, #tpu.memory_space<vmem>>, %arg19: memref<1x32xf32, #tpu.memory_space<vmem>>, %arg20: memref<64x32xf32, #tpu.memory_space<vmem>>, %arg21: memref<1x64xf32, #tpu.memory_space<vmem>>, %arg22: memref<1x16x32xf32, #tpu.memory_space<vmem>>, %arg23: memref<1x16x1xi32, #tpu.memory_space<vmem>>, %arg24: memref<1x1x1xf32, #tpu.memory_space<vmem>>, %arg25: memref<16x32xf32, #tpu.memory_space<vmem>>) attributes {dimension_semantics = [#tpu.dimension_semantics<parallel>, #tpu.dimension_semantics<arbitrary>], iteration_bounds = array<i64: 2, 2>, scalar_prefetch = 0 : i64, scratch_operands = 1 : i64, tpu.core_type = #tpu.core_type<tc>, window_params = [{transform_indices = @transform_0, window_bounds = array<i64: 1, 16, 8>}, {pipeline_mode = #tpu.pipeline_mode<synchronous>, transform_indices = @transform_1, window_bounds = array<i64: 8, 32>}, {pipeline_mode = #tpu.pipeline_mode<synchronous>, transform_indices = @transform_2, window_bounds = array<i64: 1, 32>}, {transform_indices = @transform_3, window_bounds = array<i64: 1, 1, 32>}, {transform_indices = @transform_4, window_bounds = array<i64: 1, 1, 32>}, {transform_indices = @transform_5, window_bounds = array<i64: 1, 12, 32, 16>}, {transform_indices = @transform_6, window_bounds = array<i64: 1, 4, 16, 32>}, {transform_indices = @transform_7, window_bounds = array<i64: 1, 1, 32>}, {transform_indices = @transform_8, window_bounds = array<i64: 1, 1, 32>}, {transform_indices = @transform_9, window_bounds = array<i64: 1, 1, 32>}, {transform_indices = @transform_10, window_bounds = array<i64: 1, 32, 128>}, {transform_indices = @transform_11, window_bounds = array<i64: 1, 1, 128>}, {transform_indices = @transform_12, window_bounds = array<i64: 1, 128, 32>}, {transform_indices = @transform_13, window_bounds = array<i64: 1, 1, 32>}, {pipeline_mode = #tpu.pipeline_mode<synchronous>, transform_indices = @transform_14, window_bounds = array<i64: 1, 32>}, {pipeline_mode = #tpu.pipeline_mode<synchronous>, transform_indices = @transform_15, window_bounds = array<i64: 1, 32>}, {pipeline_mode = #tpu.pipeline_mode<synchronous>, transform_indices = @transform_16, window_bounds = array<i64: 1, 32>}, {pipeline_mode = #tpu.pipeline_mode<synchronous>, transform_indices = @transform_17, window_bounds = array<i64: 1, 32>}, {pipeline_mode = #tpu.pipeline_mode<synchronous>, transform_indices = @transform_18, window_bounds = array<i64: 64, 32>}, {pipeline_mode = #tpu.pipeline_mode<synchronous>, transform_indices = @transform_19, window_bounds = array<i64: 1, 64>}, {transform_indices = @transform_20, window_bounds = array<i64: 1, 16, 32>}, {transform_indices = @transform_21, window_bounds = array<i64: 1, 16, 1>}, {transform_indices = @transform_22, window_bounds = array<i64: 1, 1, 1>}]} {
    %c0_i32 = arith.constant 0 : i32
    %0 = arith.cmpi eq, %arg1, %c0_i32 : i32
    %1 = arith.extui %0 : i1 to i32
    %c0_i32_0 = arith.constant 0 : i32
    %2 = arith.cmpi ne, %1, %c0_i32_0 : i32
    scf.if %2 {
      %c0_68 = arith.constant 0 : index
      %c0_69 = arith.constant 0 : index
      %c0_70 = arith.constant 0 : index
      %152 = vector.load %arg2[%c0_68, %c0_69, %c0_70] : memref<1x16x8xf32, #tpu.memory_space<vmem>>, vector<1x16x8xf32>
      %153 = vector.shape_cast %152 : vector<1x16x8xf32> to vector<16x8xf32>
      %c0_71 = arith.constant 0 : index
      %c0_72 = arith.constant 0 : index
      %154 = vector.load %arg3[%c0_71, %c0_72] : memref<8x32xf32, #tpu.memory_space<vmem>>, vector<8x32xf32>
      %155 = arith.truncf %153 : vector<16x8xf32> to vector<16x8xbf16>
      %156 = arith.truncf %154 : vector<8x32xf32> to vector<8x32xbf16>
      %cst_73 = arith.constant dense<0.000000e+00> : vector<16x32xf32>
      %157 = tpu.matmul %155, %156, %cst_73 {dimension_numbers = #tpu.dot_dimension_numbers<[1], [0], [0], [1], [0, 0, 1, 1], [], []>} : vector<16x8xbf16>, vector<8x32xbf16>, vector<16x32xf32> -> vector<16x32xf32>
      %c0_74 = arith.constant 0 : index
      %c0_75 = arith.constant 0 : index
      %158 = vector.load %arg4[%c0_74, %c0_75] : memref<1x32xf32, #tpu.memory_space<vmem>>, vector<1x32xf32>
      %159 = vector.broadcast %158 : vector<1x32xf32> to vector<16x32xf32>
      %160 = arith.addf %157, %159 : vector<16x32xf32>
      %c0_76 = arith.constant 0 : index
      %c0_77 = arith.constant 0 : index
      %161 = vector.load %arg25[%c0_76, %c0_77] : memref<16x32xf32, #tpu.memory_space<vmem>>, vector<16x32xf32>
      tpu.vector_store %arg25[%c0_76, %c0_77], %160 {strides = array<i32>} : memref<16x32xf32, #tpu.memory_space<vmem>>, vector<16x32xf32>,
    } else {
    }
    %c0 = arith.constant 0 : index
    %c0_1 = arith.constant 0 : index
    %3 = vector.load %arg25[%c0, %c0_1] : memref<16x32xf32, #tpu.memory_space<vmem>>, vector<16x32xf32>
    %c0_2 = arith.constant 0 : index
    %c0_3 = arith.constant 0 : index
    %c0_4 = arith.constant 0 : index
    %4 = vector.load %arg5[%c0_2, %c0_3, %c0_4] : memref<1x1x32xf32, #tpu.memory_space<vmem>>, vector<1x1x32xf32>
    %5 = vector.shape_cast %4 : vector<1x1x32xf32> to vector<1x32xf32>
    %c0_5 = arith.constant 0 : index
    %c0_6 = arith.constant 0 : index
    %c0_7 = arith.constant 0 : index
    %6 = vector.load %arg6[%c0_5, %c0_6, %c0_7] : memref<1x1x32xf32, #tpu.memory_space<vmem>>, vector<1x1x32xf32>
    %7 = vector.shape_cast %6 : vector<1x1x32xf32> to vector<1x32xf32>
    %c0_8 = arith.constant 0 : index
    %c0_9 = arith.constant 0 : index
    %c0_10 = arith.constant 0 : index
    %c0_11 = arith.constant 0 : index
    %8 = vector.load %arg7[%c0_8, %c0_9, %c0_10, %c0_11] : memref<1x12x32x16xf32, #tpu.memory_space<vmem>>, vector<1x12x32x16xf32>
    %9 = vector.shape_cast %8 : vector<1x12x32x16xf32> to vector<12x32x16xf32>
    %c0_12 = arith.constant 0 : index
    %c0_13 = arith.constant 0 : index
    %c0_14 = arith.constant 0 : index
    %c0_15 = arith.constant 0 : index
    %10 = vector.load %arg8[%c0_12, %c0_13, %c0_14, %c0_15] : memref<1x4x16x32xf32, #tpu.memory_space<vmem>>, vector<1x4x16x32xf32>
    %11 = vector.shape_cast %10 : vector<1x4x16x32xf32> to vector<4x16x32xf32>
    %c0_16 = arith.constant 0 : index
    %c0_17 = arith.constant 0 : index
    %c0_18 = arith.constant 0 : index
    %12 = vector.load %arg9[%c0_16, %c0_17, %c0_18] : memref<1x1x32xf32, #tpu.memory_space<vmem>>, vector<1x1x32xf32>
    %13 = vector.shape_cast %12 : vector<1x1x32xf32> to vector<1x32xf32>
    %c0_19 = arith.constant 0 : index
    %c0_20 = arith.constant 0 : index
    %c0_21 = arith.constant 0 : index
    %14 = vector.load %arg10[%c0_19, %c0_20, %c0_21] : memref<1x1x32xf32, #tpu.memory_space<vmem>>, vector<1x1x32xf32>
    %15 = vector.shape_cast %14 : vector<1x1x32xf32> to vector<1x32xf32>
    %c0_22 = arith.constant 0 : index
    %c0_23 = arith.constant 0 : index
    %c0_24 = arith.constant 0 : index
    %16 = vector.load %arg11[%c0_22, %c0_23, %c0_24] : memref<1x1x32xf32, #tpu.memory_space<vmem>>, vector<1x1x32xf32>
    %17 = vector.shape_cast %16 : vector<1x1x32xf32> to vector<1x32xf32>
    %c0_25 = arith.constant 0 : index
    %c0_26 = arith.constant 0 : index
    %c0_27 = arith.constant 0 : index
    %18 = vector.load %arg12[%c0_25, %c0_26, %c0_27] : memref<1x32x128xf32, #tpu.memory_space<vmem>>, vector<1x32x128xf32>
    %19 = vector.shape_cast %18 : vector<1x32x128xf32> to vector<32x128xf32>
    %c0_28 = arith.constant 0 : index
    %c0_29 = arith.constant 0 : index
    %c0_30 = arith.constant 0 : index
    %20 = vector.load %arg13[%c0_28, %c0_29, %c0_30] : memref<1x1x128xf32, #tpu.memory_space<vmem>>, vector<1x1x128xf32>
    %21 = vector.shape_cast %20 : vector<1x1x128xf32> to vector<1x128xf32>
    %c0_31 = arith.constant 0 : index
    %c0_32 = arith.constant 0 : index
    %c0_33 = arith.constant 0 : index
    %22 = vector.load %arg14[%c0_31, %c0_32, %c0_33] : memref<1x128x32xf32, #tpu.memory_space<vmem>>, vector<1x128x32xf32>
    %23 = vector.shape_cast %22 : vector<1x128x32xf32> to vector<128x32xf32>
    %c0_34 = arith.constant 0 : index
    %c0_35 = arith.constant 0 : index
    %c0_36 = arith.constant 0 : index
    %24 = vector.load %arg15[%c0_34, %c0_35, %c0_36] : memref<1x1x32xf32, #tpu.memory_space<vmem>>, vector<1x1x32xf32>
    %25 = vector.shape_cast %24 : vector<1x1x32xf32> to vector<1x32xf32>
    %cst = arith.constant dense<0.000000e+00> : vector<16xf32>
    %26 = vector.multi_reduction <add>, %3, %cst [1] : vector<16x32xf32> to vector<16xf32>
    %27 = vector.shape_cast %26 : vector<16xf32> to vector<16x1xf32>
    %cst_37 = arith.constant 3.200000e+01 : f32
    %28 = vector.broadcast %cst_37 : f32 to vector<16x1xf32>
    %29 = arith.divf %27, %28 : vector<16x1xf32>
    %30 = vector.broadcast %29 : vector<16x1xf32> to vector<16x32xf32>
    %31 = arith.subf %3, %30 : vector<16x32xf32>
    %32 = arith.mulf %31, %31 : vector<16x32xf32>
    %cst_38 = arith.constant dense<0.000000e+00> : vector<16xf32>
    %33 = vector.multi_reduction <add>, %32, %cst_38 [1] : vector<16x32xf32> to vector<16xf32>
    %34 = vector.shape_cast %33 : vector<16xf32> to vector<16x1xf32>
    %cst_39 = arith.constant 3.200000e+01 : f32
    %35 = vector.broadcast %cst_39 : f32 to vector<16x1xf32>
    %36 = arith.divf %34, %35 : vector<16x1xf32>
    %37 = vector.broadcast %29 : vector<16x1xf32> to vector<16x32xf32>
    %38 = arith.subf %3, %37 : vector<16x32xf32>
    %cst_40 = arith.constant 9.99999974E-6 : f32
    %39 = vector.broadcast %cst_40 : f32 to vector<16x1xf32>
    %40 = arith.addf %36, %39 : vector<16x1xf32>
    %41 = math.rsqrt %40 : vector<16x1xf32>
    %42 = vector.broadcast %41 : vector<16x1xf32> to vector<16x32xf32>
    %43 = arith.mulf %38, %42 : vector<16x32xf32>
    %44 = vector.broadcast %5 : vector<1x32xf32> to vector<16x32xf32>
    %45 = arith.mulf %43, %44 : vector<16x32xf32>
    %46 = vector.broadcast %7 : vector<1x32xf32> to vector<16x32xf32>
    %47 = arith.addf %45, %46 : vector<16x32xf32>
    %48 = vector.shape_cast %47 : vector<16x32xf32> to vector<1x16x32xf32>
    %49 = vector.broadcast %48 : vector<1x16x32xf32> to vector<12x16x32xf32>
    %50 = arith.truncf %49 : vector<12x16x32xf32> to vector<12x16x32xbf16>
    %51 = arith.truncf %9 : vector<12x32x16xf32> to vector<12x32x16xbf16>
    "tpu.trace_start"() <{level = 10 : i32, message = "zmd,zdk->zmk"}> : () -> ()
    %cst_41 = arith.constant dense<0.000000e+00> : vector<12x16x16xf32>
    %52 = tpu.matmul %50, %51, %cst_41 {dimension_numbers = #tpu.dot_dimension_numbers<[2], [1], [1], [2], [0, 0, 0, 1, 1, 2], [0], [0]>} : vector<12x16x32xbf16>, vector<12x32x16xbf16>, vector<12x16x16xf32> -> vector<12x16x16xf32>
    "tpu.trace_stop"() : () -> ()
    %53 = vector.extract_strided_slice %52 {offsets = [0, 0, 0], sizes = [4, 16, 16], strides = [1, 1, 1]} : vector<12x16x16xf32> to vector<4x16x16xf32>
    %54 = vector.extract_strided_slice %52 {offsets = [4, 0, 0], sizes = [4, 16, 16], strides = [1, 1, 1]} : vector<12x16x16xf32> to vector<4x16x16xf32>
    %55 = vector.extract_strided_slice %52 {offsets = [8, 0, 0], sizes = [4, 16, 16], strides = [1, 1, 1]} : vector<12x16x16xf32> to vector<4x16x16xf32>
    %56 = arith.truncf %53 : vector<4x16x16xf32> to vector<4x16x16xbf16>
    %57 = arith.truncf %54 : vector<4x16x16xf32> to vector<4x16x16xbf16>
    "tpu.trace_start"() <{level = 10 : i32, message = "hqd,hkd->hqk"}> : () -> ()
    %cst_42 = arith.constant dense<0.000000e+00> : vector<4x16x16xf32>
    %58 = tpu.matmul %56, %57, %cst_42 {dimension_numbers = #tpu.dot_dimension_numbers<[2], [2], [1], [1], [0, 0, 0, 1, 1, 1], [0], [0]>} : vector<4x16x16xbf16>, vector<4x16x16xbf16>, vector<4x16x16xf32> -> vector<4x16x16xf32>
    "tpu.trace_stop"() : () -> ()
    %cst_43 = arith.constant 2.500000e-01 : f32
    %59 = vector.broadcast %cst_43 : f32 to vector<4x16x16xf32>
    %60 = arith.mulf %58, %59 : vector<4x16x16xf32>
    %61 = tpu.iota {dimensions = array<i32: 0>} : vector<16x16xi32>
    %62 = tpu.iota {dimensions = array<i32: 1>} : vector<16x16xi32>
    %63 = arith.subi %62, %61 : vector<16x16xi32>
    %64 = math.absi %63 : vector<16x16xi32>
    %65 = arith.sitofp %64 : vector<16x16xi32> to vector<16x16xf32>
    %cst_44 = arith.constant 0.000000e+00 : f32
    %66 = vector.broadcast %cst_44 : f32 to vector<16x16xf32>
    %67 = arith.subf %66, %65 : vector<16x16xf32>
    %68 = vector.shape_cast %67 : vector<16x16xf32> to vector<1x16x16xf32>
    %cst_45 = arith.constant 2.500000e-01 : f32
    %69 = vector.broadcast %cst_45 : f32 to vector<1x16x16xf32>
    %70 = arith.mulf %68, %69 : vector<1x16x16xf32>
    %71 = vector.shape_cast %67 : vector<16x16xf32> to vector<1x16x16xf32>
    %cst_46 = arith.constant 6.250000e-02 : f32
    %72 = vector.broadcast %cst_46 : f32 to vector<1x16x16xf32>
    %73 = arith.mulf %71, %72 : vector<1x16x16xf32>
    %74 = vector.shape_cast %67 : vector<16x16xf32> to vector<1x16x16xf32>
    %cst_47 = arith.constant 1.562500e-02 : f32
    %75 = vector.broadcast %cst_47 : f32 to vector<1x16x16xf32>
    %76 = arith.mulf %74, %75 : vector<1x16x16xf32>
    %77 = vector.shape_cast %67 : vector<16x16xf32> to vector<1x16x16xf32>
    %cst_48 = arith.constant 3.906250e-03 : f32
    %78 = vector.broadcast %cst_48 : f32 to vector<1x16x16xf32>
    %79 = arith.mulf %77, %78 : vector<1x16x16xf32>
    %80 = tpu.concatenate %70, %73, %76, %79 in 0 : vector<1x16x16xf32>, vector<1x16x16xf32>, vector<1x16x16xf32>, vector<1x16x16xf32> -> vector<4x16x16xf32>
    %81 = arith.addf %60, %80 : vector<4x16x16xf32>
    %cst_49 = arith.constant dense<0xFF800000> : vector<4x16xf32>
    %82 = vector.multi_reduction <maximumf>, %81, %cst_49 [2] : vector<4x16x16xf32> to vector<4x16xf32>
    %83 = vector.shape_cast %82 : vector<4x16xf32> to vector<4x16x1xf32>
    %84 = vector.broadcast %83 : vector<4x16x1xf32> to vector<4x16x16xf32>
    %85 = arith.subf %81, %84 : vector<4x16x16xf32>
    %86 = math.exp %85 : vector<4x16x16xf32>
    %cst_50 = arith.constant dense<0.000000e+00> : vector<4x16xf32>
    %87 = vector.multi_reduction <add>, %86, %cst_50 [2] : vector<4x16x16xf32> to vector<4x16xf32>
    %88 = vector.shape_cast %87 : vector<4x16xf32> to vector<4x16x1xf32>
    %89 = tpu.reciprocal %88 {approx = true} : vector<4x16x1xf32> -> vector<4x16x1xf32>
    %90 = vector.broadcast %89 : vector<4x16x1xf32> to vector<4x16x16xf32>
    %91 = arith.mulf %86, %90 : vector<4x16x16xf32>
    %92 = arith.truncf %91 : vector<4x16x16xf32> to vector<4x16x16xbf16>
    %93 = arith.truncf %55 : vector<4x16x16xf32> to vector<4x16x16xbf16>
    "tpu.trace_start"() <{level = 10 : i32, message = "hqk,hkd->hqd"}> : () -> ()
    %cst_51 = arith.constant dense<0.000000e+00> : vector<4x16x16xf32>
    %94 = tpu.matmul %92, %93, %cst_51 {dimension_numbers = #tpu.dot_dimension_numbers<[2], [1], [1], [2], [0, 0, 0, 1, 1, 2], [0], [0]>} : vector<4x16x16xbf16>, vector<4x16x16xbf16>, vector<4x16x16xf32> -> vector<4x16x16xf32>
    "tpu.trace_stop"() : () -> ()
    %95 = arith.truncf %94 : vector<4x16x16xf32> to vector<4x16x16xbf16>
    %96 = arith.truncf %11 : vector<4x16x32xf32> to vector<4x16x32xbf16>
    "tpu.trace_start"() <{level = 10 : i32, message = "hqd,hde->hqe"}> : () -> ()
    %cst_52 = arith.constant dense<0.000000e+00> : vector<4x16x32xf32>
    %97 = tpu.matmul %95, %96, %cst_52 {dimension_numbers = #tpu.dot_dimension_numbers<[2], [1], [1], [2], [0, 0, 0, 1, 1, 2], [0], [0]>} : vector<4x16x16xbf16>, vector<4x16x32xbf16>, vector<4x16x32xf32> -> vector<4x16x32xf32>
    "tpu.trace_stop"() : () -> ()
    %cst_53 = arith.constant dense<0.000000e+00> : vector<16x32xf32>
    %98 = vector.multi_reduction <add>, %97, %cst_53 [0] : vector<4x16x32xf32> to vector<16x32xf32>
    %99 = arith.addf %3, %98 : vector<16x32xf32>
    %100 = vector.broadcast %13 : vector<1x32xf32> to vector<16x32xf32>
    %101 = arith.addf %99, %100 : vector<16x32xf32>
    %cst_54 = arith.constant dense<0.000000e+00> : vector<16xf32>
    %102 = vector.multi_reduction <add>, %101, %cst_54 [1] : vector<16x32xf32> to vector<16xf32>
    %103 = vector.shape_cast %102 : vector<16xf32> to vector<16x1xf32>
    %cst_55 = arith.constant 3.200000e+01 : f32
    %104 = vector.broadcast %cst_55 : f32 to vector<16x1xf32>
    %105 = arith.divf %103, %104 : vector<16x1xf32>
    %106 = vector.broadcast %105 : vector<16x1xf32> to vector<16x32xf32>
    %107 = arith.subf %101, %106 : vector<16x32xf32>
    %108 = arith.mulf %107, %107 : vector<16x32xf32>
    %cst_56 = arith.constant dense<0.000000e+00> : vector<16xf32>
    %109 = vector.multi_reduction <add>, %108, %cst_56 [1] : vector<16x32xf32> to vector<16xf32>
    %110 = vector.shape_cast %109 : vector<16xf32> to vector<16x1xf32>
    %cst_57 = arith.constant 3.200000e+01 : f32
    %111 = vector.broadcast %cst_57 : f32 to vector<16x1xf32>
    %112 = arith.divf %110, %111 : vector<16x1xf32>
    %113 = vector.broadcast %105 : vector<16x1xf32> to vector<16x32xf32>
    %114 = arith.subf %101, %113 : vector<16x32xf32>
    %cst_58 = arith.constant 9.99999974E-6 : f32
    %115 = vector.broadcast %cst_58 : f32 to vector<16x1xf32>
    %116 = arith.addf %112, %115 : vector<16x1xf32>
    %117 = math.rsqrt %116 : vector<16x1xf32>
    %118 = vector.broadcast %117 : vector<16x1xf32> to vector<16x32xf32>
    %119 = arith.mulf %114, %118 : vector<16x32xf32>
    %120 = vector.broadcast %15 : vector<1x32xf32> to vector<16x32xf32>
    %121 = arith.mulf %119, %120 : vector<16x32xf32>
    %122 = vector.broadcast %17 : vector<1x32xf32> to vector<16x32xf32>
    %123 = arith.addf %121, %122 : vector<16x32xf32>
    %124 = arith.truncf %123 : vector<16x32xf32> to vector<16x32xbf16>
    %125 = arith.truncf %19 : vector<32x128xf32> to vector<32x128xbf16>
    %cst_59 = arith.constant dense<0.000000e+00> : vector<16x128xf32>
    %126 = tpu.matmul %124, %125, %cst_59 {dimension_numbers = #tpu.dot_dimension_numbers<[1], [0], [0], [1], [0, 0, 1, 1], [], []>} : vector<16x32xbf16>, vector<32x128xbf16>, vector<16x128xf32> -> vector<16x128xf32>
    %127 = vector.broadcast %21 : vector<1x128xf32> to vector<16x128xf32>
    %128 = arith.addf %126, %127 : vector<16x128xf32>
    %129 = arith.mulf %128, %128 : vector<16x128xf32>
    %130 = arith.mulf %128, %129 : vector<16x128xf32>
    %cst_60 = arith.constant 4.471500e-02 : f32
    %131 = vector.broadcast %cst_60 : f32 to vector<16x128xf32>
    %132 = arith.mulf %131, %130 : vector<16x128xf32>
    %133 = arith.addf %128, %132 : vector<16x128xf32>
    %cst_61 = arith.constant 0.797884583 : f32
    %134 = vector.broadcast %cst_61 : f32 to vector<16x128xf32>
    %135 = arith.mulf %134, %133 : vector<16x128xf32>
    %136 = math.tanh %135 : vector<16x128xf32>
    %cst_62 = arith.constant 1.000000e+00 : f32
    %137 = vector.broadcast %cst_62 : f32 to vector<16x128xf32>
    %138 = arith.addf %137, %136 : vector<16x128xf32>
    %cst_63 = arith.constant 5.000000e-01 : f32
    %139 = vector.broadcast %cst_63 : f32 to vector<16x128xf32>
    %140 = arith.mulf %139, %138 : vector<16x128xf32>
    %141 = arith.mulf %128, %140 : vector<16x128xf32>
    %142 = arith.truncf %141 : vector<16x128xf32> to vector<16x128xbf16>
    %143 = arith.truncf %23 : vector<128x32xf32> to vector<128x32xbf16>
    %cst_64 = arith.constant dense<0.000000e+00> : vector<16x32xf32>
    %144 = tpu.matmul %142, %143, %cst_64 {dimension_numbers = #tpu.dot_dimension_numbers<[1], [0], [0], [1], [0, 0, 1, 1], [], []>} : vector<16x128xbf16>, vector<128x32xbf16>, vector<16x32xf32> -> vector<16x32xf32>
    %145 = arith.addf %101, %144 : vector<16x32xf32>
    %146 = vector.broadcast %25 : vector<1x32xf32> to vector<16x32xf32>
    %147 = arith.addf %145, %146 : vector<16x32xf32>
    %c0_65 = arith.constant 0 : index
    %c0_66 = arith.constant 0 : index
    %148 = vector.load %arg25[%c0_65, %c0_66] : memref<16x32xf32, #tpu.memory_space<vmem>>, vector<16x32xf32>
    tpu.vector_store %arg25[%c0_65, %c0_66], %147 {strides = array<i32>} : memref<16x32xf32, #tpu.memory_space<vmem>>, vector<16x32xf32>,
    %c1_i32 = arith.constant 1 : i32
    %149 = arith.cmpi eq, %arg1, %c1_i32 : i32
    %150 = arith.extui %149 : i1 to i32
    %c0_i32_67 = arith.constant 0 : i32
    %151 = arith.cmpi ne, %150, %c0_i32_67 : i32
    scf.if %151 {
      %c0_68 = arith.constant 0 : index
      %c0_69 = arith.constant 0 : index
      %152 = vector.load %arg16[%c0_68, %c0_69] : memref<1x32xf32, #tpu.memory_space<vmem>>, vector<1x32xf32>
      %c0_70 = arith.constant 0 : index
      %c0_71 = arith.constant 0 : index
      %153 = vector.load %arg17[%c0_70, %c0_71] : memref<1x32xf32, #tpu.memory_space<vmem>>, vector<1x32xf32>
      %cst_72 = arith.constant dense<0.000000e+00> : vector<16xf32>
      %154 = vector.multi_reduction <add>, %147, %cst_72 [1] : vector<16x32xf32> to vector<16xf32>
      %155 = vector.shape_cast %154 : vector<16xf32> to vector<16x1xf32>
      %cst_73 = arith.constant 3.200000e+01 : f32
      %156 = vector.broadcast %cst_73 : f32 to vector<16x1xf32>
      %157 = arith.divf %155, %156 : vector<16x1xf32>
      %158 = vector.broadcast %157 : vector<16x1xf32> to vector<16x32xf32>
      %159 = arith.subf %147, %158 : vector<16x32xf32>
      %160 = arith.mulf %159, %159 : vector<16x32xf32>
      %cst_74 = arith.constant dense<0.000000e+00> : vector<16xf32>
      %161 = vector.multi_reduction <add>, %160, %cst_74 [1] : vector<16x32xf32> to vector<16xf32>
      %162 = vector.shape_cast %161 : vector<16xf32> to vector<16x1xf32>
      %cst_75 = arith.constant 3.200000e+01 : f32
      %163 = vector.broadcast %cst_75 : f32 to vector<16x1xf32>
      %164 = arith.divf %162, %163 : vector<16x1xf32>
      %165 = vector.broadcast %157 : vector<16x1xf32> to vector<16x32xf32>
      %166 = arith.subf %147, %165 : vector<16x32xf32>
      %cst_76 = arith.constant 9.99999974E-6 : f32
      %167 = vector.broadcast %cst_76 : f32 to vector<16x1xf32>
      %168 = arith.addf %164, %167 : vector<16x1xf32>
      %169 = math.rsqrt %168 : vector<16x1xf32>
      %170 = vector.broadcast %169 : vector<16x1xf32> to vector<16x32xf32>
      %171 = arith.mulf %166, %170 : vector<16x32xf32>
      %172 = vector.broadcast %152 : vector<1x32xf32> to vector<16x32xf32>
      %173 = arith.mulf %171, %172 : vector<16x32xf32>
      %174 = vector.broadcast %153 : vector<1x32xf32> to vector<16x32xf32>
      %175 = arith.addf %173, %174 : vector<16x32xf32>
      %c0_77 = arith.constant 0 : index
      %c0_78 = arith.constant 0 : index
      %176 = vector.load %arg18[%c0_77, %c0_78] : memref<1x32xf32, #tpu.memory_space<vmem>>, vector<1x32xf32>
      %c0_79 = arith.constant 0 : index
      %c0_80 = arith.constant 0 : index
      %177 = vector.load %arg19[%c0_79, %c0_80] : memref<1x32xf32, #tpu.memory_space<vmem>>, vector<1x32xf32>
      %cst_81 = arith.constant dense<0.000000e+00> : vector<16xf32>
      %178 = vector.multi_reduction <add>, %175, %cst_81 [1] : vector<16x32xf32> to vector<16xf32>
      %179 = vector.shape_cast %178 : vector<16xf32> to vector<16x1xf32>
      %cst_82 = arith.constant 3.200000e+01 : f32
      %180 = vector.broadcast %cst_82 : f32 to vector<16x1xf32>
      %181 = arith.divf %179, %180 : vector<16x1xf32>
      %182 = vector.broadcast %181 : vector<16x1xf32> to vector<16x32xf32>
      %183 = arith.subf %175, %182 : vector<16x32xf32>
      %184 = arith.mulf %183, %183 : vector<16x32xf32>
      %cst_83 = arith.constant dense<0.000000e+00> : vector<16xf32>
      %185 = vector.multi_reduction <add>, %184, %cst_83 [1] : vector<16x32xf32> to vector<16xf32>
      %186 = vector.shape_cast %185 : vector<16xf32> to vector<16x1xf32>
      %cst_84 = arith.constant 3.200000e+01 : f32
      %187 = vector.broadcast %cst_84 : f32 to vector<16x1xf32>
      %188 = arith.divf %186, %187 : vector<16x1xf32>
      %189 = vector.broadcast %181 : vector<16x1xf32> to vector<16x32xf32>
      %190 = arith.subf %175, %189 : vector<16x32xf32>
      %cst_85 = arith.constant 9.99999974E-6 : f32
      %191 = vector.broadcast %cst_85 : f32 to vector<16x1xf32>
      %192 = arith.addf %188, %191 : vector<16x1xf32>
      %193 = math.rsqrt %192 : vector<16x1xf32>
      %194 = vector.broadcast %193 : vector<16x1xf32> to vector<16x32xf32>
      %195 = arith.mulf %190, %194 : vector<16x32xf32>
      %196 = vector.broadcast %176 : vector<1x32xf32> to vector<16x32xf32>
      %197 = arith.mulf %195, %196 : vector<16x32xf32>
      %198 = vector.broadcast %177 : vector<1x32xf32> to vector<16x32xf32>
      %199 = arith.addf %197, %198 : vector<16x32xf32>
      %c0_86 = arith.constant 0 : index
      %c0_87 = arith.constant 0 : index
      %200 = vector.load %arg20[%c0_86, %c0_87] : memref<64x32xf32, #tpu.memory_space<vmem>>, vector<64x32xf32>
      %cst_88 = arith.constant dense<0.000000e+00> : vector<16x64xf32>
      %201 = tpu.matmul %199, %200, %cst_88 {dimension_numbers = #tpu.dot_dimension_numbers<[1], [1], [0], [0], [0, 0, 1, 0], [], []>} : vector<16x32xf32>, vector<64x32xf32>, vector<16x64xf32> -> vector<16x64xf32>
      %c0_89 = arith.constant 0 : index
      %c0_90 = arith.constant 0 : index
      %202 = vector.load %arg21[%c0_89, %c0_90] : memref<1x64xf32, #tpu.memory_space<vmem>>, vector<1x64xf32>
      %cst_91 = arith.constant 2.000000e+00 : f32
      %203 = vector.broadcast %cst_91 : f32 to vector<16x64xf32>
      %204 = arith.mulf %203, %201 : vector<16x64xf32>
      %205 = vector.broadcast %202 : vector<1x64xf32> to vector<16x64xf32>
      %206 = arith.subf %205, %204 : vector<16x64xf32>
      %cst_92 = arith.constant dense<0x7F800000> : vector<16xf32>
      %207 = vector.multi_reduction <minimumf>, %206, %cst_92 [1] : vector<16x64xf32> to vector<16xf32>
      %208 = vector.shape_cast %207 : vector<16xf32> to vector<16x1xf32>
      %209 = tpu.iota {dimensions = array<i32: 1>} : vector<16x64xi32>
      %210 = vector.broadcast %208 : vector<16x1xf32> to vector<16x64xf32>
      %211 = arith.cmpf ole, %206, %210 : vector<16x64xf32>
      %c64_i32 = arith.constant 64 : i32
      %212 = vector.broadcast %c64_i32 : i32 to vector<16x64xi32>
      %213 = arith.select %211, %209, %212 : vector<16x64xi1>, vector<16x64xi32>
      %cst_93 = arith.constant dense<2147483647> : vector<16xi32>
      %214 = vector.multi_reduction <minsi>, %213, %cst_93 [1] : vector<16x64xi32> to vector<16xi32>
      %215 = vector.shape_cast %214 : vector<16xi32> to vector<16x1xi32>
      %c0_94 = arith.constant 0 : index
      %c0_95 = arith.constant 0 : index
      %c0_96 = arith.constant 0 : index
      %216 = vector.load %arg23[%c0_94, %c0_95, %c0_96] : memref<1x16x1xi32, #tpu.memory_space<vmem>>, vector<1x16x1xi32>
      %217 = vector.shape_cast %216 : vector<1x16x1xi32> to vector<16x1xi32>
      %218 = vector.shape_cast %215 : vector<16x1xi32> to vector<1x16x1xi32>
      tpu.vector_store %arg23[%c0_94, %c0_95, %c0_96], %218 {strides = array<i32>} : memref<1x16x1xi32, #tpu.memory_space<vmem>>, vector<1x16x1xi32>,
      %219 = vector.broadcast %215 : vector<16x1xi32> to vector<16x64xi32>
      %220 = arith.cmpi eq, %209, %219 : vector<16x64xi32>
      %221 = arith.extui %220 : vector<16x64xi1> to vector<16x64xi32>
      %222 = arith.sitofp %221 : vector<16x64xi32> to vector<16x64xf32>
      %cst_97 = arith.constant dense<0.000000e+00> : vector<16x32xf32>
      %223 = tpu.matmul %222, %200, %cst_97 {dimension_numbers = #tpu.dot_dimension_numbers<[1], [0], [0], [1], [0, 0, 1, 1], [], []>} : vector<16x64xf32>, vector<64x32xf32>, vector<16x32xf32> -> vector<16x32xf32>
      %c0_98 = arith.constant 0 : index
      %c0_99 = arith.constant 0 : index
      %c0_100 = arith.constant 0 : index
      %224 = vector.load %arg22[%c0_98, %c0_99, %c0_100] : memref<1x16x32xf32, #tpu.memory_space<vmem>>, vector<1x16x32xf32>
      %225 = vector.shape_cast %224 : vector<1x16x32xf32> to vector<16x32xf32>
      %226 = vector.shape_cast %223 : vector<16x32xf32> to vector<1x16x32xf32>
      tpu.vector_store %arg22[%c0_98, %c0_99, %c0_100], %226 {strides = array<i32>} : memref<1x16x32xf32, #tpu.memory_space<vmem>>, vector<1x16x32xf32>,
      %227 = arith.subf %223, %199 : vector<16x32xf32>
      %228 = arith.mulf %227, %227 : vector<16x32xf32>
      %cst_101 = arith.constant dense<0.000000e+00> : vector<16xf32>
      %229 = vector.multi_reduction <add>, %228, %cst_101 [1] : vector<16x32xf32> to vector<16xf32>
      %230 = vector.shape_cast %229 : vector<16xf32> to vector<16x1xf32>
      %cst_102 = arith.constant dense<0.000000e+00> : vector<1xf32>
      %231 = vector.multi_reduction <add>, %230, %cst_102 [0] : vector<16x1xf32> to vector<1xf32>
      %232 = vector.shape_cast %231 : vector<1xf32> to vector<1x1xf32>
      %cst_103 = arith.constant 9.765625E-4 : f32
      %233 = vector.broadcast %cst_103 : f32 to vector<1x1xf32>
      %234 = arith.mulf %232, %233 : vector<1x1xf32>
      %c0_104 = arith.constant 0 : index
      %c0_105 = arith.constant 0 : index
      %c0_106 = arith.constant 0 : index
      %235 = vector.load %arg24[%c0_104, %c0_105, %c0_106] : memref<1x1x1xf32, #tpu.memory_space<vmem>>, vector<1x1x1xf32>
      %236 = vector.shape_cast %235 : vector<1x1x1xf32> to vector<1x1xf32>
      %237 = vector.shape_cast %234 : vector<1x1xf32> to vector<1x1x1xf32>
      tpu.vector_store %arg24[%c0_104, %c0_105, %c0_106], %237 {strides = array<i32>} : memref<1x1x1xf32, #tpu.memory_space<vmem>>, vector<1x1x1xf32>,
    } else {
    }
    return
  }
  func.func @transform_0(%arg0: i32, %arg1: i32) -> (i32, i32, i32) {
    %c0_i32 = arith.constant 0 : i32
    %c0_i32_0 = arith.constant 0 : i32
    %c0_i32_1 = arith.constant 0 : i32
    return %arg0, %c0_i32, %c0_i32_0 : i32, i32, i32
  }
  func.func @transform_1(%arg0: i32, %arg1: i32) -> (i32, i32) {
    %c0_i32 = arith.constant 0 : i32
    %c0_i32_0 = arith.constant 0 : i32
    %c0_i32_1 = arith.constant 0 : i32
    return %c0_i32, %c0_i32_0 : i32, i32
  }
  func.func @transform_2(%arg0: i32, %arg1: i32) -> (i32, i32) {
    %c0_i32 = arith.constant 0 : i32
    %c0_i32_0 = arith.constant 0 : i32
    %c0_i32_1 = arith.constant 0 : i32
    return %c0_i32, %c0_i32_0 : i32, i32
  }
  func.func @transform_3(%arg0: i32, %arg1: i32) -> (i32, i32, i32) {
    %c0_i32 = arith.constant 0 : i32
    %c0_i32_0 = arith.constant 0 : i32
    %c0_i32_1 = arith.constant 0 : i32
    return %arg1, %c0_i32, %c0_i32_0 : i32, i32, i32
  }
  func.func @transform_4(%arg0: i32, %arg1: i32) -> (i32, i32, i32) {
    %c0_i32 = arith.constant 0 : i32
    %c0_i32_0 = arith.constant 0 : i32
    %c0_i32_1 = arith.constant 0 : i32
    return %arg1, %c0_i32, %c0_i32_0 : i32, i32, i32
  }
  func.func @transform_5(%arg0: i32, %arg1: i32) -> (i32, i32, i32, i32) {
    %c0_i32 = arith.constant 0 : i32
    %c0_i32_0 = arith.constant 0 : i32
    %c0_i32_1 = arith.constant 0 : i32
    %c0_i32_2 = arith.constant 0 : i32
    return %arg1, %c0_i32, %c0_i32_0, %c0_i32_1 : i32, i32, i32, i32
  }
  func.func @transform_6(%arg0: i32, %arg1: i32) -> (i32, i32, i32, i32) {
    %c0_i32 = arith.constant 0 : i32
    %c0_i32_0 = arith.constant 0 : i32
    %c0_i32_1 = arith.constant 0 : i32
    %c0_i32_2 = arith.constant 0 : i32
    return %arg1, %c0_i32, %c0_i32_0, %c0_i32_1 : i32, i32, i32, i32
  }
  func.func @transform_7(%arg0: i32, %arg1: i32) -> (i32, i32, i32) {
    %c0_i32 = arith.constant 0 : i32
    %c0_i32_0 = arith.constant 0 : i32
    %c0_i32_1 = arith.constant 0 : i32
    return %arg1, %c0_i32, %c0_i32_0 : i32, i32, i32
  }
  func.func @transform_8(%arg0: i32, %arg1: i32) -> (i32, i32, i32) {
    %c0_i32 = arith.constant 0 : i32
    %c0_i32_0 = arith.constant 0 : i32
    %c0_i32_1 = arith.constant 0 : i32
    return %arg1, %c0_i32, %c0_i32_0 : i32, i32, i32
  }
  func.func @transform_9(%arg0: i32, %arg1: i32) -> (i32, i32, i32) {
    %c0_i32 = arith.constant 0 : i32
    %c0_i32_0 = arith.constant 0 : i32
    %c0_i32_1 = arith.constant 0 : i32
    return %arg1, %c0_i32, %c0_i32_0 : i32, i32, i32
  }
  func.func @transform_10(%arg0: i32, %arg1: i32) -> (i32, i32, i32) {
    %c0_i32 = arith.constant 0 : i32
    %c0_i32_0 = arith.constant 0 : i32
    %c0_i32_1 = arith.constant 0 : i32
    return %arg1, %c0_i32, %c0_i32_0 : i32, i32, i32
  }
  func.func @transform_11(%arg0: i32, %arg1: i32) -> (i32, i32, i32) {
    %c0_i32 = arith.constant 0 : i32
    %c0_i32_0 = arith.constant 0 : i32
    %c0_i32_1 = arith.constant 0 : i32
    return %arg1, %c0_i32, %c0_i32_0 : i32, i32, i32
  }
  func.func @transform_12(%arg0: i32, %arg1: i32) -> (i32, i32, i32) {
    %c0_i32 = arith.constant 0 : i32
    %c0_i32_0 = arith.constant 0 : i32
    %c0_i32_1 = arith.constant 0 : i32
    return %arg1, %c0_i32, %c0_i32_0 : i32, i32, i32
  }
  func.func @transform_13(%arg0: i32, %arg1: i32) -> (i32, i32, i32) {
    %c0_i32 = arith.constant 0 : i32
    %c0_i32_0 = arith.constant 0 : i32
    %c0_i32_1 = arith.constant 0 : i32
    return %arg1, %c0_i32, %c0_i32_0 : i32, i32, i32
  }
  func.func @transform_14(%arg0: i32, %arg1: i32) -> (i32, i32) {
    %c0_i32 = arith.constant 0 : i32
    %c0_i32_0 = arith.constant 0 : i32
    %c0_i32_1 = arith.constant 0 : i32
    return %c0_i32, %c0_i32_0 : i32, i32
  }
  func.func @transform_15(%arg0: i32, %arg1: i32) -> (i32, i32) {
    %c0_i32 = arith.constant 0 : i32
    %c0_i32_0 = arith.constant 0 : i32
    %c0_i32_1 = arith.constant 0 : i32
    return %c0_i32, %c0_i32_0 : i32, i32
  }
  func.func @transform_16(%arg0: i32, %arg1: i32) -> (i32, i32) {
    %c0_i32 = arith.constant 0 : i32
    %c0_i32_0 = arith.constant 0 : i32
    %c0_i32_1 = arith.constant 0 : i32
    return %c0_i32, %c0_i32_0 : i32, i32
  }
  func.func @transform_17(%arg0: i32, %arg1: i32) -> (i32, i32) {
    %c0_i32 = arith.constant 0 : i32
    %c0_i32_0 = arith.constant 0 : i32
    %c0_i32_1 = arith.constant 0 : i32
    return %c0_i32, %c0_i32_0 : i32, i32
  }
  func.func @transform_18(%arg0: i32, %arg1: i32) -> (i32, i32) {
    %c0_i32 = arith.constant 0 : i32
    %c0_i32_0 = arith.constant 0 : i32
    %c0_i32_1 = arith.constant 0 : i32
    return %c0_i32, %c0_i32_0 : i32, i32
  }
  func.func @transform_19(%arg0: i32, %arg1: i32) -> (i32, i32) {
    %c0_i32 = arith.constant 0 : i32
    %c0_i32_0 = arith.constant 0 : i32
    %c0_i32_1 = arith.constant 0 : i32
    return %c0_i32, %c0_i32_0 : i32, i32
  }
  func.func @transform_20(%arg0: i32, %arg1: i32) -> (i32, i32, i32) {
    %c0_i32 = arith.constant 0 : i32
    %c0_i32_0 = arith.constant 0 : i32
    %c0_i32_1 = arith.constant 0 : i32
    return %arg0, %c0_i32, %c0_i32_0 : i32, i32, i32
  }
  func.func @transform_21(%arg0: i32, %arg1: i32) -> (i32, i32, i32) {
    %c0_i32 = arith.constant 0 : i32
    %c0_i32_0 = arith.constant 0 : i32
    %c0_i32_1 = arith.constant 0 : i32
    return %arg0, %c0_i32, %c0_i32_0 : i32, i32, i32
  }
  func.func @transform_22(%arg0: i32, %arg1: i32) -> (i32, i32, i32) {
    %c0_i32 = arith.constant 0 : i32
    %c0_i32_0 = arith.constant 0 : i32
    %c0_i32_1 = arith.constant 0 : i32
    return %arg0, %c0_i32, %c0_i32_0 : i32, i32, i32
  }
}

module attributes {stable_mosaic.version = 11 : i64} {
  func.func @_decoder_kernel(%arg0: i32, %arg1: i32, %arg2: memref<1x16x32xf32, #tpu.memory_space<vmem>>, %arg3: memref<1x1x32xf32, #tpu.memory_space<vmem>>, %arg4: memref<1x1x32xf32, #tpu.memory_space<vmem>>, %arg5: memref<1x12x32x16xf32, #tpu.memory_space<vmem>>, %arg6: memref<1x4x16x32xf32, #tpu.memory_space<vmem>>, %arg7: memref<1x1x32xf32, #tpu.memory_space<vmem>>, %arg8: memref<1x1x32xf32, #tpu.memory_space<vmem>>, %arg9: memref<1x1x32xf32, #tpu.memory_space<vmem>>, %arg10: memref<1x32x128xf32, #tpu.memory_space<vmem>>, %arg11: memref<1x1x128xf32, #tpu.memory_space<vmem>>, %arg12: memref<1x128x32xf32, #tpu.memory_space<vmem>>, %arg13: memref<1x1x32xf32, #tpu.memory_space<vmem>>, %arg14: memref<1x32xf32, #tpu.memory_space<vmem>>, %arg15: memref<1x32xf32, #tpu.memory_space<vmem>>, %arg16: memref<32x8xf32, #tpu.memory_space<vmem>>, %arg17: memref<1x8xf32, #tpu.memory_space<vmem>>, %arg18: memref<1x16x8xf32, #tpu.memory_space<vmem>>, %arg19: memref<16x32xf32, #tpu.memory_space<vmem>>) attributes {dimension_semantics = [#tpu.dimension_semantics<parallel>, #tpu.dimension_semantics<arbitrary>], iteration_bounds = array<i64: 2, 2>, scalar_prefetch = 0 : i64, scratch_operands = 1 : i64, tpu.core_type = #tpu.core_type<tc>, window_params = [{transform_indices = @transform_0, window_bounds = array<i64: 1, 16, 32>}, {transform_indices = @transform_1, window_bounds = array<i64: 1, 1, 32>}, {transform_indices = @transform_2, window_bounds = array<i64: 1, 1, 32>}, {transform_indices = @transform_3, window_bounds = array<i64: 1, 12, 32, 16>}, {transform_indices = @transform_4, window_bounds = array<i64: 1, 4, 16, 32>}, {transform_indices = @transform_5, window_bounds = array<i64: 1, 1, 32>}, {transform_indices = @transform_6, window_bounds = array<i64: 1, 1, 32>}, {transform_indices = @transform_7, window_bounds = array<i64: 1, 1, 32>}, {transform_indices = @transform_8, window_bounds = array<i64: 1, 32, 128>}, {transform_indices = @transform_9, window_bounds = array<i64: 1, 1, 128>}, {transform_indices = @transform_10, window_bounds = array<i64: 1, 128, 32>}, {transform_indices = @transform_11, window_bounds = array<i64: 1, 1, 32>}, {pipeline_mode = #tpu.pipeline_mode<synchronous>, transform_indices = @transform_12, window_bounds = array<i64: 1, 32>}, {pipeline_mode = #tpu.pipeline_mode<synchronous>, transform_indices = @transform_13, window_bounds = array<i64: 1, 32>}, {pipeline_mode = #tpu.pipeline_mode<synchronous>, transform_indices = @transform_14, window_bounds = array<i64: 32, 8>}, {pipeline_mode = #tpu.pipeline_mode<synchronous>, transform_indices = @transform_15, window_bounds = array<i64: 1, 8>}, {transform_indices = @transform_16, window_bounds = array<i64: 1, 16, 8>}]} {
    %c0_i32 = arith.constant 0 : i32
    %0 = arith.cmpi eq, %arg1, %c0_i32 : i32
    %1 = arith.extui %0 : i1 to i32
    %c0_i32_0 = arith.constant 0 : i32
    %2 = arith.cmpi ne, %1, %c0_i32_0 : i32
    scf.if %2 {
      %c0_68 = arith.constant 0 : index
      %c0_69 = arith.constant 0 : index
      %c0_70 = arith.constant 0 : index
      %152 = vector.load %arg2[%c0_68, %c0_69, %c0_70] : memref<1x16x32xf32, #tpu.memory_space<vmem>>, vector<1x16x32xf32>
      %153 = vector.shape_cast %152 : vector<1x16x32xf32> to vector<16x32xf32>
      %c0_71 = arith.constant 0 : index
      %c0_72 = arith.constant 0 : index
      %154 = vector.load %arg19[%c0_71, %c0_72] : memref<16x32xf32, #tpu.memory_space<vmem>>, vector<16x32xf32>
      tpu.vector_store %arg19[%c0_71, %c0_72], %153 {strides = array<i32>} : memref<16x32xf32, #tpu.memory_space<vmem>>, vector<16x32xf32>,
    } else {
    }
    %c0 = arith.constant 0 : index
    %c0_1 = arith.constant 0 : index
    %3 = vector.load %arg19[%c0, %c0_1] : memref<16x32xf32, #tpu.memory_space<vmem>>, vector<16x32xf32>
    %c0_2 = arith.constant 0 : index
    %c0_3 = arith.constant 0 : index
    %c0_4 = arith.constant 0 : index
    %4 = vector.load %arg3[%c0_2, %c0_3, %c0_4] : memref<1x1x32xf32, #tpu.memory_space<vmem>>, vector<1x1x32xf32>
    %5 = vector.shape_cast %4 : vector<1x1x32xf32> to vector<1x32xf32>
    %c0_5 = arith.constant 0 : index
    %c0_6 = arith.constant 0 : index
    %c0_7 = arith.constant 0 : index
    %6 = vector.load %arg4[%c0_5, %c0_6, %c0_7] : memref<1x1x32xf32, #tpu.memory_space<vmem>>, vector<1x1x32xf32>
    %7 = vector.shape_cast %6 : vector<1x1x32xf32> to vector<1x32xf32>
    %c0_8 = arith.constant 0 : index
    %c0_9 = arith.constant 0 : index
    %c0_10 = arith.constant 0 : index
    %c0_11 = arith.constant 0 : index
    %8 = vector.load %arg5[%c0_8, %c0_9, %c0_10, %c0_11] : memref<1x12x32x16xf32, #tpu.memory_space<vmem>>, vector<1x12x32x16xf32>
    %9 = vector.shape_cast %8 : vector<1x12x32x16xf32> to vector<12x32x16xf32>
    %c0_12 = arith.constant 0 : index
    %c0_13 = arith.constant 0 : index
    %c0_14 = arith.constant 0 : index
    %c0_15 = arith.constant 0 : index
    %10 = vector.load %arg6[%c0_12, %c0_13, %c0_14, %c0_15] : memref<1x4x16x32xf32, #tpu.memory_space<vmem>>, vector<1x4x16x32xf32>
    %11 = vector.shape_cast %10 : vector<1x4x16x32xf32> to vector<4x16x32xf32>
    %c0_16 = arith.constant 0 : index
    %c0_17 = arith.constant 0 : index
    %c0_18 = arith.constant 0 : index
    %12 = vector.load %arg7[%c0_16, %c0_17, %c0_18] : memref<1x1x32xf32, #tpu.memory_space<vmem>>, vector<1x1x32xf32>
    %13 = vector.shape_cast %12 : vector<1x1x32xf32> to vector<1x32xf32>
    %c0_19 = arith.constant 0 : index
    %c0_20 = arith.constant 0 : index
    %c0_21 = arith.constant 0 : index
    %14 = vector.load %arg8[%c0_19, %c0_20, %c0_21] : memref<1x1x32xf32, #tpu.memory_space<vmem>>, vector<1x1x32xf32>
    %15 = vector.shape_cast %14 : vector<1x1x32xf32> to vector<1x32xf32>
    %c0_22 = arith.constant 0 : index
    %c0_23 = arith.constant 0 : index
    %c0_24 = arith.constant 0 : index
    %16 = vector.load %arg9[%c0_22, %c0_23, %c0_24] : memref<1x1x32xf32, #tpu.memory_space<vmem>>, vector<1x1x32xf32>
    %17 = vector.shape_cast %16 : vector<1x1x32xf32> to vector<1x32xf32>
    %c0_25 = arith.constant 0 : index
    %c0_26 = arith.constant 0 : index
    %c0_27 = arith.constant 0 : index
    %18 = vector.load %arg10[%c0_25, %c0_26, %c0_27] : memref<1x32x128xf32, #tpu.memory_space<vmem>>, vector<1x32x128xf32>
    %19 = vector.shape_cast %18 : vector<1x32x128xf32> to vector<32x128xf32>
    %c0_28 = arith.constant 0 : index
    %c0_29 = arith.constant 0 : index
    %c0_30 = arith.constant 0 : index
    %20 = vector.load %arg11[%c0_28, %c0_29, %c0_30] : memref<1x1x128xf32, #tpu.memory_space<vmem>>, vector<1x1x128xf32>
    %21 = vector.shape_cast %20 : vector<1x1x128xf32> to vector<1x128xf32>
    %c0_31 = arith.constant 0 : index
    %c0_32 = arith.constant 0 : index
    %c0_33 = arith.constant 0 : index
    %22 = vector.load %arg12[%c0_31, %c0_32, %c0_33] : memref<1x128x32xf32, #tpu.memory_space<vmem>>, vector<1x128x32xf32>
    %23 = vector.shape_cast %22 : vector<1x128x32xf32> to vector<128x32xf32>
    %c0_34 = arith.constant 0 : index
    %c0_35 = arith.constant 0 : index
    %c0_36 = arith.constant 0 : index
    %24 = vector.load %arg13[%c0_34, %c0_35, %c0_36] : memref<1x1x32xf32, #tpu.memory_space<vmem>>, vector<1x1x32xf32>
    %25 = vector.shape_cast %24 : vector<1x1x32xf32> to vector<1x32xf32>
    %cst = arith.constant dense<0.000000e+00> : vector<16xf32>
    %26 = vector.multi_reduction <add>, %3, %cst [1] : vector<16x32xf32> to vector<16xf32>
    %27 = vector.shape_cast %26 : vector<16xf32> to vector<16x1xf32>
    %cst_37 = arith.constant 3.200000e+01 : f32
    %28 = vector.broadcast %cst_37 : f32 to vector<16x1xf32>
    %29 = arith.divf %27, %28 : vector<16x1xf32>
    %30 = vector.broadcast %29 : vector<16x1xf32> to vector<16x32xf32>
    %31 = arith.subf %3, %30 : vector<16x32xf32>
    %32 = arith.mulf %31, %31 : vector<16x32xf32>
    %cst_38 = arith.constant dense<0.000000e+00> : vector<16xf32>
    %33 = vector.multi_reduction <add>, %32, %cst_38 [1] : vector<16x32xf32> to vector<16xf32>
    %34 = vector.shape_cast %33 : vector<16xf32> to vector<16x1xf32>
    %cst_39 = arith.constant 3.200000e+01 : f32
    %35 = vector.broadcast %cst_39 : f32 to vector<16x1xf32>
    %36 = arith.divf %34, %35 : vector<16x1xf32>
    %37 = vector.broadcast %29 : vector<16x1xf32> to vector<16x32xf32>
    %38 = arith.subf %3, %37 : vector<16x32xf32>
    %cst_40 = arith.constant 9.99999974E-6 : f32
    %39 = vector.broadcast %cst_40 : f32 to vector<16x1xf32>
    %40 = arith.addf %36, %39 : vector<16x1xf32>
    %41 = math.rsqrt %40 : vector<16x1xf32>
    %42 = vector.broadcast %41 : vector<16x1xf32> to vector<16x32xf32>
    %43 = arith.mulf %38, %42 : vector<16x32xf32>
    %44 = vector.broadcast %5 : vector<1x32xf32> to vector<16x32xf32>
    %45 = arith.mulf %43, %44 : vector<16x32xf32>
    %46 = vector.broadcast %7 : vector<1x32xf32> to vector<16x32xf32>
    %47 = arith.addf %45, %46 : vector<16x32xf32>
    %48 = vector.shape_cast %47 : vector<16x32xf32> to vector<1x16x32xf32>
    %49 = vector.broadcast %48 : vector<1x16x32xf32> to vector<12x16x32xf32>
    %50 = arith.truncf %49 : vector<12x16x32xf32> to vector<12x16x32xbf16>
    %51 = arith.truncf %9 : vector<12x32x16xf32> to vector<12x32x16xbf16>
    "tpu.trace_start"() <{level = 10 : i32, message = "zmd,zdk->zmk"}> : () -> ()
    %cst_41 = arith.constant dense<0.000000e+00> : vector<12x16x16xf32>
    %52 = tpu.matmul %50, %51, %cst_41 {dimension_numbers = #tpu.dot_dimension_numbers<[2], [1], [1], [2], [0, 0, 0, 1, 1, 2], [0], [0]>} : vector<12x16x32xbf16>, vector<12x32x16xbf16>, vector<12x16x16xf32> -> vector<12x16x16xf32>
    "tpu.trace_stop"() : () -> ()
    %53 = vector.extract_strided_slice %52 {offsets = [0, 0, 0], sizes = [4, 16, 16], strides = [1, 1, 1]} : vector<12x16x16xf32> to vector<4x16x16xf32>
    %54 = vector.extract_strided_slice %52 {offsets = [4, 0, 0], sizes = [4, 16, 16], strides = [1, 1, 1]} : vector<12x16x16xf32> to vector<4x16x16xf32>
    %55 = vector.extract_strided_slice %52 {offsets = [8, 0, 0], sizes = [4, 16, 16], strides = [1, 1, 1]} : vector<12x16x16xf32> to vector<4x16x16xf32>
    %56 = arith.truncf %53 : vector<4x16x16xf32> to vector<4x16x16xbf16>
    %57 = arith.truncf %54 : vector<4x16x16xf32> to vector<4x16x16xbf16>
    "tpu.trace_start"() <{level = 10 : i32, message = "hqd,hkd->hqk"}> : () -> ()
    %cst_42 = arith.constant dense<0.000000e+00> : vector<4x16x16xf32>
    %58 = tpu.matmul %56, %57, %cst_42 {dimension_numbers = #tpu.dot_dimension_numbers<[2], [2], [1], [1], [0, 0, 0, 1, 1, 1], [0], [0]>} : vector<4x16x16xbf16>, vector<4x16x16xbf16>, vector<4x16x16xf32> -> vector<4x16x16xf32>
    "tpu.trace_stop"() : () -> ()
    %cst_43 = arith.constant 2.500000e-01 : f32
    %59 = vector.broadcast %cst_43 : f32 to vector<4x16x16xf32>
    %60 = arith.mulf %58, %59 : vector<4x16x16xf32>
    %61 = tpu.iota {dimensions = array<i32: 0>} : vector<16x16xi32>
    %62 = tpu.iota {dimensions = array<i32: 1>} : vector<16x16xi32>
    %63 = arith.subi %62, %61 : vector<16x16xi32>
    %64 = math.absi %63 : vector<16x16xi32>
    %65 = arith.sitofp %64 : vector<16x16xi32> to vector<16x16xf32>
    %cst_44 = arith.constant 0.000000e+00 : f32
    %66 = vector.broadcast %cst_44 : f32 to vector<16x16xf32>
    %67 = arith.subf %66, %65 : vector<16x16xf32>
    %68 = vector.shape_cast %67 : vector<16x16xf32> to vector<1x16x16xf32>
    %cst_45 = arith.constant 2.500000e-01 : f32
    %69 = vector.broadcast %cst_45 : f32 to vector<1x16x16xf32>
    %70 = arith.mulf %68, %69 : vector<1x16x16xf32>
    %71 = vector.shape_cast %67 : vector<16x16xf32> to vector<1x16x16xf32>
    %cst_46 = arith.constant 6.250000e-02 : f32
    %72 = vector.broadcast %cst_46 : f32 to vector<1x16x16xf32>
    %73 = arith.mulf %71, %72 : vector<1x16x16xf32>
    %74 = vector.shape_cast %67 : vector<16x16xf32> to vector<1x16x16xf32>
    %cst_47 = arith.constant 1.562500e-02 : f32
    %75 = vector.broadcast %cst_47 : f32 to vector<1x16x16xf32>
    %76 = arith.mulf %74, %75 : vector<1x16x16xf32>
    %77 = vector.shape_cast %67 : vector<16x16xf32> to vector<1x16x16xf32>
    %cst_48 = arith.constant 3.906250e-03 : f32
    %78 = vector.broadcast %cst_48 : f32 to vector<1x16x16xf32>
    %79 = arith.mulf %77, %78 : vector<1x16x16xf32>
    %80 = tpu.concatenate %70, %73, %76, %79 in 0 : vector<1x16x16xf32>, vector<1x16x16xf32>, vector<1x16x16xf32>, vector<1x16x16xf32> -> vector<4x16x16xf32>
    %81 = arith.addf %60, %80 : vector<4x16x16xf32>
    %cst_49 = arith.constant dense<0xFF800000> : vector<4x16xf32>
    %82 = vector.multi_reduction <maximumf>, %81, %cst_49 [2] : vector<4x16x16xf32> to vector<4x16xf32>
    %83 = vector.shape_cast %82 : vector<4x16xf32> to vector<4x16x1xf32>
    %84 = vector.broadcast %83 : vector<4x16x1xf32> to vector<4x16x16xf32>
    %85 = arith.subf %81, %84 : vector<4x16x16xf32>
    %86 = math.exp %85 : vector<4x16x16xf32>
    %cst_50 = arith.constant dense<0.000000e+00> : vector<4x16xf32>
    %87 = vector.multi_reduction <add>, %86, %cst_50 [2] : vector<4x16x16xf32> to vector<4x16xf32>
    %88 = vector.shape_cast %87 : vector<4x16xf32> to vector<4x16x1xf32>
    %89 = tpu.reciprocal %88 {approx = true} : vector<4x16x1xf32> -> vector<4x16x1xf32>
    %90 = vector.broadcast %89 : vector<4x16x1xf32> to vector<4x16x16xf32>
    %91 = arith.mulf %86, %90 : vector<4x16x16xf32>
    %92 = arith.truncf %91 : vector<4x16x16xf32> to vector<4x16x16xbf16>
    %93 = arith.truncf %55 : vector<4x16x16xf32> to vector<4x16x16xbf16>
    "tpu.trace_start"() <{level = 10 : i32, message = "hqk,hkd->hqd"}> : () -> ()
    %cst_51 = arith.constant dense<0.000000e+00> : vector<4x16x16xf32>
    %94 = tpu.matmul %92, %93, %cst_51 {dimension_numbers = #tpu.dot_dimension_numbers<[2], [1], [1], [2], [0, 0, 0, 1, 1, 2], [0], [0]>} : vector<4x16x16xbf16>, vector<4x16x16xbf16>, vector<4x16x16xf32> -> vector<4x16x16xf32>
    "tpu.trace_stop"() : () -> ()
    %95 = arith.truncf %94 : vector<4x16x16xf32> to vector<4x16x16xbf16>
    %96 = arith.truncf %11 : vector<4x16x32xf32> to vector<4x16x32xbf16>
    "tpu.trace_start"() <{level = 10 : i32, message = "hqd,hde->hqe"}> : () -> ()
    %cst_52 = arith.constant dense<0.000000e+00> : vector<4x16x32xf32>
    %97 = tpu.matmul %95, %96, %cst_52 {dimension_numbers = #tpu.dot_dimension_numbers<[2], [1], [1], [2], [0, 0, 0, 1, 1, 2], [0], [0]>} : vector<4x16x16xbf16>, vector<4x16x32xbf16>, vector<4x16x32xf32> -> vector<4x16x32xf32>
    "tpu.trace_stop"() : () -> ()
    %cst_53 = arith.constant dense<0.000000e+00> : vector<16x32xf32>
    %98 = vector.multi_reduction <add>, %97, %cst_53 [0] : vector<4x16x32xf32> to vector<16x32xf32>
    %99 = arith.addf %3, %98 : vector<16x32xf32>
    %100 = vector.broadcast %13 : vector<1x32xf32> to vector<16x32xf32>
    %101 = arith.addf %99, %100 : vector<16x32xf32>
    %cst_54 = arith.constant dense<0.000000e+00> : vector<16xf32>
    %102 = vector.multi_reduction <add>, %101, %cst_54 [1] : vector<16x32xf32> to vector<16xf32>
    %103 = vector.shape_cast %102 : vector<16xf32> to vector<16x1xf32>
    %cst_55 = arith.constant 3.200000e+01 : f32
    %104 = vector.broadcast %cst_55 : f32 to vector<16x1xf32>
    %105 = arith.divf %103, %104 : vector<16x1xf32>
    %106 = vector.broadcast %105 : vector<16x1xf32> to vector<16x32xf32>
    %107 = arith.subf %101, %106 : vector<16x32xf32>
    %108 = arith.mulf %107, %107 : vector<16x32xf32>
    %cst_56 = arith.constant dense<0.000000e+00> : vector<16xf32>
    %109 = vector.multi_reduction <add>, %108, %cst_56 [1] : vector<16x32xf32> to vector<16xf32>
    %110 = vector.shape_cast %109 : vector<16xf32> to vector<16x1xf32>
    %cst_57 = arith.constant 3.200000e+01 : f32
    %111 = vector.broadcast %cst_57 : f32 to vector<16x1xf32>
    %112 = arith.divf %110, %111 : vector<16x1xf32>
    %113 = vector.broadcast %105 : vector<16x1xf32> to vector<16x32xf32>
    %114 = arith.subf %101, %113 : vector<16x32xf32>
    %cst_58 = arith.constant 9.99999974E-6 : f32
    %115 = vector.broadcast %cst_58 : f32 to vector<16x1xf32>
    %116 = arith.addf %112, %115 : vector<16x1xf32>
    %117 = math.rsqrt %116 : vector<16x1xf32>
    %118 = vector.broadcast %117 : vector<16x1xf32> to vector<16x32xf32>
    %119 = arith.mulf %114, %118 : vector<16x32xf32>
    %120 = vector.broadcast %15 : vector<1x32xf32> to vector<16x32xf32>
    %121 = arith.mulf %119, %120 : vector<16x32xf32>
    %122 = vector.broadcast %17 : vector<1x32xf32> to vector<16x32xf32>
    %123 = arith.addf %121, %122 : vector<16x32xf32>
    %124 = arith.truncf %123 : vector<16x32xf32> to vector<16x32xbf16>
    %125 = arith.truncf %19 : vector<32x128xf32> to vector<32x128xbf16>
    %cst_59 = arith.constant dense<0.000000e+00> : vector<16x128xf32>
    %126 = tpu.matmul %124, %125, %cst_59 {dimension_numbers = #tpu.dot_dimension_numbers<[1], [0], [0], [1], [0, 0, 1, 1], [], []>} : vector<16x32xbf16>, vector<32x128xbf16>, vector<16x128xf32> -> vector<16x128xf32>
    %127 = vector.broadcast %21 : vector<1x128xf32> to vector<16x128xf32>
    %128 = arith.addf %126, %127 : vector<16x128xf32>
    %129 = arith.mulf %128, %128 : vector<16x128xf32>
    %130 = arith.mulf %128, %129 : vector<16x128xf32>
    %cst_60 = arith.constant 4.471500e-02 : f32
    %131 = vector.broadcast %cst_60 : f32 to vector<16x128xf32>
    %132 = arith.mulf %131, %130 : vector<16x128xf32>
    %133 = arith.addf %128, %132 : vector<16x128xf32>
    %cst_61 = arith.constant 0.797884583 : f32
    %134 = vector.broadcast %cst_61 : f32 to vector<16x128xf32>
    %135 = arith.mulf %134, %133 : vector<16x128xf32>
    %136 = math.tanh %135 : vector<16x128xf32>
    %cst_62 = arith.constant 1.000000e+00 : f32
    %137 = vector.broadcast %cst_62 : f32 to vector<16x128xf32>
    %138 = arith.addf %137, %136 : vector<16x128xf32>
    %cst_63 = arith.constant 5.000000e-01 : f32
    %139 = vector.broadcast %cst_63 : f32 to vector<16x128xf32>
    %140 = arith.mulf %139, %138 : vector<16x128xf32>
    %141 = arith.mulf %128, %140 : vector<16x128xf32>
    %142 = arith.truncf %141 : vector<16x128xf32> to vector<16x128xbf16>
    %143 = arith.truncf %23 : vector<128x32xf32> to vector<128x32xbf16>
    %cst_64 = arith.constant dense<0.000000e+00> : vector<16x32xf32>
    %144 = tpu.matmul %142, %143, %cst_64 {dimension_numbers = #tpu.dot_dimension_numbers<[1], [0], [0], [1], [0, 0, 1, 1], [], []>} : vector<16x128xbf16>, vector<128x32xbf16>, vector<16x32xf32> -> vector<16x32xf32>
    %145 = arith.addf %101, %144 : vector<16x32xf32>
    %146 = vector.broadcast %25 : vector<1x32xf32> to vector<16x32xf32>
    %147 = arith.addf %145, %146 : vector<16x32xf32>
    %c0_65 = arith.constant 0 : index
    %c0_66 = arith.constant 0 : index
    %148 = vector.load %arg19[%c0_65, %c0_66] : memref<16x32xf32, #tpu.memory_space<vmem>>, vector<16x32xf32>
    tpu.vector_store %arg19[%c0_65, %c0_66], %147 {strides = array<i32>} : memref<16x32xf32, #tpu.memory_space<vmem>>, vector<16x32xf32>,
    %c1_i32 = arith.constant 1 : i32
    %149 = arith.cmpi eq, %arg1, %c1_i32 : i32
    %150 = arith.extui %149 : i1 to i32
    %c0_i32_67 = arith.constant 0 : i32
    %151 = arith.cmpi ne, %150, %c0_i32_67 : i32
    scf.if %151 {
      %c0_68 = arith.constant 0 : index
      %c0_69 = arith.constant 0 : index
      %152 = vector.load %arg14[%c0_68, %c0_69] : memref<1x32xf32, #tpu.memory_space<vmem>>, vector<1x32xf32>
      %c0_70 = arith.constant 0 : index
      %c0_71 = arith.constant 0 : index
      %153 = vector.load %arg15[%c0_70, %c0_71] : memref<1x32xf32, #tpu.memory_space<vmem>>, vector<1x32xf32>
      %cst_72 = arith.constant dense<0.000000e+00> : vector<16xf32>
      %154 = vector.multi_reduction <add>, %147, %cst_72 [1] : vector<16x32xf32> to vector<16xf32>
      %155 = vector.shape_cast %154 : vector<16xf32> to vector<16x1xf32>
      %cst_73 = arith.constant 3.200000e+01 : f32
      %156 = vector.broadcast %cst_73 : f32 to vector<16x1xf32>
      %157 = arith.divf %155, %156 : vector<16x1xf32>
      %158 = vector.broadcast %157 : vector<16x1xf32> to vector<16x32xf32>
      %159 = arith.subf %147, %158 : vector<16x32xf32>
      %160 = arith.mulf %159, %159 : vector<16x32xf32>
      %cst_74 = arith.constant dense<0.000000e+00> : vector<16xf32>
      %161 = vector.multi_reduction <add>, %160, %cst_74 [1] : vector<16x32xf32> to vector<16xf32>
      %162 = vector.shape_cast %161 : vector<16xf32> to vector<16x1xf32>
      %cst_75 = arith.constant 3.200000e+01 : f32
      %163 = vector.broadcast %cst_75 : f32 to vector<16x1xf32>
      %164 = arith.divf %162, %163 : vector<16x1xf32>
      %165 = vector.broadcast %157 : vector<16x1xf32> to vector<16x32xf32>
      %166 = arith.subf %147, %165 : vector<16x32xf32>
      %cst_76 = arith.constant 9.99999974E-6 : f32
      %167 = vector.broadcast %cst_76 : f32 to vector<16x1xf32>
      %168 = arith.addf %164, %167 : vector<16x1xf32>
      %169 = math.rsqrt %168 : vector<16x1xf32>
      %170 = vector.broadcast %169 : vector<16x1xf32> to vector<16x32xf32>
      %171 = arith.mulf %166, %170 : vector<16x32xf32>
      %172 = vector.broadcast %152 : vector<1x32xf32> to vector<16x32xf32>
      %173 = arith.mulf %171, %172 : vector<16x32xf32>
      %174 = vector.broadcast %153 : vector<1x32xf32> to vector<16x32xf32>
      %175 = arith.addf %173, %174 : vector<16x32xf32>
      %c0_77 = arith.constant 0 : index
      %c0_78 = arith.constant 0 : index
      %176 = vector.load %arg16[%c0_77, %c0_78] : memref<32x8xf32, #tpu.memory_space<vmem>>, vector<32x8xf32>
      %177 = arith.truncf %175 : vector<16x32xf32> to vector<16x32xbf16>
      %178 = arith.truncf %176 : vector<32x8xf32> to vector<32x8xbf16>
      %cst_79 = arith.constant dense<0.000000e+00> : vector<16x8xf32>
      %179 = tpu.matmul %177, %178, %cst_79 {dimension_numbers = #tpu.dot_dimension_numbers<[1], [0], [0], [1], [0, 0, 1, 1], [], []>} : vector<16x32xbf16>, vector<32x8xbf16>, vector<16x8xf32> -> vector<16x8xf32>
      %c0_80 = arith.constant 0 : index
      %c0_81 = arith.constant 0 : index
      %180 = vector.load %arg17[%c0_80, %c0_81] : memref<1x8xf32, #tpu.memory_space<vmem>>, vector<1x8xf32>
      %181 = vector.broadcast %180 : vector<1x8xf32> to vector<16x8xf32>
      %182 = arith.addf %179, %181 : vector<16x8xf32>
      %c0_82 = arith.constant 0 : index
      %c0_83 = arith.constant 0 : index
      %c0_84 = arith.constant 0 : index
      %183 = vector.load %arg18[%c0_82, %c0_83, %c0_84] : memref<1x16x8xf32, #tpu.memory_space<vmem>>, vector<1x16x8xf32>
      %184 = vector.shape_cast %183 : vector<1x16x8xf32> to vector<16x8xf32>
      %185 = vector.shape_cast %182 : vector<16x8xf32> to vector<1x16x8xf32>
      tpu.vector_store %arg18[%c0_82, %c0_83, %c0_84], %185 {strides = array<i32>} : memref<1x16x8xf32, #tpu.memory_space<vmem>>, vector<1x16x8xf32>,
    } else {
    }
    return
  }
  func.func @transform_0(%arg0: i32, %arg1: i32) -> (i32, i32, i32) {
    %c0_i32 = arith.constant 0 : i32
    %c0_i32_0 = arith.constant 0 : i32
    %c0_i32_1 = arith.constant 0 : i32
    return %arg0, %c0_i32, %c0_i32_0 : i32, i32, i32
  }
  func.func @transform_1(%arg0: i32, %arg1: i32) -> (i32, i32, i32) {
    %c0_i32 = arith.constant 0 : i32
    %c0_i32_0 = arith.constant 0 : i32
    %c0_i32_1 = arith.constant 0 : i32
    return %arg1, %c0_i32, %c0_i32_0 : i32, i32, i32
  }
  func.func @transform_2(%arg0: i32, %arg1: i32) -> (i32, i32, i32) {
    %c0_i32 = arith.constant 0 : i32
    %c0_i32_0 = arith.constant 0 : i32
    %c0_i32_1 = arith.constant 0 : i32
    return %arg1, %c0_i32, %c0_i32_0 : i32, i32, i32
  }
  func.func @transform_3(%arg0: i32, %arg1: i32) -> (i32, i32, i32, i32) {
    %c0_i32 = arith.constant 0 : i32
    %c0_i32_0 = arith.constant 0 : i32
    %c0_i32_1 = arith.constant 0 : i32
    %c0_i32_2 = arith.constant 0 : i32
    return %arg1, %c0_i32, %c0_i32_0, %c0_i32_1 : i32, i32, i32, i32
  }
  func.func @transform_4(%arg0: i32, %arg1: i32) -> (i32, i32, i32, i32) {
    %c0_i32 = arith.constant 0 : i32
    %c0_i32_0 = arith.constant 0 : i32
    %c0_i32_1 = arith.constant 0 : i32
    %c0_i32_2 = arith.constant 0 : i32
    return %arg1, %c0_i32, %c0_i32_0, %c0_i32_1 : i32, i32, i32, i32
  }
  func.func @transform_5(%arg0: i32, %arg1: i32) -> (i32, i32, i32) {
    %c0_i32 = arith.constant 0 : i32
    %c0_i32_0 = arith.constant 0 : i32
    %c0_i32_1 = arith.constant 0 : i32
    return %arg1, %c0_i32, %c0_i32_0 : i32, i32, i32
  }
  func.func @transform_6(%arg0: i32, %arg1: i32) -> (i32, i32, i32) {
    %c0_i32 = arith.constant 0 : i32
    %c0_i32_0 = arith.constant 0 : i32
    %c0_i32_1 = arith.constant 0 : i32
    return %arg1, %c0_i32, %c0_i32_0 : i32, i32, i32
  }
  func.func @transform_7(%arg0: i32, %arg1: i32) -> (i32, i32, i32) {
    %c0_i32 = arith.constant 0 : i32
    %c0_i32_0 = arith.constant 0 : i32
    %c0_i32_1 = arith.constant 0 : i32
    return %arg1, %c0_i32, %c0_i32_0 : i32, i32, i32
  }
  func.func @transform_8(%arg0: i32, %arg1: i32) -> (i32, i32, i32) {
    %c0_i32 = arith.constant 0 : i32
    %c0_i32_0 = arith.constant 0 : i32
    %c0_i32_1 = arith.constant 0 : i32
    return %arg1, %c0_i32, %c0_i32_0 : i32, i32, i32
  }
  func.func @transform_9(%arg0: i32, %arg1: i32) -> (i32, i32, i32) {
    %c0_i32 = arith.constant 0 : i32
    %c0_i32_0 = arith.constant 0 : i32
    %c0_i32_1 = arith.constant 0 : i32
    return %arg1, %c0_i32, %c0_i32_0 : i32, i32, i32
  }
  func.func @transform_10(%arg0: i32, %arg1: i32) -> (i32, i32, i32) {
    %c0_i32 = arith.constant 0 : i32
    %c0_i32_0 = arith.constant 0 : i32
    %c0_i32_1 = arith.constant 0 : i32
    return %arg1, %c0_i32, %c0_i32_0 : i32, i32, i32
  }
  func.func @transform_11(%arg0: i32, %arg1: i32) -> (i32, i32, i32) {
    %c0_i32 = arith.constant 0 : i32
    %c0_i32_0 = arith.constant 0 : i32
    %c0_i32_1 = arith.constant 0 : i32
    return %arg1, %c0_i32, %c0_i32_0 : i32, i32, i32
  }
  func.func @transform_12(%arg0: i32, %arg1: i32) -> (i32, i32) {
    %c0_i32 = arith.constant 0 : i32
    %c0_i32_0 = arith.constant 0 : i32
    %c0_i32_1 = arith.constant 0 : i32
    return %c0_i32, %c0_i32_0 : i32, i32
  }
  func.func @transform_13(%arg0: i32, %arg1: i32) -> (i32, i32) {
    %c0_i32 = arith.constant 0 : i32
    %c0_i32_0 = arith.constant 0 : i32
    %c0_i32_1 = arith.constant 0 : i32
    return %c0_i32, %c0_i32_0 : i32, i32
  }
  func.func @transform_14(%arg0: i32, %arg1: i32) -> (i32, i32) {
    %c0_i32 = arith.constant 0 : i32
    %c0_i32_0 = arith.constant 0 : i32
    %c0_i32_1 = arith.constant 0 : i32
    return %c0_i32, %c0_i32_0 : i32, i32
  }
  func.func @transform_15(%arg0: i32, %arg1: i32) -> (i32, i32) {
    %c0_i32 = arith.constant 0 : i32
    %c0_i32_0 = arith.constant 0 : i32
    %c0_i32_1 = arith.constant 0 : i32
    return %c0_i32, %c0_i32_0 : i32, i32
  }
  func.func @transform_16(%arg0: i32, %arg1: i32) -> (i32, i32, i32) {
    %c0_i32 = arith.constant 0 : i32
    %c0_i32_0 = arith.constant 0 : i32
    %c0_i32_1 = arith.constant 0 : i32
    return %arg0, %c0_i32, %c0_i32_0 : i32, i32, i32
  }
}

</mosaic_0001>

<bundles_post_ra>
// kernel: vq_motion_model_forward.2
= control target key start
LH: loop header
LB: loop body
LE: loop exit
PB: predicated region body
PF: predicated region fallthrough
CT: control target
= control target key end

     0   :  { %s2989_s28 = smov 0   ;;  %s2991_s29 = smov 0   ;;  %s3466_s0 = inlined_call_operand.vmem [shape: f32[2,16,8], index: 0, kind: input, shape index: {}]   ;;  %s3467_s1 = inlined_call_operand.vmem [shape: f32[8,32], index: 1, kind: input, shape index: {}]   ;;  %s3468_s2 = inlined_call_operand.vmem [shape: f32[1,32], index: 2, kind: input, shape index: {}]   ;;  %s3469_s3 = inlined_call_operand.vmem [shape: f32[2,1,32], index: 3, kind: input, shape index: {}]   ;;  %s3470_s4 = inlined_call_operand.vmem [shape: f32[2,1,32], index: 4, kind: input, shape index: {}]   ;;  %s3471_s5 = inlined_call_operand.vmem [shape: f32[2,12,32,16], index: 5, kind: input, shape index: {}]   ;;  %s3472_s6 = inlined_call_operand.vmem [shape: f32[2,4,16,32], index: 6, kind: input, shape index: {}]   ;;  %s3473_s7 = inlined_call_operand.vmem [shape: f32[2,1,32], index: 7, kind: input, shape index: {}]   ;;  %s3474_s8 = inlined_call_operand.vmem [shape: f32[2,1,32], index: 8, kind: input, shape index: {}]   ;;  %s3475_s9 = inlined_call_operand.vmem [shape: f32[2,1,32], index: 9, kind: input, shape index: {}]   ;;  %s3476_s10 = inlined_call_operand.vmem [shape: f32[2,32,128], index: 10, kind: input, shape index: {}]   ;;  %s3477_s11 = inlined_call_operand.vmem [shape: f32[2,1,128], index: 11, kind: input, shape index: {}]   ;;  %s3478_s12 = inlined_call_operand.vmem [shape: f32[2,128,32], index: 12, kind: input, shape index: {}]   ;;  %s3479_s13 = inlined_call_operand.vmem [shape: f32[2,1,32], index: 13, kind: input, shape index: {}]   ;;  %s3480_s14 = inlined_call_operand.vmem [shape: f32[1,32], index: 14, kind: input, shape index: {}]   ;;  %s3481_s15 = inlined_call_operand.vmem [shape: f32[1,32], index: 15, kind: input, shape index: {}]   ;;  %s3482_s16 = inlined_call_operand.vmem [shape: f32[1,32], index: 16, kind: input, shape index: {}]   ;;  %s3483_s17 = inlined_call_operand.vmem [shape: f32[1,32], index: 17, kind: input, shape index: {}]   ;;  %s3484_s18 = inlined_call_operand.vmem [shape: f32[64,32], index: 18, kind: input, shape index: {}]   ;;  %s3485_s19 = inlined_call_operand.vmem [shape: f32[1,64], index: 19, kind: input, shape index: {}]   ;;  %s3486_s20 = inlined_call_operand.vmem [shape: f32[2,16,32], index: 20, kind: output, shape index: {0}]   ;;  %s3487_s21 = inlined_call_operand.vmem [shape: s32[2,16,1], index: 21, kind: output, shape index: {1}]   ;;  %s3488_s22 = inlined_call_operand.vmem [shape: f32[2,1,1], index: 22, kind: output, shape index: {2}]  }
   0x1   :  { %3495 = sst [smem:[#allocation10_spill]] %s3466_s0  ;;  %s2993_s30 = smov 0  }
   0x2   :  { %3496 = sst [smem:[#allocation11_spill]] %s3467_s1 }
   0x3   :  { %3497 = sst [smem:[#allocation12_spill]] %s3468_s2 }
   0x4   :  { %3498 = sst [smem:[#allocation13_spill]] %s3469_s3  ;;  %s2987_s3 = smov 0  }
   0x5   :  { %3499 = sst [smem:[#allocation14_spill]] %s3470_s4  ;;  %s2995_s4 = smov 0  }
   0x6   :  { %3500 = sst [smem:[#allocation15_spill]] %s3471_s5 }
   0x7   :  { %3501 = sst [smem:[#allocation16_spill]] %s3472_s6 }
   0x8   :  { %3502 = sst [smem:[#allocation17_spill]] %s3480_s14 }
   0x9   :  { %3503 = sst [smem:[#allocation18_spill]] %s3481_s15 }
   0xa   :  { %3504 = sst [smem:[#allocation19_spill]] %s3482_s16 }
   0xb   :  { %3505 = sst [smem:[#allocation20_spill]] %s3483_s17 }
   0xc   :  { %3506 = sst [smem:[#allocation21_spill]] %s3484_s18 }
   0xd   :  { %3507 = sst [smem:[#allocation22_spill]] %s3485_s19 }
   0xe   :  { %3508 = sst [smem:[#allocation23_spill]] %s3487_s21 }
   0xf   :  { %3509 = sst [smem:[#allocation24_spill]] %s3488_s22 }
  0x10 LB: > { %3510 = sst [smem:[#allocation3_spill]] %s2852_s3  ;;  %s42_s0 = sadd.s32 1, %s2860_s29  ;;  %s2868_s4 = sphi %s2995_s4, %s33_s4   ;;  %s2864_s30 = sphi %s2993_s30, %s3548_s30   ;;  %s2860_s29 = sphi %s2991_s29, %s3547_s29   ;;  %s2856_s28 = sphi %s2989_s28, %s3546_s28   ;;  %s2852_s3 = sphi %s2987_s3, %s3545_s3  }
  0x11   : > { %3511 = sst [smem:[#allocation4_spill]] %s2860_s29  ;;  %s45_s23 = sadd.s32 1, %s2864_s30 }
  0x12   : > { %3512 = sst [smem:[#allocation5_spill]] %s2864_s30  ;;  %p43_p0 = scmp.ge.s32.totalorder %s42_s0, 2 }
  0x13   : > { %3513 = sst [smem:[#allocation6_spill]] %s2868_s4  ;;  %p2646_p1 = scmp.ge.s32.totalorder %s2868_s4, 1 }
  0x14   : > { %p725_p2 = scmp.lt.s32.totalorder %s2868_s4, 5  ;;  %s3550_s0 = smov (%p43_p0, %s42_s0), 0 }
  0x15   : > { %3514 = sst [smem:[#allocation7_spill]] %s3550_s0  ;;  %s3552_s23 = smov (!%p43_p0, %s45_s23), %s2864_s30 }
  0x16   : > { %p726_p3 = pnand %p2646_p1, %p725_p2  ;;  %p47_p4 = scmp.ge.s32.totalorder %s3552_s23, 2 }
  0x18   : > { %s3554_s23 = smov (%p47_p4, %s3552_s23), 0  ;;  %729 = sbr.rel (%p726_p3) target bundleno = 3250 (0xcb2), region = 100 }
  0x19   : > { %3515 = sst [smem:[#allocation8_spill]] %s3554_s23 }
  0x1d   : > { %p836_p5 = scmp.lt.s32.totalorder %s2856_s28, 1  ;;  %p841_p6 = scmp.lt.s32.totalorder %s2852_s3, 1 }
  0x1e   : > { %s3518_s27 = sld [smem:[#allocation10_spill]] }
  0x1f   : > { %s3556_s28 = smov (!%p836_p5, %s2856_s28), 1  ;;  %s3519_s29 = sld [smem:[#allocation13_spill]] }
  0x20   : > { %3516 = sst [smem:[#allocation9_spill]] %s3556_s28  ;;  %s2704_s5 = sshll.u32 %s3556_s28, 4 }
  0x21   : > { %s3023_s1 = scalar_select %p841_p6, %s2852_s3, 1 }
  0x22   : > { %s3521_s22 = sld [smem:[#allocation15_spill]]  ;;  %s3088_s24 = scalar_lea.vmem %s3486_s20, %s2704_s5 }
  0x23   : > { %s2718_s15 = smul.u32 384, %s3023_s1  ;;  %s2705_s14 = sshll.u32 %s3023_s1, 6 }
  0x24   : > { %s840_s23 = scalar_lea.vmem %s3518_s27, %s2704_s5  ;;  %s3522_s28 = sld [smem:[#allocation16_spill]] }
  0x25   : > { %s843_s4 = scalar_lea.vmem %s3519_s29, %s3023_s1  ;;  %s862_s16 = scalar_lea.vmem %s3474_s8, %s3023_s1 }
  0x26   : > { %s2706_s21 = sshll.u32 %s3023_s1, 5  ;;  %s881_s17 = scalar_lea.vmem %s3479_s13, %s3023_s1 }
  0x27   : > { %s3073_s6 = scalar_lea.vmem %s3476_s10, %s2706_s21 }
  0x28   : > { %s3050_s26 = scalar_lea.vmem %s3521_s22, %s2718_s15  ;;  %s3523_s15 = sld [smem:[#allocation23_spill]] }
  0x29   : > { %s3524_s22 = sld [smem:[#allocation3_spill]] }
  0x2a   : > { %s3055_s30 = scalar_lea.vmem %s3522_s28, %s2705_s14  ;;  %s2707_s14 = sshll.u32 %s3023_s1, 7 }
  0x2b   : > { %s3079_s27 = scalar_lea.vmem %s3478_s12, %s2707_s14 }
  0x2e   : > { %s3093_s21 = scalar_lea.vmem %s3523_s15, %s2704_s5 }
  0x2f   : > { %p2660_p7 = scmp.ne.s32.totalorder %s3524_s22, 0 }
  0x30   : > { %s3525_s2 = sld [smem:[#allocation11_spill]] (!%p2660_p7) }
  0x31   : > { %899 = sbr.rel (%p2660_p7) target bundleno = 198 (0xc6), region = 104  ;;  %s3526_s5 = sld [smem:[#allocation12_spill]] (!%p2660_p7) }
  0x36   : > { %v902_v0 = vld [vmem:[%s3525_s2] sm:$0xff]  ;;  %vm913_vm0 = vcmask 1043456   ;;  %v901_v2 = vld [vmem:[%s840_s23 + $0x8] sm:$0xff]  ;;  %vm909_vm1 = vcmask 64512   ;;  %vm931_vm2 = vcmask 261120  }
  0x37   : > { %v900_v1 = vld [vmem:[%s840_s23] sm:$0xff]  ;;  %v904_v3 = vpack.c.bf16 %v902_v0, %v902_v0 }
  0x38   : > { %v903_v5 = vpack.c.bf16 %v901_v2, %v900_v1  ;;  %v2761_v6 = vld [vmem:[%s3526_s5] ss:$0 sm:$0xff] }
  0x39   : > { %v915_v4 = vsel %vm913_vm0, %v904_v3, 0 }
  0x3a   : > { %924 = vmatpush.bf16.msra.mxu0 %v915_v4 }
  0x3d   : > { %2661 = vmatmul.msk.bf16.vlgmr.msra.gmra.mxu0 %vm909_vm1, %v903_v5 }
  0xba   : > { %v926_v7 = vpop.f32.mrf.mxu0 }
  0xbb   : > { %v927_v8 = vadd.f32 %v2761_v6, %v926_v7 }
  0xbd   : > { %932 = vst.msk [vmem:[#allocation2] sm:$0xff] %vm931_vm2, %v927_v8 }
  0xc2   : > { %v928_v9 = vpop.f32.mrf.mxu0 }
  0xc3   : > { %v929_v10 = vadd.f32 %v2761_v6, %v928_v9 }
  0xc5   : > { %933 = vst.msk [vmem:[#allocation2 + $0x8] sm:$0xff] %vm931_vm2, %v929_v10 }
  0xc6 PF: > { %v934_v11 = vld [vmem:[#allocation2] sm:$0xff]  ;;  %vm1019_vm3 = vcmask 261120   ;;  %v2870_v15 = vmov 32.0   ;;  %v940_v32 = vld [vmem:[%s3050_s26 + $0x10] sm:$0xff]  ;;  %v941_v33 = vld [vmem:[%s3050_s26 + $0x18] sm:$0xff]  ;;  %s3528_s3 = sld [smem:[#allocation14_spill]]  ;;  %s3530_s22 = scalar_lea.vmem %s3473_s7, %s3023_s1 }
  0xc7   : > { %v1020_v12 = vsel %vm1019_vm3, %v934_v11, 0.0  ;;  %2769 = vrcp.f32 %v2870_v15  ;;  %v944_v34 = vld [vmem:[%s3050_s26 + $0x30] sm:$0xff]  ;;  %v1085_v35 = vpack.c.bf16 %v940_v32, %v940_v32  ;;  %v1086_v36 = vpack.c.bf16 %v941_v33, %v941_v33  ;;  %v945_v37 = vld [vmem:[%s3050_s26 + $0x38] sm:$0xff]  ;;  %v938_v55 = vld [vmem:[%s3050_s26] sm:$0xff]  ;;  %s3531_s18 = scalar_lea.vmem %s3475_s9, %s3023_s1  ;;  %s3532_s5 = scalar_lea.vmem %s3477_s11, %s3023_s1 }
  0xc8   : > { %1021 = vadd.xlane.f32.xlu0 %v1020_v12  ;;  %v1089_v38 = vpack.c.bf16 %v944_v34, %v944_v34  ;;  %v952_v39 = vld [vmem:[%s3050_s26 + $0x70] sm:$0xff]  ;;  %v953_v40 = vld [vmem:[%s3050_s26 + $0x78] sm:$0xff]  ;;  %v1090_v41 = vpack.c.bf16 %v945_v37, %v945_v37  ;;  %v939_v56 = vld [vmem:[%s3050_s26 + $0x8] sm:$0xff]  ;;  %v1083_v61 = vpack.c.bf16 %v938_v55, %v938_v55  ;;  %vm1477_vm11 = vcmask 130048   ;;  %s3533_s29 = sld [smem:[#allocation3_spill]] }
  0xc9   : > { %v1097_v42 = vpack.c.bf16 %v952_v39, %v952_v39  ;;  %v1098_v43 = vpack.c.bf16 %v953_v40, %v953_v40  ;;  %v960_v44 = vld [vmem:[%s3050_s26 + $0xb0] sm:$0xff]  ;;  %v961_v45 = vld [vmem:[%s3050_s26 + $0xb8] sm:$0xff]  ;;  %v1142_v47 = vunpack.c.l.b16 %v1085_v35  ;;  %v1143_v48 = vunpack.c.l.b16 %v1086_v36  ;;  %v942_v57 = vld [vmem:[%s3050_s26 + $0x20] sm:$0xff] }
  0xca   : > { %v1171_v49 = vunpack.c.l.b16 %v1089_v38  ;;  %v1105_v50 = vpack.c.bf16 %v960_v44, %v960_v44  ;;  %v1172_v52 = vunpack.c.l.b16 %v1090_v41  ;;  %v1106_v59 = vpack.c.bf16 %v961_v45, %v961_v45  ;;  %v943_v62 = vld [vmem:[%s3050_s26 + $0x28] sm:$0xff]  ;;  %v950_v63 = vld [vmem:[%s3050_s26 + $0x60] sm:$0xff]  ;;  %v948_v35 = vld [vmem:[%s3050_s26 + $0x50] sm:$0xff] }
  0xcb   : > { %v1223_v53 = vunpack.c.l.b16 %v1097_v42  ;;  %v1224_v54 = vunpack.c.l.b16 %v1098_v43  ;;  %v1145_v58 = vpack.c.b16 %v1143_v48, %v1142_v47  ;;  %v1084_v3 = vpack.c.bf16 %v939_v56, %v939_v56  ;;  %v951_v4 = vld [vmem:[%s3050_s26 + $0x68] sm:$0xff]  ;;  %v958_v9 = vld [vmem:[%s3050_s26 + $0xa0] sm:$0xff]  ;;  %v949_v36 = vld [vmem:[%s3050_s26 + $0x58] sm:$0xff] }
  0xcc   : > { %v935_v13 = vld [vmem:[#allocation2 + $0x8] sm:$0xff]  ;;  %v1275_v60 = vunpack.c.l.b16 %v1105_v50  ;;  %v1174_v1 = vpack.c.b16 %v1172_v52, %v1171_v49  ;;  %v1276_v5 = vunpack.c.l.b16 %v1106_v59  ;;  %v1140_v6 = vunpack.c.l.b16 %v1083_v61  ;;  %v956_v37 = vld [vmem:[%s3050_s26 + $0x90] sm:$0xff]  ;;  %v957_v40 = vld [vmem:[%s3050_s26 + $0x98] sm:$0xff]  ;;  %s3529_s15 = scalar_lea.vmem %s3528_s3, %s3023_s1 }
  0xcd   : > { %v1023_v14 = vsel %vm1019_vm3, %v935_v13, 0.0  ;;  %v2770_v16 = vpop.eup %2769  ;;  %v1226_v2 = vpack.c.b16 %v1224_v54, %v1223_v53  ;;  %1157 = vmatpush.bf16.msra.mxu0 %v1145_v58  ;;  %v1087_v7 = vpack.c.bf16 %v942_v57, %v942_v57  ;;  %v1088_v8 = vpack.c.bf16 %v943_v62, %v943_v62  ;;  %v959_v10 = vld [vmem:[%s3050_s26 + $0xa8] sm:$0xff]  ;;  %v968_v41 = vld [vmem:[%s3050_s26 + $0xf0] sm:$0xff]  ;;  %v969_v45 = vld [vmem:[%s3050_s26 + $0xf8] sm:$0xff] }
  0xce   : > { %v1027_v17 = vmul.f32 32.0, %v2770_v16  ;;  %vm1031_vm4 = vweird.f32 %v2770_v16  ;;  %1183 = vmatpush.bf16.msra.mxu2 %v1174_v1  ;;  %v1095_v12 = vpack.c.bf16 %v950_v63, %v950_v63  ;;  %v1093_v38 = vpack.c.bf16 %v948_v35, %v948_v35  ;;  %v976_v47 = vld [vmem:[%s3050_s26 + $0x130] sm:$0xff]  ;;  %v977_v48 = vld [vmem:[%s3050_s26 + $0x138] sm:$0xff]  ;;  %v946_v53 = vld [vmem:[%s3050_s26 + $0x40] sm:$0xff]  ;;  %p2687_p8 = scmp.ne.s32.totalorder %s3533_s29, 1 }
  0xcf   : > { %1235 = vmatpush.bf16.msra.mxu3 %v1226_v2  ;;  %v1170_v15 = vunpack.c.l.b16 %v1088_v8  ;;  %v1094_v39 = vpack.c.bf16 %v949_v36, %v949_v36  ;;  %v1101_v43 = vpack.c.bf16 %v956_v37, %v956_v37  ;;  %v1102_v44 = vpack.c.bf16 %v957_v40, %v957_v40  ;;  %v947_v54 = vld [vmem:[%s3050_s26 + $0x48] sm:$0xff]  ;;  %v954_v59 = vld [vmem:[%s3050_s26 + $0x80] sm:$0xff]  ;;  %s3534_s0 = sld [smem:[#allocation17_spill]] (!%p2687_p8) }
  0xd0   : > { %1024 = vadd.xlane.f32.xlu0 %v1023_v14  ;;  %v1028_v18 = vsub.f32 1.0, %v1027_v17  ;;  %v1169_v14 = vunpack.c.l.b16 %v1087_v7  ;;  %v1197_v49 = vunpack.c.l.b16 %v1093_v38  ;;  %v1121_v52 = vpack.c.bf16 %v976_v47, %v976_v47  ;;  %v972_v47 = vld [vmem:[%s3050_s26 + $0x110] sm:$0xff]  ;;  %s3535_s3 = sld [smem:[#allocation18_spill]] (!%p2687_p8) }
  0xd1   : > { %v1198_v50 = vunpack.c.l.b16 %v1094_v39  ;;  %v1249_v56 = vunpack.c.l.b16 %v1101_v43  ;;  %v1250_v57 = vunpack.c.l.b16 %v1102_v44  ;;  %v1122_v63 = vpack.c.bf16 %v977_v48, %v977_v48  ;;  %v973_v48 = vld [vmem:[%s3050_s26 + $0x118] sm:$0xff]  ;;  %s3540_s14 = sld [smem:[#allocation22_spill]] (!%p2687_p8) }
  0xd2   : > { %v1029_v19 = vmul.f32 %v2770_v16, %v1028_v18  ;;  %v1221_v18 = vunpack.c.l.b16 %v1095_v12  ;;  %v1379_v1 = vunpack.c.l.b16 %v1121_v52  ;;  %v967_v12 = vld [vmem:[%s3050_s26 + $0xe8] sm:$0xff]  ;;  %s3541_s2 = sld [smem:[#allocation9_spill]] (!%p2687_p8) }
  0xd3   : > { %v1200_v61 = vpack.c.b16 %v1198_v50, %v1197_v49  ;;  %v1380_v8 = vunpack.c.l.b16 %v1122_v63  ;;  %v971_v63 = vld [vmem:[%s3050_s26 + $0x108] sm:$0xff] }
  0xd4   : > { %v1030_v20 = vadd.f32 %v2770_v16, %v1029_v19  ;;  %v1103_v19 = vpack.c.bf16 %v958_v9, %v958_v9  ;;  %v1099_v9 = vpack.c.bf16 %v954_v59, %v954_v59 }
  0xd6   : > { %v3104_v21 = vsel %vm1031_vm4, %v2770_v16, %v1030_v20  ;;  %v1096_v16 = vpack.c.bf16 %v951_v4, %v951_v4  ;;  %v1104_v20 = vpack.c.bf16 %v959_v10, %v959_v10  ;;  %v1091_v4 = vpack.c.bf16 %v946_v53, %v946_v53  ;;  %v985_v53 = vld [vmem:[%s3050_s26 + $0x178] sm:$0xff] }
 0x13b   : > { %v1022_v22 = vpop.xlane.xlu0 %1021 }
 0x13c   : > { %v1033_v23 = vmul.f32 %v3104_v21, %v1022_v22 }
 0x13e   : > { %v3107_v24 = vsub.f32 %v934_v11, %v1033_v23  ;;  %v1141_v11 = vunpack.c.l.b16 %v1084_v3  ;;  %v1173_v23 = vpack.c.b16 %v1170_v15, %v1169_v14  ;;  %v1252_v3 = vpack.c.b16 %v1250_v57, %v1249_v56 }
 0x13f   : > { %v1195_v15 = vunpack.c.l.b16 %v1091_v4  ;;  %v1118_v56 = vpack.c.bf16 %v973_v48, %v973_v48  ;;  %v982_v4 = vld [vmem:[%s3050_s26 + $0x160] sm:$0xff] }
 0x140   : > { %v1037_v25 = vmul.f32 %v3107_v24, %v3107_v24  ;;  %v1144_v17 = vpack.c.b16 %v1141_v11, %v1140_v6  ;;  %1184 = vmatpush.bf16.msra.mxu2 %v1173_v23  ;;  %v966_v11 = vld [vmem:[%s3050_s26 + $0xe0] sm:$0xff] }
 0x142   : > { %v1039_v26 = vsel %vm1019_vm3, %v1037_v25, 0.0  ;;  %v1222_v25 = vunpack.c.l.b16 %v1096_v16  ;;  %1158 = vmatpush.bf16.msra.mxu0 %v1144_v17  ;;  %v974_v16 = vld [vmem:[%s3050_s26 + $0x120] sm:$0xff]  ;;  %v1382_v17 = vpack.c.b16 %v1380_v8, %v1379_v1 }
 0x143   : > { %1040 = vadd.xlane.f32.xlu1 %v1039_v26  ;;  %v1025_v27 = vpop.xlane.xlu0 %1024 }
 0x144   : > { %v1034_v28 = vmul.f32 %v3104_v21, %v1025_v27  ;;  %v1273_v27 = vunpack.c.l.b16 %v1103_v19  ;;  %1209 = vmatpush.bf16.msrb.mxu2 %v1200_v61  ;;  %v1247_v19 = vunpack.c.l.b16 %v1099_v9  ;;  %v963_v61 = vld [vmem:[%s3050_s26 + $0xc8] sm:$0xff] }
 0x146   : > { %v3113_v29 = vsub.f32 %v935_v13, %v1034_v28  ;;  %v1278_v13 = vpack.c.b16 %v1276_v5, %v1275_v60  ;;  %v1274_v28 = vunpack.c.l.b16 %v1104_v20  ;;  %v955_v60 = vld [vmem:[%s3050_s26 + $0x88] sm:$0xff]  ;;  %v1092_v5 = vpack.c.bf16 %v947_v54, %v947_v54  ;;  %1261 = vmatpush.bf16.msrb.mxu0 %v1252_v3 }
 0x147   : > { %v1100_v10 = vpack.c.bf16 %v955_v60, %v955_v60  ;;  %v1130_v60 = vpack.c.bf16 %v985_v53, %v985_v53 }
 0x148   : > { %v1038_v30 = vmul.f32 %v3113_v29, %v3113_v29  ;;  %1287 = vmatpush.bf16.msra.mxu1 %v1278_v13  ;;  %v1277_v33 = vpack.c.b16 %v1274_v28, %v1273_v27  ;;  %v2762_v27 = vld [vmem:[%s843_s4] ss:$0 sm:$0xff] }
 0x149   : > { %v1248_v20 = vunpack.c.l.b16 %v1100_v10  ;;  %v1108_v10 = vpack.c.bf16 %v963_v61, %v963_v61 }
 0x14a   : > { %v1042_v31 = vsel %vm1019_vm3, %v1038_v30, 0.0  ;;  %v1225_v30 = vpack.c.b16 %v1222_v25, %v1221_v18  ;;  %v1196_v18 = vunpack.c.l.b16 %v1092_v5 }
 0x14b   : > { %1043 = vadd.xlane.f32.xlu1 %v1042_v31 }
 0x14c   : > { %1236 = vmatpush.bf16.msra.mxu3 %v1225_v30  ;;  %1288 = vmatpush.bf16.msra.mxu1 %v1277_v33  ;;  %v1199_v30 = vpack.c.b16 %v1196_v18, %v1195_v15  ;;  %v1251_v33 = vpack.c.b16 %v1248_v20, %v1247_v19  ;;  %v1127_v15 = vpack.c.bf16 %v982_v4, %v982_v4 }
 0x14e   : > { %1210 = vmatpush.bf16.msrb.mxu2 %v1199_v30  ;;  %1262 = vmatpush.bf16.msrb.mxu0 %v1251_v33 }
 0x150   : > { %1391 = vmatpush.bf16.msrb.mxu1 %v1382_v17 }
 0x1b6   : > { %v1041_v46 = vpop.xlane.xlu1 %1040 }
 0x1b7   : > { %v1045_v51 = vmul.f32 %v1041_v46, %v3104_v21  ;;  %v1113_v46 = vpack.c.bf16 %v968_v41, %v968_v41  ;;  %v2763_v41 = vld [vmem:[%s3529_s15] ss:$0 sm:$0xff] }
 0x1b9   : > { %v3132_v0 = vadd.f32 1e-05, %v1045_v51  ;;  %v1114_v51 = vpack.c.bf16 %v969_v45, %v969_v45  ;;  %v1327_v58 = vunpack.c.l.b16 %v1113_v46  ;;  %v964_v45 = vld [vmem:[%s3050_s26 + $0xd0] sm:$0xff]  ;;  %v965_v46 = vld [vmem:[%s3050_s26 + $0xd8] sm:$0xff] }
 0x1ba   : > { %v1109_v52 = vpack.c.bf16 %v964_v45, %v964_v45  ;;  %v1110_v54 = vpack.c.bf16 %v965_v46, %v965_v46 }
 0x1bb   : > { %2771 = vrsqrt.f32 %v3132_v0  ;;  %v1328_v62 = vunpack.c.l.b16 %v1114_v51  ;;  %vm1055_vm6 = vweird.f32 %v3132_v0 }
 0x1bc   : > { %v1301_v3 = vunpack.c.l.b16 %v1109_v52  ;;  %v1302_v5 = vunpack.c.l.b16 %v1110_v54 }
 0x1bd   : > { %v1330_v7 = vpack.c.b16 %v1328_v62, %v1327_v58  ;;  %v962_v58 = vld [vmem:[%s3050_s26 + $0xc0] sm:$0xff] }
 0x1be   : > { %v1044_v22 = vpop.xlane.xlu1 %1043  ;;  %v970_v62 = vld [vmem:[%s3050_s26 + $0x100] sm:$0xff]  ;;  %v1107_v8 = vpack.c.bf16 %v962_v58, %v962_v58  ;;  %v1304_v19 = vpack.c.b16 %v1302_v5, %v1301_v3 }
 0x1bf   : > { %v1046_v26 = vmul.f32 %v1044_v22, %v3104_v21  ;;  %1339 = vmatpush.bf16.msrb.mxu3 %v1330_v7  ;;  %v975_v22 = vld [vmem:[%s3050_s26 + $0x128] sm:$0xff]  ;;  %v1354_v7 = vunpack.c.l.b16 %v1118_v56 }
 0x1c1   : > { %v3139_v31 = vpop.eup %2771  ;;  %v3141_v32 = vadd.f32 1e-05, %v1046_v26  ;;  %v1111_v26 = vpack.c.bf16 %v966_v11, %v966_v11  ;;  %v1115_v11 = vpack.c.bf16 %v970_v62, %v970_v62 }
 0x1c2   : > { %v1050_v34 = vmul.f32 %v3139_v31, %v3132_v0  ;;  %vm1056_vm5 = vweird.f32 %v3139_v31  ;;  %v1112_v0 = vpack.c.bf16 %v967_v12, %v967_v12  ;;  %v1116_v12 = vpack.c.bf16 %v971_v63, %v971_v63 }
 0x1c3   : > { %2773 = vrsqrt.f32 %v3141_v32  ;;  %vm1057_vm7 = vmor %vm1055_vm6, %vm1056_vm5  ;;  %v1325_v36 = vunpack.c.l.b16 %v1111_v26  ;;  %vm1065_vm9 = vweird.f32 %v3141_v32  ;;  %v1351_v26 = vunpack.c.l.b16 %v1115_v11 }
 0x1c4   : > { %v1051_v42 = vmul.f32 %v3139_v31, %v1050_v34  ;;  %v1119_v34 = vpack.c.bf16 %v974_v16, %v974_v16  ;;  %v1326_v37 = vunpack.c.l.b16 %v1112_v0  ;;  %v1352_v0 = vunpack.c.l.b16 %v1116_v12 }
 0x1c6   : > { %v1052_v55 = vmul.f32 0.5, %v1051_v42  ;;  %v1377_v38 = vunpack.c.l.b16 %v1119_v34  ;;  %v1329_v40 = vpack.c.b16 %v1326_v37, %v1325_v36  ;;  %v1355_v34 = vpack.c.b16 %v1352_v0, %v1351_v26  ;;  %v980_v36 = vld [vmem:[%s3050_s26 + $0x150] sm:$0xff]  ;;  %v981_v37 = vld [vmem:[%s3050_s26 + $0x158] sm:$0xff] }
 0x1c8   : > { %v1053_v2 = vsub.f32 1.5, %v1052_v55  ;;  %1340 = vmatpush.bf16.msrb.mxu3 %v1329_v40  ;;  %v1117_v55 = vpack.c.bf16 %v972_v47, %v972_v47  ;;  %v979_v40 = vld [vmem:[%s3050_s26 + $0x148] sm:$0xff] }
 0x1c9   : > { %v2774_v6 = vpop.eup %2773 }
 0x1ca   : > { %v1054_v13 = vmul.f32 %v3139_v31, %v1053_v2  ;;  %v1060_v14 = vmul.f32 %v2774_v6, %v3141_v32  ;;  %vm1066_vm8 = vweird.f32 %v2774_v6  ;;  %v984_v32 = vld [vmem:[%s3050_s26 + $0x170] sm:$0xff] }
 0x1cb   : > { %vm1067_vm10 = vmor %vm1065_vm9, %vm1066_vm8  ;;  %v1129_v59 = vpack.c.bf16 %v984_v32, %v984_v32 }
 0x1cc   : > { %v1058_v23 = vsel %vm1057_vm7, %v3139_v31, %v1054_v13  ;;  %v1061_v25 = vmul.f32 %v2774_v6, %v1060_v14  ;;  %v1120_v31 = vpack.c.bf16 %v975_v22, %v975_v22  ;;  %v1432_v14 = vunpack.c.l.b16 %v1130_v60 }
 0x1cd   : > { %v1069_v28 = vmul.f32 %v1058_v23, %v3107_v24  ;;  %v1431_v13 = vunpack.c.l.b16 %v1129_v59  ;;  %v1299_v22 = vunpack.c.l.b16 %v1107_v8 }
 0x1ce   : > { %v1062_v35 = vmul.f32 0.5, %v1061_v25  ;;  %v1378_v24 = vunpack.c.l.b16 %v1120_v31  ;;  %v1300_v25 = vunpack.c.l.b16 %v1108_v10  ;;  %v1125_v31 = vpack.c.bf16 %v980_v36, %v980_v36 }
 0x1cf   : > { %v1074_v42 = vmul.f32 %v2762_v27, %v1069_v28  ;;  %v1429_v28 = vunpack.c.l.b16 %v1127_v15 }
 0x1d0   : > { %v1063_v39 = vsub.f32 1.5, %v1062_v35  ;;  %v1381_v44 = vpack.c.b16 %v1378_v24, %v1377_v38  ;;  %v1303_v33 = vpack.c.b16 %v1300_v25, %v1299_v22  ;;  %v1126_v38 = vpack.c.bf16 %v981_v37, %v981_v37 }
 0x1d1   : > { %v1079_v50 = vadd.f32 %v2763_v41, %v1074_v42  ;;  %v1405_v24 = vunpack.c.l.b16 %v1125_v31 }
 0x1d2   : > { %v1064_v43 = vmul.f32 %v2774_v6, %v1063_v39  ;;  %1392 = vmatpush.bf16.msrb.mxu1 %v1381_v44  ;;  %v978_v39 = vld [vmem:[%s3050_s26 + $0x140] sm:$0xff] }
 0x1d3   : > { %v1081_v1 = vpack.c.bf16 %v1079_v50, %v1079_v50  ;;  %v1123_v42 = vpack.c.bf16 %v978_v39, %v978_v39 }
 0x1d4   : > { %v1068_v49 = vsel %vm1067_vm10, %v2774_v6, %v1064_v43  ;;  %v1353_v6 = vunpack.c.l.b16 %v1117_v55  ;;  %v1124_v43 = vpack.c.bf16 %v979_v40, %v979_v40 }
 0x1d5   : > { %v1070_v51 = vmul.f32 %v1068_v49, %v3113_v29  ;;  %v983_v29 = vld [vmem:[%s3050_s26 + $0x168] sm:$0xff]  ;;  %v1133_v17 = vunpack.c.l.b16 %v1081_v1  ;;  %v1403_v45 = vunpack.c.l.b16 %v1123_v42 }
 0x1d6   : > { %v1128_v16 = vpack.c.bf16 %v983_v29, %v983_v29  ;;  %v1356_v20 = vpack.c.b16 %v1354_v7, %v1353_v6  ;;  %v1404_v46 = vunpack.c.l.b16 %v1124_v43 }
 0x1d7   : > { %v1075_v57 = vmul.f32 %v2762_v27, %v1070_v51  ;;  %v1434_v27 = vpack.c.b16 %v1432_v14, %v1431_v13 }
 0x1d8   : > { %v1430_v30 = vunpack.c.l.b16 %v1128_v16  ;;  %v1407_v47 = vpack.c.b16 %v1404_v46, %v1403_v45 }
 0x1d9   : > { %v1080_v2 = vadd.f32 %v2763_v41, %v1075_v57  ;;  %v1406_v41 = vunpack.c.l.b16 %v1126_v38 }
 0x1da   : > { %v1433_v35 = vpack.c.b16 %v1430_v30, %v1429_v28 }
 0x1db   : > { %v1082_v9 = vpack.c.bf16 %v1080_v2, %v1080_v2  ;;  %v1408_v44 = vpack.c.b16 %v1406_v41, %v1405_v24 }
 0x1dd   : > { %v1134_v18 = vunpack.c.l.b16 %v1082_v9 }
 0x1df   : > { %v1135_v23 = vpack.c.b16 %v1134_v18, %v1133_v17 }
 0x1e1   : > { %2662 = vmatmul.msk.bf16.vlgmr.msra.gmra.mxu0 %vm1019_vm3, %v1135_v23  ;;  %2663 = vmatmul.msk.bf16.vlgmr.msra.gmra.mxu2 %vm1019_vm3, %v1135_v23 }
 0x1e2   : > { %2665 = vmatmul.msk.bf16.vlgmr.msra.gmra.mxu3 %vm1019_vm3, %v1135_v23  ;;  %2667 = vmatmul.msk.bf16.vlgmr.msra.gmra.mxu1 %vm1019_vm3, %v1135_v23 }
 0x1e3   : > { %1313 = vmatpush.bf16.msra.mxu2 %v1304_v19  ;;  %1365 = vmatpush.bf16.msra.mxu0 %v1356_v20 }
 0x1e4   : > { %1443 = vmatpush.bf16.msra.mxu3 %v1434_v27 }
 0x1e7   : > { %1314 = vmatpush.bf16.msra.mxu2 %v1303_v33  ;;  %1366 = vmatpush.bf16.msra.mxu0 %v1355_v34 }
 0x1e8   : > { %1444 = vmatpush.bf16.msra.mxu3 %v1433_v35 }
 0x1f1   : > { %2664 = vmatmul.msk.bf16.vlgmr.msrb.gmra.mxu2 %vm1019_vm3, %v1135_v23  ;;  %2666 = vmatmul.msk.bf16.vlgmr.msrb.gmra.mxu0 %vm1019_vm3, %v1135_v23 }
 0x1f2   : > { %2669 = vmatmul.msk.bf16.vlgmr.msrb.gmra.mxu3 %vm1019_vm3, %v1135_v23  ;;  %2671 = vmatmul.msk.bf16.vlgmr.msrb.gmra.mxu1 %vm1019_vm3, %v1135_v23 }
 0x1f3   : > { %1417 = vmatpush.bf16.msrb.mxu2 %v1408_v44 }
 0x1f7   : > { %1418 = vmatpush.bf16.msrb.mxu2 %v1407_v47 }
 0x201   : > { %2668 = vmatmul.msk.bf16.vlgmr.msra.gmra.mxu2 %vm1019_vm3, %v1135_v23  ;;  %2670 = vmatmul.msk.bf16.vlgmr.msra.gmra.mxu0 %vm1019_vm3, %v1135_v23 }
 0x202   : > { %2673 = vmatmul.msk.bf16.vlgmr.msra.gmra.mxu3 %vm1019_vm3, %v1135_v23 }
 0x211   : > { %2672 = vmatmul.msk.bf16.vlgmr.msrb.gmra.mxu2 %vm1019_vm3, %v1135_v23 }
 0x25e   : > { %v1160_v48 = vpop.f32.mrf.mxu0 }
 0x25f   : > { %v1290_v49 = vpop.f32.mrf.mxu1  ;;  %v1451_v22 = vpack.c.bf16 %v1160_v48, %v1160_v48 }
 0x260   : > { %v1461_v52 = vpack.c.bf16 %v1290_v49, %v1290_v49 }
 0x261   : > { %v1469_v33 = vunpack.c.l.b16 %v1451_v22 }
 0x262   : > { %v1505_v55 = vunpack.c.l.b16 %v1461_v52 }
 0x264   : > { %v1186_v50 = vpop.f32.mrf.mxu2 }
 0x265   : > { %v1238_v51 = vpop.f32.mrf.mxu3  ;;  %v1453_v61 = vpack.c.bf16 %v1186_v50, %v1186_v50 }
 0x266   : > { %v1162_v32 = vpop.f32.mrf.mxu0  ;;  %v1457_v37 = vpack.c.bf16 %v1238_v51, %v1238_v51 }
 0x267   : > { %v1292_v53 = vpop.f32.mrf.mxu1  ;;  %v1500_v3 = vunpack.c.l.b16 %v1453_v61  ;;  %v1452_v16 = vpack.c.bf16 %v1162_v32, %v1162_v32 }
 0x268   : > { %v1462_v54 = vpack.c.bf16 %v1292_v53, %v1292_v53  ;;  %v1560_v43 = vunpack.c.l.b16 %v1457_v37 }
 0x269   : > { %v1470_v27 = vunpack.c.l.b16 %v1452_v16 }
 0x26a   : > { %v1506_v56 = vunpack.c.l.b16 %v1462_v54 }
 0x26b   : > { %v1471_v36 = vpack.c.b16 %v1470_v27, %v1469_v33 }
 0x26c   : > { %v1507_v57 = vpack.c.b16 %v1506_v56, %v1505_v55  ;;  %v1188_v58 = vpop.f32.mrf.mxu2 }
 0x26d   : > { %v1454_v59 = vpack.c.bf16 %v1188_v58, %v1188_v58  ;;  %v1240_v60 = vpop.f32.mrf.mxu3 }
 0x26e   : > { %v1264_v62 = vpop.f32.mrf.mxu0  ;;  %v1512_v63 = vsel %vm1477_vm11, %v1507_v57, 0  ;;  %v1458_v34 = vpack.c.bf16 %v1240_v60, %v1240_v60 }
 0x26f   : > { %v1394_v1 = vpop.f32.mrf.mxu1  ;;  %1521 = vmatpush.bf16.xpose.msra.mxu1 %v1512_v63  ;;  %v1501_v2 = vunpack.c.l.b16 %v1454_v59  ;;  %v1459_v5 = vpack.c.bf16 %v1264_v62, %v1264_v62 }
 0x270   : > { %v1727_v7 = vpack.c.bf16 %v1394_v1, %v1394_v1  ;;  %v1561_v24 = vunpack.c.l.b16 %v1458_v34 }
 0x271   : > { %v1502_v4 = vpack.c.b16 %v1501_v2, %v1500_v3  ;;  %v1474_v12 = vunpack.c.l.b16 %v1459_v5 }
 0x272   : > { %v1768_v14 = vunpack.c.l.b16 %v1727_v7  ;;  %v1562_v46 = vpack.c.b16 %v1561_v24, %v1560_v43 }
 0x274   : > { %v3212_v29 = vpop.f32.mrf.mxu2 }
 0x275   : > { %v1342_v6 = vpop.f32.mrf.mxu3  ;;  %v1455_v60 = vpack.c.bf16 %v3212_v29, %v3212_v29 }
 0x276   : > { %2675 = vmatmul.msk.bf16.vlgmr.msra.gmra.mxu1 %vm1477_vm11, %v1502_v4  ;;  %v1266_v8 = vpop.f32.mrf.mxu0  ;;  %v1465_v18 = vpack.c.bf16 %v1342_v6, %v1342_v6 }
 0x277   : > { %v1460_v9 = vpack.c.bf16 %v1266_v8, %v1266_v8  ;;  %v1396_v10 = vpop.f32.mrf.mxu1  ;;  %v1530_v1 = vunpack.c.l.b16 %v1455_v60 }
 0x278   : > { %v1728_v11 = vpack.c.bf16 %v1396_v10, %v1396_v10  ;;  %v1565_v28 = vunpack.c.l.b16 %v1465_v18 }
 0x279   : > { %v1475_v13 = vunpack.c.l.b16 %v1460_v9  ;;  %v1596_v9 = vlaneseq }
 0x27a   : > { %v1769_v15 = vunpack.c.l.b16 %v1728_v11 }
 0x27b   : > { %v1476_v17 = vpack.c.b16 %v1475_v13, %v1474_v12  ;;  %v1597_v10 = vshrl.u32 %v1596_v9, 7  ;;  %v3223_v29 = vand.u32 127, %v1596_v9 }
 0x27c   : > { %v1770_v19 = vpack.c.b16 %v1769_v15, %v1768_v14  ;;  %v1214_v20 = vpop.f32.mrf.mxu2 }
 0x27d   : > { %v1344_v23 = vpop.f32.mrf.mxu3  ;;  %v1482_v25 = vsel %vm1477_vm11, %v1476_v17, 0  ;;  %v1456_v57 = vpack.c.bf16 %v1214_v20, %v1214_v20  ;;  %v1601_v11 = vsub.s32 %v3223_v29, %v1597_v10  ;;  %v1598_v12 = vadd.s32 8, %v1597_v10 }
 0x27e   : > { %v1466_v26 = vpack.c.bf16 %v1344_v23, %v1344_v23  ;;  %1782 = vmatpush.bf16.msrb.mxu1 %v1770_v19  ;;  %v1368_v0 = vpop.f32.mrf.mxu0  ;;  %1491 = vmatpush.bf16.xpose.msrb.mxu0 %v1482_v25 }
 0x27f   : > { %v1725_v39 = vpack.c.bf16 %v1368_v0, %v1368_v0  ;;  %v1531_v63 = vunpack.c.l.b16 %v1456_v57  ;;  %v1604_v13 = vsub.s32 0, %v1601_v11  ;;  %vm1603_vm12 = vcmp.lt.s32.totalorder %v1601_v11, 0 }
 0x280   : > { %v1566_v30 = vunpack.c.l.b16 %v1466_v26  ;;  %v1602_v14 = vsub.s32 %v3223_v29, %v1598_v12 }
 0x281   : > { %v1740_v44 = vunpack.c.l.b16 %v1725_v39  ;;  %v1532_v2 = vpack.c.b16 %v1531_v63, %v1530_v1  ;;  %v1605_v15 = vsel %vm1603_vm12, %v1604_v13, %v1601_v11 }
 0x282   : > { %v1567_v35 = vpack.c.b16 %v1566_v30, %v1565_v28  ;;  %v1607_v17 = vsub.s32 0, %v1602_v14  ;;  %v1609_v18 = vcvt.s32.f32 %v1605_v15  ;;  %vm1606_vm13 = vcmp.lt.s32.totalorder %v1602_v14, 0 }
 0x284   : > { %v1316_v31 = vpop.f32.mrf.mxu2  ;;  %v1572_v38 = vsel %vm1477_vm11, %v1567_v35, 0  ;;  %v1608_v19 = vsel %vm1606_vm13, %v1607_v17, %v1602_v14  ;;  %v1611_v20 = vsub.f32 0.0, %v1609_v18 }
 0x285   : > { %v1446_v40 = vpop.f32.mrf.mxu3  ;;  %1581 = vmatpush.bf16.xpose.msrb.mxu3 %v1572_v38  ;;  %2674 = vmatmul.msk.bf16.vlgmr.msrb.gmra.mxu0 %vm1477_vm11, %v1471_v36  ;;  %v1463_v47 = vpack.c.bf16 %v1316_v31, %v1316_v31  ;;  %v1610_v23 = vcvt.s32.f32 %v1608_v19 }
 0x286   : > { %v1370_v41 = vpop.f32.mrf.mxu0  ;;  %v1731_v49 = vpack.c.bf16 %v1446_v40, %v1446_v40  ;;  %v1619_v22 = vmul.f32 0.00390625, %v1611_v20  ;;  %v1617_v43 = vmul.f32 0.015625, %v1611_v20 }
 0x287   : > { %v1726_v42 = vpack.c.bf16 %v1370_v41, %v1370_v41  ;;  %v1535_v53 = vunpack.c.l.b16 %v1463_v47  ;;  %v1612_v28 = vsub.f32 0.0, %v1610_v23 }
 0x288   : > { %v1824_v55 = vunpack.c.l.b16 %v1731_v49 }
 0x289   : > { %v1741_v45 = vunpack.c.l.b16 %v1726_v42  ;;  %v1614_v34 = vmul.f32 0.25, %v1612_v28  ;;  %v1620_v35 = vmul.f32 0.00390625, %v1612_v28  ;;  %v1615_v42 = vmul.f32 0.0625, %v1611_v20 }
 0x28a   : > { %v1616_v60 = vmul.f32 0.0625, %v1612_v28 }
 0x28b   : > { %v1742_v48 = vpack.c.b16 %v1741_v45, %v1740_v44 }
 0x28c   : > { %2677 = vmatmul.msk.bf16.vlgmr.msrb.gmra.mxu3 %vm1477_vm11, %v1562_v46  ;;  %v1318_v50 = vpop.f32.mrf.mxu2 }
 0x28d   : > { %v1464_v51 = vpack.c.bf16 %v1318_v50, %v1318_v50  ;;  %v1448_v52 = vpop.f32.mrf.mxu3  ;;  %1754 = vmatpush.bf16.msra.mxu0 %v1742_v48  ;;  %v1618_v50 = vmul.f32 0.015625, %v1612_v28 }
 0x28e   : > { %v1732_v32 = vpack.c.bf16 %v1448_v52, %v1448_v52 }
 0x28f   : > { %v1536_v54 = vunpack.c.l.b16 %v1464_v51 }
 0x290   : > { %v1825_v56 = vunpack.c.l.b16 %v1732_v32 }
 0x291   : > { %v1537_v58 = vpack.c.b16 %v1536_v54, %v1535_v53 }
 0x292   : > { %v1826_v59 = vpack.c.b16 %v1825_v56, %v1824_v55  ;;  %v1613_v55 = vmul.f32 0.25, %v1611_v20 }
 0x293   : > { %v1542_v61 = vsel %vm1477_vm11, %v1537_v58, 0 }
 0x294   : > { %1838 = vmatpush.bf16.msra.mxu3 %v1826_v59  ;;  %v1420_v62 = vpop.f32.mrf.mxu2  ;;  %1551 = vmatpush.bf16.xpose.msra.mxu2 %v1542_v61 }
 0x295   : > { %v1729_v3 = vpack.c.bf16 %v1420_v62, %v1420_v62 }
 0x297   : > { %v1796_v6 = vunpack.c.l.b16 %v1729_v3 }
 0x29b   : > { %2676 = vmatmul.msk.bf16.vlgmr.msra.gmra.mxu2 %vm1477_vm11, %v1532_v2 }
 0x29c   : > { %v1422_v4 = vpop.f32.mrf.mxu2 }
 0x29d   : > { %v1730_v5 = vpack.c.bf16 %v1422_v4, %v1422_v4 }
 0x29f   : > { %v1797_v7 = vunpack.c.l.b16 %v1730_v5 }
 0x2a1   : > { %v1798_v8 = vpack.c.b16 %v1797_v7, %v1796_v6 }
 0x2a3   : > { %1810 = vmatpush.bf16.msrb.mxu2 %v1798_v8 }
 0x2f3   : > { %v1523_v38 = vpop.f32.mrf.mxu1 }
 0x2f4   : > { %v1590_v40 = vmul.f32 0.25, %v1523_v38 }
 0x2f6   : > { %v1623_v46 = vadd.f32 %v1615_v42, %v1590_v40 }
 0x2f8   : > { %v1635_v49 = vsel %vm1477_vm11, %v1623_v46, -inf }
 0x2fb   : > { %v1525_v57 = vpop.f32.mrf.mxu1 }
 0x2fc   : > { %v1591_v58 = vmul.f32 0.25, %v1525_v57 }
 0x2fe   : > { %v1624_v61 = vadd.f32 %v1616_v60, %v1591_v58 }
 0x300   : > { %v1638_v62 = vsel %vm1477_vm11, %v1624_v61, -inf }
 0x302   : > { %v1493_v16 = vpop.f32.mrf.mxu0 }
 0x303   : > { %v1588_v53 = vmul.f32 0.25, %v1493_v16 }
 0x305   : > { %v1621_v56 = vadd.f32 %v1613_v55, %v1588_v53 }
 0x307   : > { %v1629_v59 = vsel %vm1477_vm11, %v1621_v56, -inf }
 0x30a   : > { %v1495_v0 = vpop.f32.mrf.mxu0 }
 0x30b   : > { %v1589_v30 = vmul.f32 0.25, %v1495_v0 }
 0x30d   : > { %v1622_v31 = vadd.f32 %v1614_v34, %v1589_v30 }
 0x30f   : > { %v1583_v25 = vpop.f32.mrf.mxu3  ;;  %v1632_v41 = vsel %vm1477_vm11, %v1622_v31, -inf }
 0x310   : > { %v1594_v26 = vmul.f32 0.25, %v1583_v25 }
 0x312   : > { %v1627_v27 = vadd.f32 %v1619_v22, %v1594_v26 }
 0x314   : > { %v1647_v33 = vsel %vm1477_vm11, %v1627_v27, -inf }
 0x315   : > { %1648 = vmax.xlane.f32.xlu0 %v1647_v33 }
 0x317   : > { %v1585_v36 = vpop.f32.mrf.mxu3 }
 0x318   : > { %v1595_v37 = vmul.f32 0.25, %v1585_v36 }
 0x31a   : > { %v1628_v39 = vadd.f32 %v1620_v35, %v1595_v37 }
 0x31c   : > { %v1650_v24 = vsel %vm1477_vm11, %v1628_v39, -inf }
 0x31d   : > { %1651 = vmax.xlane.f32.xlu1 %v1650_v24  ;;  %1633 = vmax.xlane.f32.xlu0 %v1632_v41 }
 0x31e   : > { %v1553_v44 = vpop.f32.mrf.mxu2 }
 0x31f   : > { %v1592_v45 = vmul.f32 0.25, %v1553_v44 }
 0x321   : > { %v1625_v47 = vadd.f32 %v1617_v43, %v1592_v45 }
 0x323   : > { %v1641_v48 = vsel %vm1477_vm11, %v1625_v47, -inf }
 0x324   : > { %1642 = vmax.xlane.f32.xlu2 %v1641_v48 }
 0x325   : > { %1636 = vmax.xlane.f32.xlu1 %v1635_v49 }
 0x326   : > { %v1555_v51 = vpop.f32.mrf.mxu2 }
 0x327   : > { %v1593_v52 = vmul.f32 0.25, %v1555_v51 }
 0x329   : > { %v1626_v32 = vadd.f32 %v1618_v50, %v1593_v52 }
 0x32b   : > { %v1644_v54 = vsel %vm1477_vm11, %v1626_v32, -inf }
 0x32c   : > { %1645 = vmax.xlane.f32.xlu2 %v1644_v54 }
 0x334   : > { %1630 = vmax.xlane.f32.xlu2 %v1629_v59 }
 0x33c   : > { %1639 = vmax.xlane.f32.xlu2 %v1638_v62 }
 0x388   : > { %v1649_v63 = vpop.xlane.xlu0 %1648 }
 0x389   : > { %v1659_v1 = vsub.f32 %v1627_v27, %v1649_v63 }
 0x38b   : > { %v1673_v2 = vmul.f32 1.442695, %v1659_v1 }
 0x38d   : > { %2775 = vpow2.f32 %v1673_v2 }
 0x390   : > { %v1634_v3 = vpop.xlane.xlu0 %1633  ;;  %v1652_v8 = vpop.xlane.xlu1 %1651 }
 0x391   : > { %v1654_v4 = vsub.f32 %v1622_v31, %v1634_v3  ;;  %v1660_v11 = vsub.f32 %v1628_v39, %v1652_v8 }
 0x393   : > { %v3235_v5 = vpop.eup %2775  ;;  %v1663_v6 = vmul.f32 1.442695, %v1654_v4  ;;  %v1675_v15 = vmul.f32 1.442695, %v1660_v11 }
 0x394   : > { %v1695_v7 = vsel %vm1477_vm11, %v3235_v5, 0.0 }
 0x395   : > { %1696 = vadd.xlane.f32.xlu2 %v1695_v7  ;;  %2777 = vpow2.f32 %v1663_v6 }
 0x397   : > { %v1643_v9 = vpop.xlane.xlu2 %1642 }
 0x398   : > { %v1657_v10 = vsub.f32 %v1625_v47, %v1643_v9  ;;  %v1637_v16 = vpop.xlane.xlu1 %1636 }
 0x399   : > { %v1655_v20 = vsub.f32 %v1623_v46, %v1637_v16 }
 0x39a   : > { %v1669_v12 = vmul.f32 1.442695, %v1657_v10 }
 0x39b   : > { %v3239_v13 = vpop.eup %2777  ;;  %v1665_v25 = vmul.f32 1.442695, %v1655_v20 }
 0x39c   : > { %2779 = vpow2.f32 %v1669_v12  ;;  %v1680_v14 = vsel %vm1477_vm11, %v3239_v13, 0.0 }
 0x39d   : > { %1681 = vadd.xlane.f32.xlu2 %v1680_v14  ;;  %2781 = vpow2.f32 %v1675_v15 }
 0x39f   : > { %v1646_v17 = vpop.xlane.xlu2 %1645 }
 0x3a0   : > { %v1658_v18 = vsub.f32 %v1626_v32, %v1646_v17 }
 0x3a2   : > { %v2780_v19 = vpop.eup %2779  ;;  %v1671_v22 = vmul.f32 1.442695, %v1658_v18 }
 0x3a3   : > { %v1689_v23 = vsel %vm1477_vm11, %v2780_v19, 0.0  ;;  %v2782_v0 = vpop.eup %2781 }
 0x3a4   : > { %2783 = vpow2.f32 %v1671_v22  ;;  %1690 = vadd.xlane.f32.xlu0 %v1689_v23  ;;  %v1698_v34 = vsel %vm1477_vm11, %v2782_v0, 0.0  ;;  %v990_v23 = vld [vmem:[%s3055_s30 + $0x20] sm:$0xff] }
 0x3a5   : > { %2785 = vpow2.f32 %v1665_v25  ;;  %v991_v25 = vld [vmem:[%s3055_s30 + $0x28] sm:$0xff] }
 0x3a7   : > { %v1631_v26 = vpop.xlane.xlu2 %1630 }
 0x3a8   : > { %v1653_v27 = vsub.f32 %v1621_v56, %v1631_v26  ;;  %v992_v26 = vld [vmem:[%s3055_s30 + $0x30] sm:$0xff] }
 0x3aa   : > { %v2784_v28 = vpop.eup %2783  ;;  %v1661_v30 = vmul.f32 1.442695, %v1653_v27  ;;  %v1858_v27 = vpack.c.bf16 %v991_v25, %v991_v25 }
 0x3ab   : > { %v1692_v33 = vsel %vm1477_vm11, %v2784_v28, 0.0  ;;  %v2786_v36 = vpop.eup %2785 }
 0x3ac   : > { %2787 = vpow2.f32 %v1661_v30  ;;  %1693 = vadd.xlane.f32.xlu1 %v1692_v33  ;;  %1699 = vadd.xlane.f32.xlu0 %v1698_v34  ;;  %v1683_v40 = vsel %vm1477_vm11, %v2786_v36, 0.0  ;;  %v1859_v30 = vpack.c.bf16 %v992_v26, %v992_v26  ;;  %v986_v34 = vld [vmem:[%s3055_s30] sm:$0xff] }
 0x3af   : > { %v1640_v35 = vpop.xlane.xlu2 %1639 }
 0x3b0   : > { %v1656_v37 = vsub.f32 %v1624_v61, %v1640_v35  ;;  %v987_v35 = vld [vmem:[%s3055_s30 + $0x8] sm:$0xff] }
 0x3b2   : > { %v2788_v31 = vpop.eup %2787  ;;  %v1667_v38 = vmul.f32 1.442695, %v1656_v37  ;;  %v1925_v37 = vunpack.c.l.b16 %v1858_v27 }
 0x3b3   : > { %v1677_v39 = vsel %vm1477_vm11, %v2788_v31, 0.0 }
 0x3b4   : > { %2789 = vpow2.f32 %v1667_v38  ;;  %1678 = vadd.xlane.f32.xlu1 %v1677_v39  ;;  %1684 = vadd.xlane.f32.xlu0 %v1683_v40  ;;  %v1853_v38 = vpack.c.bf16 %v986_v34, %v986_v34  ;;  %v1854_v40 = vpack.c.bf16 %v987_v35, %v987_v35  ;;  %v2815_v35 = vld [vmem:[#allocation2] sm:$0xff] }
 0x3ba   : > { %v2790_v24 = vpop.eup %2789 }
 0x3bb   : > { %v1686_v41 = vsel %vm1477_vm11, %v2790_v24, 0.0 }
 0x3bc   : > { %1687 = vadd.xlane.f32.xlu1 %v1686_v41  ;;  %v1868_v41 = vunpack.c.l.b16 %v1853_v38 }
 0x408   : > { %v1697_v42 = vpop.xlane.xlu2 %1696 }
 0x410   : > { %v1682_v44 = vpop.xlane.xlu2 %1681 }
 0x417   : > { %v1691_v43 = vpop.xlane.xlu0 %1690 }
 0x418   : > { %2791 = vrcp.f32 %v1691_v43  ;;  %v1869_v43 = vunpack.c.l.b16 %v1854_v40 }
 0x419   : > { %2793 = vrcp.f32 %v1697_v42 }
 0x41e   : > { %v2792_v47 = vpop.eup %2791 }
 0x41f   : > { %v1694_v45 = vpop.xlane.xlu1 %1693  ;;  %v1700_v46 = vpop.xlane.xlu0 %1699  ;;  %v1713_v49 = vmul.f32 %v2792_v47, %v2780_v19 }
 0x420   : > { %2795 = vrcp.f32 %v1694_v45  ;;  %v2794_v48 = vpop.eup %2793  ;;  %v988_v45 = vld [vmem:[%s3055_s30 + $0x10] sm:$0xff] }
 0x421   : > { %2797 = vrcp.f32 %v1700_v46  ;;  %v1715_v50 = vmul.f32 %v2794_v48, %v3235_v5  ;;  %v1721_v32 = vpack.c.bf16 %v1713_v49, %v1713_v49  ;;  %v989_v46 = vld [vmem:[%s3055_s30 + $0x18] sm:$0xff]  ;;  %v1855_v47 = vpack.c.bf16 %v988_v45, %v988_v45  ;;  %v2816_v45 = vld [vmem:[#allocation2 + $0x8] sm:$0xff] }
 0x422   : > { %2799 = vrcp.f32 %v1682_v44  ;;  %v1870_v44 = vpack.c.b16 %v1869_v43, %v1868_v41  ;;  %v1856_v48 = vpack.c.bf16 %v989_v46, %v989_v46 }
 0x423   : > { %v1723_v57 = vpack.c.bf16 %v1715_v50, %v1715_v50  ;;  %v1791_v62 = vunpack.c.l.b16 %v1721_v32  ;;  %v1896_v49 = vunpack.c.l.b16 %v1855_v47 }
 0x424   : > { %1882 = vmatpush.bf16.msrb.mxu0 %v1870_v44  ;;  %v1897_v50 = vunpack.c.l.b16 %v1856_v48 }
 0x425   : > { %v1819_v1 = vunpack.c.l.b16 %v1723_v57 }
 0x426   : > { %v2796_v51 = vpop.eup %2795 }
 0x427   : > { %v2798_v52 = vpop.eup %2797  ;;  %v1714_v53 = vmul.f32 %v2796_v51, %v2784_v28  ;;  %v1679_v54 = vpop.xlane.xlu1 %1678  ;;  %v993_v28 = vld [vmem:[%s3055_s30 + $0x38] sm:$0xff]  ;;  %v1898_v51 = vpack.c.b16 %v1897_v50, %v1896_v49  ;;  %s3536_s30 = sld [smem:[#allocation21_spill]] (!%p2687_p8) }
 0x428   : > { %v1685_v55 = vpop.xlane.xlu0 %1684  ;;  %v2800_v56 = vpop.eup %2799  ;;  %v1716_v58 = vmul.f32 %v2798_v52, %v2782_v0  ;;  %2801 = vrcp.f32 %v1679_v54  ;;  %v1857_v0 = vpack.c.bf16 %v990_v23, %v990_v23  ;;  %v1860_v33 = vpack.c.bf16 %v993_v28, %v993_v28 }
 0x429   : > { %v1722_v59 = vpack.c.bf16 %v1714_v53, %v1714_v53  ;;  %2803 = vrcp.f32 %v1685_v55  ;;  %v1710_v61 = vmul.f32 %v2800_v56, %v3239_v13  ;;  %1910 = vmatpush.bf16.msra.mxu1 %v1898_v51 }
 0x42a   : > { %v1724_v60 = vpack.c.bf16 %v1716_v58, %v1716_v58  ;;  %v1953_v39 = vunpack.c.l.b16 %v1860_v33 }
 0x42b   : > { %v1792_v63 = vunpack.c.l.b16 %v1722_v59  ;;  %v1718_v6 = vpack.c.bf16 %v1710_v61, %v1710_v61 }
 0x42c   : > { %v1820_v2 = vunpack.c.l.b16 %v1724_v60 }
 0x42d   : > { %v1793_v3 = vpack.c.b16 %v1792_v63, %v1791_v62  ;;  %v1736_v11 = vunpack.c.l.b16 %v1718_v6 }
 0x42e   : > { %v2802_v4 = vpop.eup %2801  ;;  %v1821_v5 = vpack.c.b16 %v1820_v2, %v1819_v1 }
 0x42f   : > { %v1709_v7 = vmul.f32 %v2802_v4, %v2788_v31  ;;  %v1688_v8 = vpop.xlane.xlu1 %1687  ;;  %2680 = vmatmul.msk.bf16.vlgmr.msrb.gmra.mxu2 %vm1477_vm11, %v1793_v3  ;;  %v2804_v9 = vpop.eup %2803  ;;  %v1952_v31 = vunpack.c.l.b16 %v1859_v30  ;;  %v2764_v30 = vld [vmem:[%s3530_s22] ss:$0 sm:$0xff]  ;;  %s3537_s22 = smov (!%p2687_p8), %s3536_s30 }
 0x430   : > { %2805 = vrcp.f32 %v1688_v8  ;;  %2681 = vmatmul.msk.bf16.vlgmr.msra.gmra.mxu3 %vm1477_vm11, %v1821_v5  ;;  %v1711_v13 = vmul.f32 %v2804_v9, %v2786_v36  ;;  %v1924_v36 = vunpack.c.l.b16 %v1857_v0 }
 0x431   : > { %v1717_v10 = vpack.c.bf16 %v1709_v7, %v1709_v7  ;;  %v1954_v42 = vpack.c.b16 %v1953_v39, %v1952_v31 }
 0x432   : > { %v1719_v16 = vpack.c.bf16 %v1711_v13, %v1711_v13 }
 0x433   : > { %v1735_v12 = vunpack.c.l.b16 %v1717_v10  ;;  %1966 = vmatpush.bf16.msrb.mxu3 %v1954_v42 }
 0x434   : > { %v1763_v19 = vunpack.c.l.b16 %v1719_v16 }
 0x435   : > { %v1737_v14 = vpack.c.b16 %v1736_v11, %v1735_v12 }
 0x436   : > { %v2806_v15 = vpop.eup %2805 }
 0x437   : > { %v1712_v17 = vmul.f32 %v2806_v15, %v2790_v24  ;;  %2678 = vmatmul.msk.bf16.vlgmr.msra.gmra.mxu0 %vm1477_vm11, %v1737_v14  ;;  %v1926_v24 = vpack.c.b16 %v1925_v37, %v1924_v36 }
 0x439   : > { %v1720_v18 = vpack.c.bf16 %v1712_v17, %v1712_v17  ;;  %1938 = vmatpush.bf16.msra.mxu2 %v1926_v24 }
 0x43b   : > { %v1764_v20 = vunpack.c.l.b16 %v1720_v18 }
 0x43d   : > { %v1765_v22 = vpack.c.b16 %v1764_v20, %v1763_v19 }
 0x43f   : > { %2679 = vmatmul.msk.bf16.vlgmr.msrb.gmra.mxu1 %vm1477_vm11, %v1765_v22 }
 0x4b2   : > { %v1812_v52 = vpop.f32.mrf.mxu2 }
 0x4b3   : > { %v1840_v32 = vpop.f32.mrf.mxu3  ;;  %v1849_v54 = vpack.c.bf16 %v1812_v52, %v1812_v52 }
 0x4b4   : > { %v1756_v53 = vpop.f32.mrf.mxu0  ;;  %v1851_v55 = vpack.c.bf16 %v1840_v32, %v1840_v32 }
 0x4b5   : > { %v1845_v57 = vpack.c.bf16 %v1756_v53, %v1756_v53  ;;  %v1919_v63 = vunpack.c.l.b16 %v1849_v54 }
 0x4b6   : > { %v1947_v3 = vunpack.c.l.b16 %v1851_v55 }
 0x4b7   : > { %v1863_v5 = vunpack.c.l.b16 %v1845_v57 }
 0x4ba   : > { %v1814_v56 = vpop.f32.mrf.mxu2 }
 0x4bb   : > { %v1850_v58 = vpack.c.bf16 %v1814_v56, %v1814_v56  ;;  %v1842_v59 = vpop.f32.mrf.mxu3 }
 0x4bc   : > { %v1852_v60 = vpack.c.bf16 %v1842_v59, %v1842_v59  ;;  %v1758_v61 = vpop.f32.mrf.mxu0  ;;  %v1784_v62 = vpop.f32.mrf.mxu1  ;;  %v1000_v59 = vld [vmem:[%s3073_s6 + $0x18] sm:$0xff] }
 0x4bd   : > { %v1920_v1 = vunpack.c.l.b16 %v1850_v58  ;;  %v1846_v2 = vpack.c.bf16 %v1758_v61, %v1758_v61  ;;  %v1847_v10 = vpack.c.bf16 %v1784_v62, %v1784_v62  ;;  %v999_v58 = vld [vmem:[%s3073_s6 + $0x10] sm:$0xff] }
 0x4be   : > { %v1948_v4 = vunpack.c.l.b16 %v1852_v60  ;;  %v2050_v61 = vpack.c.bf16 %v1000_v59, %v999_v58 }
 0x4bf   : > { %v1921_v6 = vpack.c.b16 %v1920_v1, %v1919_v63  ;;  %v1864_v7 = vunpack.c.l.b16 %v1846_v2  ;;  %v1891_v13 = vunpack.c.l.b16 %v1847_v10  ;;  %v997_v1 = vld [vmem:[%s3073_s6] sm:$0xff]  ;;  %v998_v2 = vld [vmem:[%s3073_s6 + $0x8] sm:$0xff] }
 0x4c0   : > { %v1949_v8 = vpack.c.b16 %v1948_v4, %v1947_v3  ;;  %2063 = vmatpush.bf16.msra.mxu0 %v2050_v61  ;;  %v2049_v3 = vpack.c.bf16 %v998_v2, %v997_v1 }
 0x4c1   : > { %v1865_v9 = vpack.c.b16 %v1864_v7, %v1863_v5  ;;  %2684 = vmatmul.msk.bf16.vlgmr.msra.gmra.mxu2 %vm1477_vm11, %v1921_v6 }
 0x4c2   : > { %2685 = vmatmul.msk.bf16.vlgmr.msrb.gmra.mxu3 %vm1477_vm11, %v1949_v8 }
 0x4c3   : > { %2682 = vmatmul.msk.bf16.vlgmr.msrb.gmra.mxu0 %vm1477_vm11, %v1865_v9 }
 0x4c4   : > { %v1786_v11 = vpop.f32.mrf.mxu1  ;;  %2064 = vmatpush.bf16.msra.mxu0 %v2049_v3 }
 0x4c5   : > { %v1848_v12 = vpack.c.bf16 %v1786_v11, %v1786_v11 }
 0x4c7   : > { %v1892_v14 = vunpack.c.l.b16 %v1848_v12 }
 0x4c9   : > { %v1893_v15 = vpack.c.b16 %v1892_v14, %v1891_v13 }
 0x4cb   : > { %2683 = vmatmul.msk.bf16.vlgmr.msra.gmra.mxu1 %vm1477_vm11, %v1893_v15 }
 0x540   : > { %v1884_v16 = vpop.f32.mrf.mxu0 }
 0x541   : > { %v1973_v20 = vsel %vm1019_vm3, %v1884_v16, 0.0 }
 0x544   : > { %v1940_v17 = vpop.f32.mrf.mxu2 }
 0x545   : > { %v1968_v18 = vpop.f32.mrf.mxu3  ;;  %v1976_v25 = vsel %vm1019_vm3, %v1940_v17, 0.0 }
 0x546   : > { %v1978_v0 = vsel %vm1019_vm3, %v1968_v18, 0.0 }
 0x548   : > { %v1912_v19 = vpop.f32.mrf.mxu1  ;;  %v1886_v27 = vpop.f32.mrf.mxu0 }
 0x549   : > { %v1974_v22 = vsel %vm1019_vm3, %v1912_v19, 0.0  ;;  %v1980_v37 = vsel %vm1019_vm3, %v1886_v27, 0.0  ;;  %v2765_v19 = vld [vmem:[%s862_s16] ss:$0 sm:$0xff] }
 0x54a   : > { %v1975_v23 = vadd.f32 %v1974_v22, %v1973_v20 }
 0x54c   : > { %v1977_v26 = vadd.f32 %v1976_v25, %v1975_v23  ;;  %v1942_v33 = vpop.f32.mrf.mxu2  ;;  %v2766_v25 = vld [vmem:[%s3531_s18] ss:$0 sm:$0xff]  ;;  %s3542_s18 = sld [smem:[#allocation24_spill]] (!%p2687_p8) }
 0x54d   : > { %v1970_v38 = vpop.f32.mrf.mxu3  ;;  %v1983_v24 = vsel %vm1019_vm3, %v1942_v33, 0.0 }
 0x54e   : > { %v1979_v28 = vadd.f32 %v1978_v0, %v1977_v26  ;;  %v1985_v43 = vsel %vm1019_vm3, %v1970_v38, 0.0 }
 0x550   : > { %v1914_v34 = vpop.f32.mrf.mxu1  ;;  %v1987_v36 = vadd.f32 %v2815_v35, %v1979_v28  ;;  %v1017_v35 = vld [vmem:[%s3079_s27 + $0x78] sm:$0xff] }
 0x551   : > { %v1981_v31 = vsel %vm1019_vm3, %v1914_v34, 0.0  ;;  %v1016_v34 = vld [vmem:[%s3079_s27 + $0x70] sm:$0xff] }
 0x552   : > { %v1982_v39 = vadd.f32 %v1981_v31, %v1980_v37  ;;  %v3278_v40 = vadd.f32 %v2764_v30, %v1987_v36  ;;  %v2097_v36 = vpack.c.bf16 %v1017_v35, %v1016_v34  ;;  %v1014_v37 = vld [vmem:[%s3079_s27 + $0x60] sm:$0xff]  ;;  %v1015_v31 = vld [vmem:[%s3079_s27 + $0x68] sm:$0xff]  ;;  %s3543_s16 = scalar_lea.vmem (!%p2687_p8), %s3542_s18, %s3541_s2 }
 0x553   : > { %v2096_v38 = vpack.c.bf16 %v1015_v31, %v1014_v37 }
 0x554   : > { %v1984_v41 = vadd.f32 %v1983_v24, %v1982_v39  ;;  %v1994_v42 = vsel %vm1019_vm3, %v3278_v40, 0.0  ;;  %2098 = vmatpush.bf16.msrb.mxu1 %v2097_v36  ;;  %v1012_v39 = vld [vmem:[%s3079_s27 + $0x50] sm:$0xff]  ;;  %v1013_v24 = vld [vmem:[%s3079_s27 + $0x58] sm:$0xff] }
 0x555   : > { %1995 = vadd.xlane.f32.xlu2 %v1994_v42  ;;  %v1010_v42 = vld [vmem:[%s3079_s27 + $0x40] sm:$0xff] }
 0x556   : > { %v1986_v44 = vadd.f32 %v1985_v43, %v1984_v41  ;;  %v2095_v41 = vpack.c.bf16 %v1013_v24, %v1012_v39  ;;  %v1011_v43 = vld [vmem:[%s3079_s27 + $0x48] sm:$0xff] }
 0x558   : > { %v1988_v46 = vadd.f32 %v2816_v45, %v1986_v44  ;;  %2099 = vmatpush.bf16.msrb.mxu1 %v2096_v38  ;;  %v2094_v44 = vpack.c.bf16 %v1011_v43, %v1010_v42  ;;  %v1008_v45 = vld [vmem:[%s3079_s27 + $0x30] sm:$0xff] }
 0x55a   : > { %v3284_v47 = vadd.f32 %v2764_v30, %v1988_v46  ;;  %v1009_v46 = vld [vmem:[%s3079_s27 + $0x38] sm:$0xff] }
 0x55c   : > { %v1997_v48 = vsel %vm1019_vm3, %v3284_v47, 0.0  ;;  %2100 = vmatpush.bf16.msrb.mxu1 %v2095_v41 }
 0x55d   : > { %1998 = vadd.xlane.f32.xlu0 %v1997_v48  ;;  %v2093_v48 = vpack.c.bf16 %v1009_v46, %v1008_v45 }
 0x560   : > { %2101 = vmatpush.bf16.msrb.mxu1 %v2094_v44 }
 0x564   : > { %2102 = vmatpush.bf16.msrb.mxu1 %v2093_v48 }
 0x5c8   : > { %v1996_v49 = vpop.xlane.xlu2 %1995 }
 0x5c9   : > { %v2000_v50 = vmul.f32 %v1996_v49, %v3104_v21  ;;  %v1006_v49 = vld [vmem:[%s3079_s27 + $0x20] sm:$0xff] }
 0x5cb   : > { %v2002_v51 = vsub.f32 %v3278_v40, %v2000_v50  ;;  %v1007_v50 = vld [vmem:[%s3079_s27 + $0x28] sm:$0xff] }
 0x5cd   : > { %v2004_v52 = vmul.f32 %v2002_v51, %v2002_v51 }
 0x5cf   : > { %v2006_v32 = vsel %vm1019_vm3, %v2004_v52, 0.0  ;;  %v1004_v52 = vld [vmem:[%s3079_s27 + $0x10] sm:$0xff] }
 0x5d0   : > { %2007 = vadd.xlane.f32.xlu1 %v2006_v32  ;;  %v1999_v53 = vpop.xlane.xlu0 %1998  ;;  %v1005_v32 = vld [vmem:[%s3079_s27 + $0x18] sm:$0xff] }
 0x5d1   : > { %v2001_v54 = vmul.f32 %v1999_v53, %v3104_v21  ;;  %v2767_v53 = vld [vmem:[%s3532_s5] ss:$0 sm:$0xff] }
 0x5d3   : > { %v2003_v55 = vsub.f32 %v3284_v47, %v2001_v54  ;;  %v2091_v54 = vpack.c.bf16 %v1005_v32, %v1004_v52 }
 0x5d5   : > { %v2005_v56 = vmul.f32 %v2003_v55, %v2003_v55 }
 0x5d7   : > { %v2009_v57 = vsel %vm1019_vm3, %v2005_v56, 0.0  ;;  %v1002_v56 = vld [vmem:[%s3079_s27] sm:$0xff] }
 0x5d8   : > { %2010 = vadd.xlane.f32.xlu2 %v2009_v57  ;;  %v1003_v57 = vld [vmem:[%s3079_s27 + $0x8] sm:$0xff] }
 0x5d9   : > { %v2090_v59 = vpack.c.bf16 %v1003_v57, %v1002_v56 }
 0x643   : > { %v2008_v60 = vpop.xlane.xlu1 %2007 }
 0x644   : > { %v2012_v62 = vmul.f32 %v2008_v60, %v3104_v21 }
 0x646   : > { %v2014_v63 = vadd.f32 1e-05, %v2012_v62 }
 0x648   : > { %2807 = vrsqrt.f32 %v2014_v63  ;;  %vm2022_vm15 = vweird.f32 %v2014_v63 }
 0x64b   : > { %v2011_v4 = vpop.xlane.xlu2 %2010 }
 0x64c   : > { %v2013_v5 = vmul.f32 %v2011_v4, %v3104_v21 }
 0x64e   : > { %v2808_v6 = vpop.eup %2807  ;;  %v2015_v7 = vadd.f32 1e-05, %v2013_v5 }
 0x64f   : > { %v2017_v8 = vmul.f32 %v2808_v6, %v2014_v63  ;;  %vm2023_vm14 = vweird.f32 %v2808_v6 }
 0x650   : > { %2809 = vrsqrt.f32 %v2015_v7  ;;  %vm2024_vm0 = vmor %vm2022_vm15, %vm2023_vm14  ;;  %vm2032_vm2 = vweird.f32 %v2015_v7 }
 0x651   : > { %v2018_v9 = vmul.f32 %v2808_v6, %v2017_v8 }
 0x653   : > { %v2019_v10 = vmul.f32 0.5, %v2018_v9 }
 0x655   : > { %v2020_v11 = vsub.f32 1.5, %v2019_v10 }
 0x656   : > { %v2810_v12 = vpop.eup %2809 }
 0x657   : > { %v2021_v13 = vmul.f32 %v2808_v6, %v2020_v11  ;;  %v2027_v14 = vmul.f32 %v2810_v12, %v2015_v7  ;;  %vm2033_vm1 = vweird.f32 %v2810_v12 }
 0x658   : > { %vm2034_vm4 = vmor %vm2032_vm2, %vm2033_vm1 }
 0x659   : > { %v2028_v15 = vmul.f32 %v2810_v12, %v2027_v14  ;;  %v2025_v16 = vsel %vm2024_vm0, %v2808_v6, %v2021_v13 }
 0x65a   : > { %v2036_v20 = vmul.f32 %v2025_v16, %v2002_v51  ;;  %v2092_v51 = vpack.c.bf16 %v1007_v50, %v1006_v49 }
 0x65b   : > { %v2029_v17 = vmul.f32 0.5, %v2028_v15 }
 0x65c   : > { %v2041_v26 = vmul.f32 %v2765_v19, %v2036_v20  ;;  %2103 = vmatpush.bf16.msrb.mxu1 %v2092_v51 }
 0x65d   : > { %v2030_v18 = vsub.f32 1.5, %v2029_v17 }
 0x65e   : > { %v2046_v28 = vadd.f32 %v2766_v25, %v2041_v26 }
 0x65f   : > { %v2031_v22 = vmul.f32 %v2810_v12, %v2030_v18  ;;  %v2768_v18 = vld [vmem:[%s881_s17] ss:$0 sm:$0xff] }
 0x660   : > { %2104 = vmatpush.bf16.msrb.mxu1 %v2091_v54 }
 0x661   : > { %v2035_v23 = vsel %vm2034_vm4, %v2810_v12, %v2031_v22 }
 0x662   : > { %v2037_v0 = vmul.f32 %v2035_v23, %v2003_v55 }
 0x664   : > { %v2042_v27 = vmul.f32 %v2765_v19, %v2037_v0  ;;  %2105 = vmatpush.bf16.msrb.mxu1 %v2090_v59 }
 0x666   : > { %v2047_v30 = vadd.f32 %v2766_v25, %v2042_v27 }
 0x668   : > { %v2048_v33 = vpack.c.bf16 %v2047_v30, %v2046_v28 }
 0x66a   : > { %2686 = vmatmul.msk.bf16.vlgmr.msra.gmra.mxu0 %vm1019_vm3, %v2048_v33 }
 0x6e7   : > { %v2066_v55 = vpop.f32.mrf.mxu0 }
 0x6e8   : > { %v2067_v58 = vadd.f32 %v2767_v53, %v2066_v55 }
 0x6ea   : > { %v2071_v60 = vmul.f32 %v2067_v58, %v2067_v58 }
 0x6ec   : > { %v2073_v61 = vmul.f32 %v2071_v60, %v2067_v58 }
 0x6ee   : > { %v2075_v62 = vmul.f32 0.044715, %v2073_v61 }
 0x6ef   : > { %v2068_v63 = vpop.f32.mrf.mxu0 }
 0x6f0   : > { %v2077_v1 = vadd.f32 %v2075_v62, %v2067_v58  ;;  %v2069_v2 = vadd.f32 %v2767_v53, %v2068_v63 }
 0x6f2   : > { %v2079_v3 = vmul.f32 0.7978846, %v2077_v1  ;;  %v2072_v4 = vmul.f32 %v2069_v2, %v2069_v2 }
 0x6f4   : > { %v2074_v5 = vmul.f32 %v2072_v4, %v2069_v2  ;;  %2811 = vtanh.f32 %v2079_v3 }
 0x6f6   : > { %v2076_v6 = vmul.f32 0.044715, %v2074_v5 }
 0x6f8   : > { %v2078_v7 = vadd.f32 %v2076_v6, %v2069_v2 }
 0x6fa   : > { %v2080_v8 = vmul.f32 0.7978846, %v2078_v7  ;;  %v2812_v9 = vpop.eup %2811 }
 0x6fb   : > { %v2083_v10 = vadd.f32 1.0, %v2812_v9 }
 0x6fc   : > { %2813 = vtanh.f32 %v2080_v8 }
 0x6fd   : > { %v2085_v12 = vmul.f32 0.5, %v2083_v10 }
 0x6ff   : > { %v2087_v15 = vmul.f32 %v2085_v12, %v2067_v58 }
 0x702   : > { %v2814_v11 = vpop.eup %2813 }
 0x703   : > { %v2084_v13 = vadd.f32 1.0, %v2814_v11 }
 0x705   : > { %v2086_v14 = vmul.f32 0.5, %v2084_v13 }
 0x707   : > { %v2088_v16 = vmul.f32 %v2086_v14, %v2069_v2 }
 0x709   : > { %v2089_v17 = vpack.c.bf16 %v2088_v16, %v2087_v15 }
 0x70b   : > { %2106 = vmatmul.bf16.vlgmr.msrb.gmra.mxu1 %v2089_v17 }
 0x788   : > { %v2107_v19 = vpop.f32.mrf.mxu1 }
 0x789   : > { %v2112_v20 = vadd.f32 %v2107_v19, %v3278_v40 }
 0x78b   : > { %v2117_v22 = vadd.f32 %v2768_v18, %v2112_v20 }
 0x78d   : > { %2119 = vst.msk [vmem:[#allocation2] sm:$0xff] %vm1019_vm3, %v2117_v22 }
 0x790   : > { %v2109_v23 = vpop.f32.mrf.mxu1 }
 0x791   : > { %v2113_v25 = vadd.f32 %v2109_v23, %v3284_v47  ;;  %2124 = sbr.rel (%p2687_p8) target bundleno = 3250 (0xcb2), region = 108 }
 0x793   : > { %v2118_v26 = vadd.f32 %v2768_v18, %v2113_v25 }
 0x795   : > { %2120 = vst.msk [vmem:[#allocation2 + $0x8] sm:$0xff] %vm1019_vm3, %v2118_v26 }
 0x796   : > { %v2127_v0 = vsel %vm1019_vm3, %v2117_v22, 0.0  ;;  %v2130_v27 = vsel %vm1019_vm3, %v2118_v26, 0.0  ;;  %v2817_v32 = vld [vmem:[%s3534_s0] ss:$0 sm:$0xff]  ;;  %v2244_v5 = vld [vmem:[%s3536_s30 + $0x38] sm:$0xff]  ;;  %v2243_v16 = vld [vmem:[%s3537_s22 + $0x30] sm:$0xff] }
 0x797   : > { %2128 = vadd.xlane.f32.xlu0 %v2127_v0  ;;  %v2818_v56 = vld [vmem:[%s3535_s3] ss:$0 sm:$0xff]  ;;  %2688 = vmatpush.xpose.msk.msra.mxu0 %vm1019_vm3, %v2244_v5  ;;  %v2242_v17 = vld [vmem:[%s3537_s22 + $0x28] sm:$0xff]  ;;  %v2240_v19 = vld [vmem:[%s3537_s22 + $0x18] sm:$0xff]  ;;  %s3538_s3 = sld [smem:[#allocation19_spill]]  ;;  %vm2306_vm1 = vcmask 523264  }
 0x798   : > { %2710 = vmatpush.xpose.msk.msra.mxu2 %vm1019_vm3, %v2244_v5  ;;  %2370 = vmatpush.msra.mxu1 %v2244_v5  ;;  %v2241_v18 = vld [vmem:[%s3537_s22 + $0x20] sm:$0xff]  ;;  %v2239_v20 = vld [vmem:[%s3537_s22 + $0x10] sm:$0xff]  ;;  %s3539_s30 = sld [smem:[#allocation20_spill]] }
 0x799   : > { %v2237_v23 = vld [vmem:[%s3537_s22] sm:$0xff] }
 0x79a   : > { %2371 = vmatpush.msra.mxu1 %v2243_v16 }
 0x79b   : > { %2689 = vmatpush.xpose.msk.msra.mxu0 %vm1019_vm3, %v2243_v16 }
 0x79c   : > { %2711 = vmatpush.xpose.msk.msra.mxu2 %vm1019_vm3, %v2243_v16  ;;  %2372 = vmatpush.msra.mxu1 %v2242_v17 }
 0x79e   : > { %2373 = vmatpush.msra.mxu1 %v2241_v18 }
 0x79f   : > { %2131 = vadd.xlane.f32.xlu0 %v2130_v27  ;;  %2690 = vmatpush.xpose.msk.msra.mxu0 %vm1019_vm3, %v2242_v17 }
 0x7a0   : > { %2712 = vmatpush.xpose.msk.msra.mxu2 %vm1019_vm3, %v2242_v17  ;;  %2374 = vmatpush.msra.mxu1 %v2240_v19 }
 0x7a2   : > { %2375 = vmatpush.msra.mxu1 %v2239_v20 }
 0x7a3   : > { %2691 = vmatpush.xpose.msk.msra.mxu0 %vm1019_vm3, %v2241_v18 }
 0x7a4   : > { %2713 = vmatpush.xpose.msk.msra.mxu2 %vm1019_vm3, %v2241_v18 }
 0x7a7   : > { %2692 = vmatpush.xpose.msk.msra.mxu0 %vm1019_vm3, %v2240_v19 }
 0x7a8   : > { %2714 = vmatpush.xpose.msk.msra.mxu2 %vm1019_vm3, %v2240_v19 }
 0x7ab   : > { %2693 = vmatpush.xpose.msk.msra.mxu0 %vm1019_vm3, %v2239_v20 }
 0x7ac   : > { %2715 = vmatpush.xpose.msk.msra.mxu2 %vm1019_vm3, %v2239_v20  ;;  %v2871_v20 = vmov 0.0  }
 0x80a   : > { %v2129_v28 = vpop.xlane.xlu0 %2128 }
 0x80b   : > { %v2133_v40 = vmul.f32 %v2129_v28, %v3104_v21 }
 0x80d   : > { %v2135_v30 = vsub.f32 %v2117_v22, %v2133_v40  ;;  %v2238_v22 = vld [vmem:[%s3537_s22 + $0x8] sm:$0xff] }
 0x80e   : > { %2694 = vmatpush.xpose.msk.msra.mxu0 %vm1019_vm3, %v2238_v22  ;;  %2716 = vmatpush.xpose.msk.msra.mxu2 %vm1019_vm3, %v2238_v22 }
 0x80f   : > { %v2137_v33 = vmul.f32 %v2135_v30, %v2135_v30  ;;  %2376 = vmatpush.msra.mxu1 %v2238_v22 }
 0x811   : > { %v2139_v34 = vsel %vm1019_vm3, %v2137_v33, 0.0  ;;  %2377 = vmatpush.msra.mxu1 %v2237_v23 }
 0x812   : > { %2140 = vadd.xlane.f32.xlu1 %v2139_v34  ;;  %v2132_v47 = vpop.xlane.xlu0 %2131  ;;  %2695 = vmatpush.xpose.msk.msra.mxu0 %vm1019_vm3, %v2237_v23 }
 0x813   : > { %v2134_v35 = vmul.f32 %v2132_v47, %v3104_v21  ;;  %2717 = vmatpush.xpose.msk.msra.mxu2 %vm1019_vm3, %v2237_v23 }
 0x815   : > { %v2136_v36 = vsub.f32 %v2118_v26, %v2134_v35 }
 0x817   : > { %v2138_v37 = vmul.f32 %v2136_v36, %v2136_v36 }
 0x819   : > { %v2142_v31 = vsel %vm1019_vm3, %v2138_v37, 0.0 }
 0x81a   : > { %2143 = vadd.xlane.f32.xlu1 %v2142_v31 }
 0x885   : > { %v2141_v38 = vpop.xlane.xlu1 %2140 }
 0x886   : > { %v2145_v39 = vmul.f32 %v2141_v38, %v3104_v21  ;;  %v2819_v38 = vld [vmem:[%s3538_s3] ss:$0 sm:$0xff] }
 0x888   : > { %v2147_v24 = vadd.f32 1e-05, %v2145_v39 }
 0x88a   : > { %2822 = vrsqrt.f32 %v2147_v24  ;;  %vm2155_vm6 = vweird.f32 %v2147_v24 }
 0x88d   : > { %v2144_v41 = vpop.xlane.xlu1 %2143 }
 0x88e   : > { %v2146_v42 = vmul.f32 %v2144_v41, %v3104_v21  ;;  %v2820_v41 = vld [vmem:[%s3539_s30] ss:$0 sm:$0xff] }
 0x890   : > { %v2823_v43 = vpop.eup %2822  ;;  %v2148_v44 = vadd.f32 1e-05, %v2146_v42 }
 0x891   : > { %v2150_v45 = vmul.f32 %v2823_v43, %v2147_v24  ;;  %vm2156_vm5 = vweird.f32 %v2823_v43 }
 0x892   : > { %2824 = vrsqrt.f32 %v2148_v44  ;;  %vm2157_vm7 = vmor %vm2155_vm6, %vm2156_vm5  ;;  %vm2165_vm9 = vweird.f32 %v2148_v44 }
 0x893   : > { %v2151_v46 = vmul.f32 %v2823_v43, %v2150_v45 }
 0x895   : > { %v2152_v48 = vmul.f32 0.5, %v2151_v46 }
 0x897   : > { %v2153_v49 = vsub.f32 1.5, %v2152_v48 }
 0x898   : > { %v2825_v50 = vpop.eup %2824 }
 0x899   : > { %v2154_v51 = vmul.f32 %v2823_v43, %v2153_v49  ;;  %v2160_v52 = vmul.f32 %v2825_v50, %v2148_v44  ;;  %vm2166_vm8 = vweird.f32 %v2825_v50 }
 0x89a   : > { %vm2167_vm10 = vmor %vm2165_vm9, %vm2166_vm8 }
 0x89b   : > { %v2161_v53 = vmul.f32 %v2825_v50, %v2160_v52  ;;  %v2158_v54 = vsel %vm2157_vm7, %v2823_v43, %v2154_v51  ;;  %v2821_v52 = vld [vmem:[%s3540_s14] ss:$0 sm:$0xff]  ;;  %vm2347_vm7 = vcmask 7168  }
 0x89c   : > { %v2169_v55 = vmul.f32 %v2158_v54, %v2135_v30 }
 0x89d   : > { %v2162_v57 = vmul.f32 0.5, %v2161_v53 }
 0x89e   : > { %v2174_v58 = vmul.f32 %v2817_v32, %v2169_v55 }
 0x89f   : > { %v2163_v59 = vsub.f32 1.5, %v2162_v57 }
 0x8a0   : > { %v2179_v60 = vadd.f32 %v2818_v56, %v2174_v58 }
 0x8a1   : > { %v2164_v61 = vmul.f32 %v2825_v50, %v2163_v59 }
 0x8a2   : > { %v2183_v62 = vsel %vm1019_vm3, %v2179_v60, 0.0 }
 0x8a3   : > { %2184 = vadd.xlane.f32.xlu2 %v2183_v62  ;;  %v2168_v63 = vsel %vm2167_vm10, %v2825_v50, %v2164_v61  ;;  %vm2405_vm10 = vcmask 0  }
 0x8a4   : > { %v2170_v1 = vmul.f32 %v2168_v63, %v2136_v36 }
 0x8a6   : > { %v2175_v2 = vmul.f32 %v2817_v32, %v2170_v1 }
 0x8a8   : > { %v2180_v3 = vadd.f32 %v2818_v56, %v2175_v2 }
 0x8aa   : > { %v2186_v4 = vsel %vm1019_vm3, %v2180_v3, 0.0 }
 0x8ab   : > { %2187 = vadd.xlane.f32.xlu2 %v2186_v4 }
 0x916   : > { %v2185_v6 = vpop.xlane.xlu2 %2184 }
 0x917   : > { %v2189_v7 = vmul.f32 %v2185_v6, %v3104_v21 }
 0x919   : > { %v2191_v8 = vsub.f32 %v2179_v60, %v2189_v7 }
 0x91b   : > { %v2193_v9 = vmul.f32 %v2191_v8, %v2191_v8 }
 0x91d   : > { %v2195_v10 = vsel %vm1019_vm3, %v2193_v9, 0.0 }
 0x91e   : > { %2196 = vadd.xlane.f32.xlu0 %v2195_v10  ;;  %v2188_v11 = vpop.xlane.xlu2 %2187 }
 0x91f   : > { %v2190_v12 = vmul.f32 %v2188_v11, %v3104_v21 }
 0x921   : > { %v3366_v13 = vsub.f32 %v2180_v3, %v2190_v12 }
 0x923   : > { %v2194_v14 = vmul.f32 %v3366_v13, %v3366_v13 }
 0x925   : > { %v2198_v15 = vsel %vm1019_vm3, %v2194_v14, 0.0 }
 0x926   : > { %2199 = vadd.xlane.f32.xlu1 %v2198_v15 }
 0x991   : > { %v2197_v25 = vpop.xlane.xlu0 %2196 }
 0x992   : > { %v2201_v26 = vmul.f32 %v2197_v25, %v3104_v21 }
 0x994   : > { %v2203_v0 = vadd.f32 1e-05, %v2201_v26 }
 0x996   : > { %2826 = vrsqrt.f32 %v2203_v0  ;;  %vm2211_vm12 = vweird.f32 %v2203_v0 }
 0x999   : > { %v2200_v27 = vpop.xlane.xlu1 %2199 }
 0x99a   : > { %v2202_v28 = vmul.f32 %v2200_v27, %v3104_v21 }
 0x99c   : > { %v2827_v40 = vpop.eup %2826  ;;  %v2204_v30 = vadd.f32 1e-05, %v2202_v28 }
 0x99d   : > { %v2206_v33 = vmul.f32 %v2827_v40, %v2203_v0  ;;  %vm2212_vm11 = vweird.f32 %v2827_v40 }
 0x99e   : > { %2828 = vrsqrt.f32 %v2204_v30  ;;  %vm2213_vm13 = vmor %vm2211_vm12, %vm2212_vm11  ;;  %vm2221_vm15 = vweird.f32 %v2204_v30 }
 0x99f   : > { %v2207_v34 = vmul.f32 %v2827_v40, %v2206_v33 }
 0x9a1   : > { %v2208_v47 = vmul.f32 0.5, %v2207_v34 }
 0x9a3   : > { %v2209_v35 = vsub.f32 1.5, %v2208_v47 }
 0x9a4   : > { %v2829_v36 = vpop.eup %2828 }
 0x9a5   : > { %v2210_v37 = vmul.f32 %v2827_v40, %v2209_v35  ;;  %v2216_v31 = vmul.f32 %v2829_v36, %v2204_v30  ;;  %vm2222_vm14 = vweird.f32 %v2829_v36 }
 0x9a6   : > { %vm2223_vm0 = vmor %vm2221_vm15, %vm2222_vm14 }
 0x9a7   : > { %v2217_v39 = vmul.f32 %v2829_v36, %v2216_v31  ;;  %v2214_v24 = vsel %vm2213_vm13, %v2827_v40, %v2210_v37 }
 0x9a8   : > { %v2225_v21 = vmul.f32 %v2214_v24, %v2191_v8 }
 0x9a9   : > { %v2218_v42 = vmul.f32 0.5, %v2217_v39 }
 0x9aa   : > { %v2230_v43 = vmul.f32 %v2819_v38, %v2225_v21 }
 0x9ab   : > { %v2219_v44 = vsub.f32 1.5, %v2218_v42 }
 0x9ac   : > { %v3414_v45 = vadd.f32 %v2820_v41, %v2230_v43 }
 0x9ad   : > { %v2220_v46 = vmul.f32 %v2829_v36, %v2219_v44 }
 0x9ae   : > { %2696 = vmatmul.msk.f32.vlgmr.msra.gmra.mxu0 %vm1019_vm3, %v3414_v45 }
 0x9af   : > { %v2224_v48 = vsel %vm2223_vm0, %v2829_v36, %v2220_v46 }
 0x9b0   : > { %v2226_v49 = vmul.f32 %v2224_v48, %v3366_v13 }
 0x9b2   : > { %v2231_v50 = vmul.f32 %v2819_v38, %v2226_v49 }
 0x9b4   : > { %v3419_v51 = vadd.f32 %v2820_v41, %v2231_v50 }
 0x9b6   : > { %2697 = vmatmul.msk.f32.vlgmr.msra.gmra.mxu2 %vm1019_vm3, %v3419_v51 }
 0xa2b   : > { %v2292_v32 = vpop.f32.mrf.mxu0 }
 0xa2c   : > { %v2299_v53 = vmul.f32 2.0, %v2292_v32 }
 0xa2e   : > { %v2304_v54 = vsub.f32 %v2821_v52, %v2299_v53 }
 0xa30   : > { %v2307_v55 = vsel %vm2306_vm1, %v2304_v54, inf }
 0xa31   : > { %2308 = vmin.xlane.f32.xlu2 %v2307_v55 }
 0xa39   : > { %v2295_v56 = vpop.f32.mrf.mxu2 }
 0xa3a   : > { %v2300_v57 = vmul.f32 2.0, %v2295_v56 }
 0xa3c   : > { %v2305_v58 = vsub.f32 %v2821_v52, %v2300_v57 }
 0xa3e   : > { %v2310_v59 = vsel %vm2306_vm1, %v2305_v58, inf }
 0xa3f   : > { %2311 = vmin.xlane.f32.xlu0 %v2310_v59 }
 0xaa4   : > { %v2309_v60 = vpop.xlane.xlu2 %2308 }
 0xaa5   : > { %vm2313_vm2 = vcmp.le.f32.partialorder %v2304_v54, %v2309_v60 }
 0xaa6   : > { %v2315_v61 = vsel %vm2313_vm2, %v3223_v29, 64 }
 0xaa7   : > { %v2317_v62 = vsel %vm2306_vm1, %v2315_v61, 2147483647 }
 0xaa8   : > { %v2319_v63 = vshra.s32 %v2317_v62, 16  ;;  %v2318_v7 = vand.u32 65535, %v2317_v62 }
 0xaaa   : > { %v2321_v1 = vcvt.s32.f32 %v2319_v63  ;;  %v2320_v9 = vcvt.s32.f32 %v2318_v7 }
 0xaac   : > { %2322 = vmin.xlane.f32.xlu1 %v2321_v1 }
 0xab2   : > { %v2312_v2 = vpop.xlane.xlu0 %2311 }
 0xab3   : > { %vm2314_vm4 = vcmp.le.f32.partialorder %v2305_v58, %v2312_v2 }
 0xab4   : > { %v2316_v3 = vsel %vm2314_vm4, %v3223_v29, 64 }
 0xab5   : > { %v2332_v4 = vsel %vm2306_vm1, %v2316_v3, 2147483647 }
 0xab6   : > { %v2334_v5 = vshra.s32 %v2332_v4, 16  ;;  %v2333_v11 = vand.u32 65535, %v2332_v4 }
 0xab8   : > { %v2336_v6 = vcvt.s32.f32 %v2334_v5  ;;  %v2335_v13 = vcvt.s32.f32 %v2333_v11 }
 0xaba   : > { %2337 = vmin.xlane.f32.xlu2 %v2336_v6 }
 0xb1f   : > { %v2323_v8 = vpop.xlane.xlu1 %2322 }
 0xb20   : > { %vm2324_vm5 = vcmp.eq.f32.partialorder %v2321_v1, %v2323_v8  ;;  %v2329_v15 = vcvt.f32.s32 %v2323_v8 }
 0xb21   : > { %v2325_v10 = vsel %vm2324_vm5, %v2320_v9, inf }
 0xb22   : > { %2326 = vmin.xlane.f32.xlu0 %v2325_v10  ;;  %v2330_v17 = vshll.u32 %v2329_v15, 16 }
 0xb2d   : > { %v2338_v12 = vpop.xlane.xlu2 %2337 }
 0xb2e   : > { %vm2339_vm6 = vcmp.eq.f32.partialorder %v2336_v6, %v2338_v12  ;;  %v2344_v23 = vcvt.f32.s32 %v2338_v12 }
 0xb2f   : > { %v2340_v14 = vsel %vm2339_vm6, %v2335_v13, inf }
 0xb30   : > { %2341 = vmin.xlane.f32.xlu1 %v2340_v14  ;;  %v2345_v26 = vshll.u32 %v2344_v23, 16 }
 0xb95   : > { %v2327_v16 = vpop.xlane.xlu0 %2326 }
 0xb96   : > { %v2328_v18 = vcvt.f32.s32 %v2327_v16 }
 0xb98   : > { %v2331_v19 = vadd.s32 %v2330_v17, %v2328_v18 }
 0xb9a   : > { %2348 = vst.msk [vmem:[%s3093_s21] sm:$0xff] %vm2347_vm7, %v2331_v19  ;;  %vm2350_vm8 = vcmp.eq.s32.totalorder %v3223_v29, %v2331_v19 }
 0xb9b   : > { %v2698_v22 = vsel %vm2350_vm8, 1.0, %v2871_v20 }
 0xb9c   : > { %2700 = vmatmul.msk.f32.vlgmr.msra.gmra.mxu1 %vm2306_vm1, %v2698_v22 }
 0xba3   : > { %v2342_v25 = vpop.xlane.xlu1 %2341 }
 0xba4   : > { %v2343_v0 = vcvt.f32.s32 %v2342_v25 }
 0xba6   : > { %v2346_v27 = vadd.s32 %v2345_v26, %v2343_v0 }
 0xba8   : > { %2349 = vst.msk [vmem:[%s3093_s21 + $0x8] sm:$0xff] %vm2347_vm7, %v2346_v27  ;;  %vm2351_vm9 = vcmp.eq.s32.totalorder %v3223_v29, %v2346_v27 }
 0xba9   : > { %v2699_v28 = vsel %vm2351_vm9, 1.0, %v2871_v20 }
 0xbaa   : > { %2701 = vmatmul.msk.f32.gmra.mxu1 %vm2306_vm1, %v2699_v28 }
 0xc19   : > { %v2379_v40 = vpop.f32.mrf.mxu1 }
 0xc1a   : > { %2385 = vst.msk [vmem:[%s3088_s24] sm:$0xff] %vm1019_vm3, %v2379_v40  ;;  %v2387_v30 = vsub.f32 %v2379_v40, %v3414_v45 }
 0xc1c   : > { %v2389_v33 = vmul.f32 %v2387_v30, %v2387_v30 }
 0xc1e   : > { %v2391_v34 = vsel %vm1019_vm3, %v2389_v33, 0.0 }
 0xc1f   : > { %2392 = vadd.xlane.f32.xlu2 %v2391_v34 }
 0xc27   : > { %v2382_v47 = vpop.f32.mrf.mxu1 }
 0xc28   : > { %2386 = vst.msk [vmem:[%s3088_s24 + $0x8] sm:$0xff] %vm1019_vm3, %v2382_v47  ;;  %v2388_v35 = vsub.f32 %v2382_v47, %v3419_v51 }
 0xc2a   : > { %v2390_v36 = vmul.f32 %v2388_v35, %v2388_v35 }
 0xc2c   : > { %v2394_v29 = vsel %vm1019_vm3, %v2390_v36, 0.0 }
 0xc2d   : > { %2395 = vadd.xlane.f32.xlu0 %v2394_v29 }
 0xc92   : > { %v2393_v37 = vpop.xlane.xlu2 %2392 }
 0xca0   : > { %v2396_v31 = vpop.xlane.xlu0 %2395 }
 0xca1   : > { %v2397_v38 = vadd.f32 %v2396_v31, %v2393_v37 }
 0xca3   : > { %v2398_v39 = vrot.slane %v2397_v38, 4 }
 0xca5   : > { %v2399_v24 = vadd.f32 %v2398_v39, %v2397_v38 }
 0xca7   : > { %v2400_v21 = vrot.slane %v2399_v24, 2 }
 0xca9   : > { %v2401_v41 = vadd.f32 %v2400_v21, %v2399_v24 }
 0xcab   : > { %v2402_v42 = vrot.slane %v2401_v41, 1 }
 0xcad   : > { %v2403_v43 = vadd.f32 %v2402_v42, %v2401_v41 }
 0xcaf   : > { %v2404_v44 = vmul.f32 0.0009765625, %v2403_v43 }
 0xcb1   : > { %2406 = vst.msk [vmem:[%s3543_s16] sm:$0x1] %vm2405_vm10, %v2404_v44 }
 0xcb2 PF: > { %s3544_s25 = sld [smem:[#allocation6_spill]] }
 0xcb3   : > { %s3545_s3 = sld [smem:[#allocation4_spill]] }
 0xcb4   : > { %s3546_s28 = sld [smem:[#allocation5_spill]] }
 0xcb5   : > { %s3547_s29 = sld [smem:[#allocation7_spill]] }
 0xcb6   : > { %s3548_s30 = sld [smem:[#allocation8_spill]] }
 0xcb8   : > { %s33_s4 = sadd.s32 1, %s3544_s25  }
 0xcb9   : > { %p30_p9 = scmp.ge.s32.totalorder %s33_s4, 6  }
 0xcbb   :  { %32 = sbr.rel (!%p30_p9) target bundleno = 16 (0x10), region = 195 }

// kernel: vq_motion_model_forward.3
= control target key start
LH: loop header
LB: loop body
LE: loop exit
PB: predicated region body
PF: predicated region fallthrough
CT: control target
= control target key end

     0   :  { %s2458_s21 = smov 0   ;;  %s2460_s22 = smov 0   ;;  %s2838_s0 = inlined_call_operand.vmem [shape: f32[2,16,32], index: 0, kind: input, shape index: {}]   ;;  %s2839_s1 = inlined_call_operand.vmem [shape: f32[2,1,32], index: 1, kind: input, shape index: {}]   ;;  %s2840_s2 = inlined_call_operand.vmem [shape: f32[2,1,32], index: 2, kind: input, shape index: {}]   ;;  %s2841_s3 = inlined_call_operand.vmem [shape: f32[2,12,32,16], index: 3, kind: input, shape index: {}]   ;;  %s2842_s4 = inlined_call_operand.vmem [shape: f32[2,4,16,32], index: 4, kind: input, shape index: {}]   ;;  %s2843_s5 = inlined_call_operand.vmem [shape: f32[2,1,32], index: 5, kind: input, shape index: {}]   ;;  %s2844_s6 = inlined_call_operand.vmem [shape: f32[2,1,32], index: 6, kind: input, shape index: {}]   ;;  %s2845_s7 = inlined_call_operand.vmem [shape: f32[2,1,32], index: 7, kind: input, shape index: {}]   ;;  %s2846_s8 = inlined_call_operand.vmem [shape: f32[2,32,128], index: 8, kind: input, shape index: {}]   ;;  %s2847_s9 = inlined_call_operand.vmem [shape: f32[2,1,128], index: 9, kind: input, shape index: {}]   ;;  %s2848_s10 = inlined_call_operand.vmem [shape: f32[2,128,32], index: 10, kind: input, shape index: {}]   ;;  %s2849_s11 = inlined_call_operand.vmem [shape: f32[2,1,32], index: 11, kind: input, shape index: {}]   ;;  %s2850_s12 = inlined_call_operand.vmem [shape: f32[1,32], index: 12, kind: input, shape index: {}]   ;;  %s2851_s13 = inlined_call_operand.vmem [shape: f32[1,32], index: 13, kind: input, shape index: {}]   ;;  %s2852_s14 = inlined_call_operand.vmem [shape: f32[32,8], index: 14, kind: input, shape index: {}]   ;;  %s2853_s15 = inlined_call_operand.vmem [shape: f32[1,8], index: 15, kind: input, shape index: {}]   ;;  %s2854_s16 = inlined_call_operand.vmem [shape: f32[2,16,8], index: 16, kind: output, shape index: {}]  }
   0x1   :  { %2860 = sst [smem:[#allocation9_spill]] %s2838_s0  ;;  %s2462_s23 = smov 0  }
   0x2   :  { %2861 = sst [smem:[#allocation10_spill]] %s2840_s2  ;;  %s2464_s24 = smov 0  }
   0x3   :  { %2862 = sst [smem:[#allocation11_spill]] %s2841_s3  ;;  %s2466_s25 = smov 0  }
   0x4   :  { %2863 = sst [smem:[#allocation12_spill]] %s2850_s12 }
   0x5   :  { %2864 = sst [smem:[#allocation13_spill]] %s2851_s13 }
   0x6   :  { %2865 = sst [smem:[#allocation14_spill]] %s2852_s14 }
   0x7   :  { %2866 = sst [smem:[#allocation15_spill]] %s2853_s15 }
   0x8 LB: > { %2867 = sst [smem:[#allocation3_spill]] %s2354_s21  ;;  %s35_s26 = sadd.s32 1, %s2362_s23  ;;  %s2370_s25 = sphi %s2466_s25, %s26_s25   ;;  %s2366_s24 = sphi %s2464_s24, %s2893_s24   ;;  %s2362_s23 = sphi %s2462_s23, %s2892_s23   ;;  %s2358_s22 = sphi %s2460_s22, %s2891_s22   ;;  %s2354_s21 = sphi %s2458_s21, %s2890_s21  }
   0x9   : > { %2868 = sst [smem:[#allocation4_spill]] %s2362_s23  ;;  %s38_s27 = sadd.s32 1, %s2366_s24 }
   0xa   : > { %2869 = sst [smem:[#allocation5_spill]] %s2366_s24  ;;  %p36_p0 = scmp.ge.s32.totalorder %s35_s26, 2 }
   0xb   : > { %2870 = sst [smem:[#allocation6_spill]] %s2370_s25  ;;  %p2181_p1 = scmp.ge.s32.totalorder %s2370_s25, 1 }
   0xc   : > { %p570_p2 = scmp.lt.s32.totalorder %s2370_s25, 5  ;;  %s2895_s26 = smov (%p36_p0, %s35_s26), 0 }
   0xd   : > { %2871 = sst [smem:[#allocation7_spill]] %s2895_s26  ;;  %s2897_s27 = smov (!%p36_p0, %s38_s27), %s2366_s24 }
   0xe   : > { %p571_p3 = pnand %p2181_p1, %p570_p2  ;;  %p40_p4 = scmp.ge.s32.totalorder %s2897_s27, 2 }
   0xf   : > { %p661_p5 = scmp.lt.s32.totalorder (!%p571_p3), %s2358_s22, 1  ;;  %p666_p6 = scmp.lt.s32.totalorder (!%p571_p3), %s2354_s21, 1 }
  0x10   : > { %s2899_s27 = smov (%p40_p4, %s2897_s27), 0  ;;  %574 = sbr.rel (%p571_p3) target bundleno = 2204 (0x89c), region = 84 }
  0x11   : > { %2872 = sst [smem:[#allocation8_spill]] %s2899_s27 }
  0x12   : > { %s2873_s17 = sld [smem:[#allocation9_spill]] (!%p571_p3) }
  0x13   : > { %s2875_s3 = sld [smem:[#allocation11_spill]] (!%p571_p3) }
  0x14   : > { %s2876_s13 = sld [smem:[#allocation3_spill]] (!%p571_p3) }
  0x15   : > { %s2901_s22 = smov (!%p661_p5, %s2358_s22), 1 }
  0x16   : > { %s2492_s28 = scalar_select %p666_p6, %s2354_s21, 1 }
  0x17   : > { %s2223_s29 = sshll.u32 %s2901_s22, 4 }
  0x18   : > { %s665_s18 = scalar_lea.vmem %s2873_s17, %s2223_s29  ;;  %s2228_s25 = smul.u32 384, %s2492_s28 }
  0x19   : > { %s2224_s15 = sshll.u32 %s2492_s28, 6  ;;  %s2225_s12 = sshll.u32 %s2492_s28, 5 }
  0x1a   : > { %s2514_s30 = scalar_lea.vmem %s2875_s3, %s2228_s25  ;;  %s2519_s19 = scalar_lea.vmem %s2842_s4, %s2224_s15 }
  0x1b   : > { %s698_s21 = scalar_lea.vmem %s2847_s9, %s2492_s28  ;;  %s2537_s3 = scalar_lea.vmem %s2846_s8, %s2225_s12 }
  0x1c   : > { %s2226_s15 = sshll.u32 %s2492_s28, 7  ;;  %s706_s23 = scalar_lea.vmem %s2849_s11, %s2492_s28 }
  0x1d   : > { %s2543_s27 = scalar_lea.vmem %s2848_s10, %s2226_s15  ;;  %s2552_s14 = scalar_lea.vmem %s2854_s16, %s2223_s29 }
  0x1e   : > { %p2193_p7 = scmp.ne.s32.totalorder %s2876_s13, 0 }
  0x20   : > { %716 = sbr.rel (%p2193_p7) target bundleno = 40 (0x28), region = 88 }
  0x25   : > { %v717_v0 = vld [vmem:[%s665_s18] sm:$0xff]  ;;  %vm719_vm0 = vcmask 261120   ;;  %v718_v1 = vld [vmem:[%s665_s18 + $0x8] sm:$0xff] }
  0x26   : > { %720 = vst.msk [vmem:[#allocation2] sm:$0xff] %vm719_vm0, %v717_v0 }
  0x27   : > { %721 = vst.msk [vmem:[#allocation2 + $0x8] sm:$0xff] %vm719_vm0, %v718_v1 }
  0x28 PF: > { %vm807_vm1 = vcmask 261120   ;;  %v2372_v6 = vmov 32.0   ;;  %v728_v23 = vld [vmem:[%s2514_s30 + $0x10] sm:$0xff]  ;;  %v729_v24 = vld [vmem:[%s2514_s30 + $0x18] sm:$0xff]  ;;  %v726_v46 = vld [vmem:[%s2514_s30] sm:$0xff]  ;;  %s2877_s18 = scalar_lea.vmem %s2839_s1, %s2492_s28  ;;  %s2878_s25 = sld [smem:[#allocation10_spill]] }
  0x29   : > { %2277 = vrcp.f32 %v2372_v6  ;;  %v732_v25 = vld [vmem:[%s2514_s30 + $0x30] sm:$0xff]  ;;  %v873_v26 = vpack.c.bf16 %v728_v23, %v728_v23  ;;  %v874_v27 = vpack.c.bf16 %v729_v24, %v729_v24  ;;  %v733_v28 = vld [vmem:[%s2514_s30 + $0x38] sm:$0xff]  ;;  %v727_v47 = vld [vmem:[%s2514_s30 + $0x8] sm:$0xff]  ;;  %v871_v52 = vpack.c.bf16 %v726_v46, %v726_v46  ;;  %s2880_s15 = scalar_lea.vmem %s2843_s5, %s2492_s28  ;;  %s2881_s17 = scalar_lea.vmem %s2844_s6, %s2492_s28 }
  0x2a   : > { %v877_v29 = vpack.c.bf16 %v732_v25, %v732_v25  ;;  %v740_v30 = vld [vmem:[%s2514_s30 + $0x70] sm:$0xff]  ;;  %v741_v31 = vld [vmem:[%s2514_s30 + $0x78] sm:$0xff]  ;;  %v878_v32 = vpack.c.bf16 %v733_v28, %v733_v28  ;;  %v730_v48 = vld [vmem:[%s2514_s30 + $0x20] sm:$0xff]  ;;  %v872_v58 = vpack.c.bf16 %v727_v47, %v727_v47  ;;  %vm1265_vm9 = vcmask 130048   ;;  %s2882_s13 = scalar_lea.vmem %s2845_s7, %s2492_s28 }
  0x2b   : > { %v885_v33 = vpack.c.bf16 %v740_v30, %v740_v30  ;;  %v886_v34 = vpack.c.bf16 %v741_v31, %v741_v31  ;;  %v748_v35 = vld [vmem:[%s2514_s30 + $0xb0] sm:$0xff]  ;;  %v749_v36 = vld [vmem:[%s2514_s30 + $0xb8] sm:$0xff]  ;;  %v930_v38 = vunpack.c.l.b16 %v873_v26  ;;  %v931_v39 = vunpack.c.l.b16 %v874_v27  ;;  %v731_v53 = vld [vmem:[%s2514_s30 + $0x28] sm:$0xff] }
  0x2c   : > { %v959_v40 = vunpack.c.l.b16 %v877_v29  ;;  %v893_v41 = vpack.c.bf16 %v748_v35, %v748_v35  ;;  %v960_v43 = vunpack.c.l.b16 %v878_v32  ;;  %v894_v50 = vpack.c.bf16 %v749_v36, %v749_v36  ;;  %v738_v54 = vld [vmem:[%s2514_s30 + $0x60] sm:$0xff]  ;;  %v739_v59 = vld [vmem:[%s2514_s30 + $0x68] sm:$0xff]  ;;  %v736_v26 = vld [vmem:[%s2514_s30 + $0x50] sm:$0xff] }
  0x2d   : > { %v722_v2 = vld [vmem:[#allocation2] sm:$0xff]  ;;  %v1011_v44 = vunpack.c.l.b16 %v885_v33  ;;  %v1012_v45 = vunpack.c.l.b16 %v886_v34  ;;  %v933_v49 = vpack.c.b16 %v931_v39, %v930_v38  ;;  %v928_v61 = vunpack.c.l.b16 %v871_v52  ;;  %v747_v1 = vld [vmem:[%s2514_s30 + $0xa8] sm:$0xff]  ;;  %v737_v27 = vld [vmem:[%s2514_s30 + $0x58] sm:$0xff] }
  0x2e   : > { %v808_v3 = vsel %vm807_vm1, %v722_v2, 0.0  ;;  %v723_v4 = vld [vmem:[#allocation2 + $0x8] sm:$0xff]  ;;  %v1063_v51 = vunpack.c.l.b16 %v893_v41  ;;  %v962_v56 = vpack.c.b16 %v960_v43, %v959_v40  ;;  %v1064_v60 = vunpack.c.l.b16 %v894_v50  ;;  %v746_v0 = vld [vmem:[%s2514_s30 + $0xa0] sm:$0xff]  ;;  %v744_v28 = vld [vmem:[%s2514_s30 + $0x90] sm:$0xff]  ;;  %s2879_s22 = scalar_lea.vmem %s2878_s25, %s2492_s28 }
  0x2f   : > { %809 = vadd.xlane.f32.xlu0 %v808_v3  ;;  %v811_v5 = vsel %vm807_vm1, %v723_v4, 0.0  ;;  %v2278_v7 = vpop.eup %2277  ;;  %v1014_v57 = vpack.c.b16 %v1012_v45, %v1011_v44  ;;  %945 = vmatpush.bf16.msra.mxu0 %v933_v49  ;;  %v875_v62 = vpack.c.bf16 %v730_v48, %v730_v48  ;;  %v876_v63 = vpack.c.bf16 %v731_v53, %v731_v53  ;;  %v745_v31 = vld [vmem:[%s2514_s30 + $0x98] sm:$0xff]  ;;  %v756_v32 = vld [vmem:[%s2514_s30 + $0xf0] sm:$0xff]  ;;  %v734_v44 = vld [vmem:[%s2514_s30 + $0x40] sm:$0xff] }
  0x30   : > { %v815_v8 = vmul.f32 32.0, %v2278_v7  ;;  %vm819_vm2 = vweird.f32 %v2278_v7  ;;  %971 = vmatpush.bf16.msra.mxu2 %v962_v56  ;;  %v883_v3 = vpack.c.bf16 %v738_v54, %v738_v54  ;;  %v881_v29 = vpack.c.bf16 %v736_v26, %v736_v26  ;;  %v757_v36 = vld [vmem:[%s2514_s30 + $0xf8] sm:$0xff]  ;;  %v764_v38 = vld [vmem:[%s2514_s30 + $0x130] sm:$0xff]  ;;  %v735_v45 = vld [vmem:[%s2514_s30 + $0x48] sm:$0xff] }
  0x31   : > { %1023 = vmatpush.bf16.msra.mxu3 %v1014_v57  ;;  %v958_v6 = vunpack.c.l.b16 %v876_v63  ;;  %v882_v30 = vpack.c.bf16 %v737_v27, %v737_v27  ;;  %v889_v34 = vpack.c.bf16 %v744_v28, %v744_v28  ;;  %v890_v35 = vpack.c.bf16 %v745_v31, %v745_v31  ;;  %v765_v39 = vld [vmem:[%s2514_s30 + $0x138] sm:$0xff]  ;;  %v742_v50 = vld [vmem:[%s2514_s30 + $0x80] sm:$0xff] }
  0x32   : > { %v816_v9 = vsub.f32 1.0, %v815_v8  ;;  %v985_v40 = vunpack.c.l.b16 %v881_v29  ;;  %v909_v43 = vpack.c.bf16 %v764_v38, %v764_v38  ;;  %v910_v54 = vpack.c.bf16 %v765_v39, %v765_v39  ;;  %v760_v38 = vld [vmem:[%s2514_s30 + $0x110] sm:$0xff]  ;;  %v761_v39 = vld [vmem:[%s2514_s30 + $0x118] sm:$0xff] }
  0x33   : > { %v986_v41 = vunpack.c.l.b16 %v882_v30  ;;  %v1037_v47 = vunpack.c.l.b16 %v889_v34  ;;  %v1038_v48 = vunpack.c.l.b16 %v890_v35 }
  0x34   : > { %v817_v10 = vmul.f32 %v2278_v7, %v816_v9  ;;  %v1009_v9 = vunpack.c.l.b16 %v883_v3  ;;  %v1167_v56 = vunpack.c.l.b16 %v909_v43  ;;  %v1168_v63 = vunpack.c.l.b16 %v910_v54  ;;  %v755_v3 = vld [vmem:[%s2514_s30 + $0xe8] sm:$0xff] }
  0x35   : > { %v988_v52 = vpack.c.b16 %v986_v41, %v985_v40  ;;  %v759_v54 = vld [vmem:[%s2514_s30 + $0x108] sm:$0xff] }
  0x36   : > { %v818_v11 = vadd.f32 %v2278_v7, %v817_v10  ;;  %v891_v10 = vpack.c.bf16 %v746_v0, %v746_v0  ;;  %v887_v0 = vpack.c.bf16 %v742_v50, %v742_v50 }
  0x37   : > { %812 = vadd.xlane.f32.xlu0 %v811_v5  ;;  %v957_v5 = vunpack.c.l.b16 %v875_v62 }
  0x38   : > { %v2557_v12 = vsel %vm819_vm2, %v2278_v7, %v818_v11  ;;  %v884_v7 = vpack.c.bf16 %v739_v59, %v739_v59  ;;  %v892_v11 = vpack.c.bf16 %v747_v1, %v747_v1  ;;  %v879_v59 = vpack.c.bf16 %v734_v44, %v734_v44  ;;  %v773_v44 = vld [vmem:[%s2514_s30 + $0x178] sm:$0xff] }
  0xa2   : > { %v810_v13 = vpop.xlane.xlu0 %809 }
  0xa3   : > { %v821_v14 = vmul.f32 %v2557_v12, %v810_v13 }
  0xa5   : > { %v2560_v15 = vsub.f32 %v722_v2, %v821_v14  ;;  %v929_v2 = vunpack.c.l.b16 %v872_v58  ;;  %v961_v14 = vpack.c.b16 %v958_v6, %v957_v5  ;;  %v1040_v58 = vpack.c.b16 %v1038_v48, %v1037_v47 }
  0xa6   : > { %v983_v6 = vunpack.c.l.b16 %v879_v59  ;;  %v906_v47 = vpack.c.bf16 %v761_v39, %v761_v39  ;;  %v770_v59 = vld [vmem:[%s2514_s30 + $0x160] sm:$0xff] }
  0xa7   : > { %v825_v16 = vmul.f32 %v2560_v15, %v2560_v15  ;;  %v932_v8 = vpack.c.b16 %v929_v2, %v928_v61  ;;  %972 = vmatpush.bf16.msra.mxu2 %v961_v14  ;;  %v754_v2 = vld [vmem:[%s2514_s30 + $0xe0] sm:$0xff] }
  0xa9   : > { %v827_v17 = vsel %vm807_vm1, %v825_v16, 0.0  ;;  %v1010_v16 = vunpack.c.l.b16 %v884_v7  ;;  %946 = vmatpush.bf16.msra.mxu0 %v932_v8  ;;  %v762_v7 = vld [vmem:[%s2514_s30 + $0x120] sm:$0xff]  ;;  %v1170_v8 = vpack.c.b16 %v1168_v63, %v1167_v56 }
  0xaa   : > { %828 = vadd.xlane.f32.xlu1 %v827_v17  ;;  %v813_v18 = vpop.xlane.xlu0 %812 }
  0xab   : > { %v822_v19 = vmul.f32 %v2557_v12, %v813_v18  ;;  %v1061_v18 = vunpack.c.l.b16 %v891_v10  ;;  %997 = vmatpush.bf16.msrb.mxu2 %v988_v52  ;;  %v1035_v10 = vunpack.c.l.b16 %v887_v0  ;;  %v751_v52 = vld [vmem:[%s2514_s30 + $0xc8] sm:$0xff] }
  0xad   : > { %v2566_v20 = vsub.f32 %v723_v4, %v822_v19  ;;  %v1066_v4 = vpack.c.b16 %v1064_v60, %v1063_v51  ;;  %v1062_v19 = vunpack.c.l.b16 %v892_v11  ;;  %v743_v51 = vld [vmem:[%s2514_s30 + $0x88] sm:$0xff]  ;;  %v880_v60 = vpack.c.bf16 %v735_v45, %v735_v45  ;;  %1049 = vmatpush.bf16.msrb.mxu0 %v1040_v58 }
  0xae   : > { %v888_v1 = vpack.c.bf16 %v743_v51, %v743_v51  ;;  %v918_v51 = vpack.c.bf16 %v773_v44, %v773_v44 }
  0xaf   : > { %v826_v21 = vmul.f32 %v2566_v20, %v2566_v20  ;;  %1075 = vmatpush.bf16.msra.mxu1 %v1066_v4  ;;  %v1065_v24 = vpack.c.b16 %v1062_v19, %v1061_v18  ;;  %v2270_v18 = vld [vmem:[%s2877_s18] ss:$0 sm:$0xff]  ;;  %s2883_s18 = sld [smem:[#allocation3_spill]] }
  0xb0   : > { %v1036_v11 = vunpack.c.l.b16 %v888_v1  ;;  %v896_v1 = vpack.c.bf16 %v751_v52, %v751_v52 }
  0xb1   : > { %v830_v22 = vsel %vm807_vm1, %v826_v21, 0.0  ;;  %v1013_v21 = vpack.c.b16 %v1010_v16, %v1009_v9  ;;  %v984_v9 = vunpack.c.l.b16 %v880_v60 }
  0xb2   : > { %831 = vadd.xlane.f32.xlu1 %v830_v22 }
  0xb3   : > { %1024 = vmatpush.bf16.msra.mxu3 %v1013_v21  ;;  %1076 = vmatpush.bf16.msra.mxu1 %v1065_v24  ;;  %v987_v21 = vpack.c.b16 %v984_v9, %v983_v6  ;;  %v1039_v24 = vpack.c.b16 %v1036_v11, %v1035_v10  ;;  %v915_v6 = vpack.c.bf16 %v770_v59, %v770_v59 }
  0xb5   : > { %998 = vmatpush.bf16.msrb.mxu2 %v987_v21  ;;  %1050 = vmatpush.bf16.msrb.mxu0 %v1039_v24  ;;  %p2219_p8 = scmp.ne.s32.totalorder %s2883_s18, 1 }
  0xb6   : > { %s2884_s24 = sld [smem:[#allocation14_spill]] (!%p2219_p8) }
  0xb7   : > { %1179 = vmatpush.bf16.msrb.mxu1 %v1170_v8  ;;  %s2886_s20 = sld [smem:[#allocation12_spill]] (!%p2219_p8) }
  0xb8   : > { %s2887_s2 = sld [smem:[#allocation13_spill]] (!%p2219_p8) }
  0xbc   : > { %s2885_s12 = smov (!%p2219_p8), %s2884_s24 }
 0x11d   : > { %v829_v37 = vpop.xlane.xlu1 %828 }
 0x11e   : > { %v833_v42 = vmul.f32 %v829_v37, %v2557_v12  ;;  %v901_v37 = vpack.c.bf16 %v756_v32, %v756_v32  ;;  %v2271_v32 = vld [vmem:[%s2879_s22] ss:$0 sm:$0xff] }
 0x120   : > { %v2585_v55 = vadd.f32 1e-05, %v833_v42  ;;  %v902_v42 = vpack.c.bf16 %v757_v36, %v757_v36  ;;  %v1115_v49 = vunpack.c.l.b16 %v901_v37  ;;  %v752_v36 = vld [vmem:[%s2514_s30 + $0xd0] sm:$0xff]  ;;  %v753_v37 = vld [vmem:[%s2514_s30 + $0xd8] sm:$0xff] }
 0x121   : > { %v897_v43 = vpack.c.bf16 %v752_v36, %v752_v36  ;;  %v898_v45 = vpack.c.bf16 %v753_v37, %v753_v37 }
 0x122   : > { %2279 = vrsqrt.f32 %v2585_v55  ;;  %v1116_v53 = vunpack.c.l.b16 %v902_v42  ;;  %vm843_vm4 = vweird.f32 %v2585_v55 }
 0x123   : > { %v1089_v58 = vunpack.c.l.b16 %v897_v43  ;;  %v1090_v60 = vunpack.c.l.b16 %v898_v45 }
 0x124   : > { %v1118_v62 = vpack.c.b16 %v1116_v53, %v1115_v49  ;;  %v750_v49 = vld [vmem:[%s2514_s30 + $0xc0] sm:$0xff] }
 0x125   : > { %v832_v13 = vpop.xlane.xlu1 %831  ;;  %v758_v53 = vld [vmem:[%s2514_s30 + $0x100] sm:$0xff]  ;;  %v895_v63 = vpack.c.bf16 %v750_v49, %v750_v49  ;;  %v1092_v10 = vpack.c.b16 %v1090_v60, %v1089_v58 }
 0x126   : > { %v834_v17 = vmul.f32 %v832_v13, %v2557_v12  ;;  %1127 = vmatpush.bf16.msrb.mxu3 %v1118_v62  ;;  %v763_v13 = vld [vmem:[%s2514_s30 + $0x128] sm:$0xff]  ;;  %v1142_v62 = vunpack.c.l.b16 %v906_v47 }
 0x128   : > { %v2592_v22 = vpop.eup %2279  ;;  %v2594_v23 = vadd.f32 1e-05, %v834_v17  ;;  %v899_v17 = vpack.c.bf16 %v754_v2, %v754_v2  ;;  %v903_v2 = vpack.c.bf16 %v758_v53, %v758_v53 }
 0x129   : > { %v838_v25 = vmul.f32 %v2592_v22, %v2585_v55  ;;  %vm844_vm3 = vweird.f32 %v2592_v22  ;;  %v900_v55 = vpack.c.bf16 %v755_v3, %v755_v3  ;;  %v904_v3 = vpack.c.bf16 %v759_v54, %v759_v54 }
 0x12a   : > { %2281 = vrsqrt.f32 %v2594_v23  ;;  %vm845_vm5 = vmor %vm843_vm4, %vm844_vm3  ;;  %v1113_v27 = vunpack.c.l.b16 %v899_v17  ;;  %vm853_vm7 = vweird.f32 %v2594_v23  ;;  %v1139_v17 = vunpack.c.l.b16 %v903_v2 }
 0x12b   : > { %v839_v33 = vmul.f32 %v2592_v22, %v838_v25  ;;  %v907_v25 = vpack.c.bf16 %v762_v7, %v762_v7  ;;  %v1114_v28 = vunpack.c.l.b16 %v900_v55  ;;  %v1140_v55 = vunpack.c.l.b16 %v904_v3 }
 0x12d   : > { %v840_v46 = vmul.f32 0.5, %v839_v33  ;;  %v1165_v29 = vunpack.c.l.b16 %v907_v25  ;;  %v1117_v31 = vpack.c.b16 %v1114_v28, %v1113_v27  ;;  %v1143_v25 = vpack.c.b16 %v1140_v55, %v1139_v17  ;;  %v768_v27 = vld [vmem:[%s2514_s30 + $0x150] sm:$0xff]  ;;  %v769_v28 = vld [vmem:[%s2514_s30 + $0x158] sm:$0xff] }
 0x12f   : > { %v841_v57 = vsub.f32 1.5, %v840_v46  ;;  %1128 = vmatpush.bf16.msrb.mxu3 %v1117_v31  ;;  %v905_v46 = vpack.c.bf16 %v760_v38, %v760_v38  ;;  %v767_v31 = vld [vmem:[%s2514_s30 + $0x148] sm:$0xff] }
 0x130   : > { %v2282_v61 = vpop.eup %2281 }
 0x131   : > { %v842_v4 = vmul.f32 %v2592_v22, %v841_v57  ;;  %v848_v5 = vmul.f32 %v2282_v61, %v2594_v23  ;;  %vm854_vm6 = vweird.f32 %v2282_v61  ;;  %v772_v23 = vld [vmem:[%s2514_s30 + $0x170] sm:$0xff] }
 0x132   : > { %vm855_vm8 = vmor %vm853_vm7, %vm854_vm6  ;;  %v917_v50 = vpack.c.bf16 %v772_v23, %v772_v23 }
 0x133   : > { %v846_v14 = vsel %vm845_vm5, %v2592_v22, %v842_v4  ;;  %v849_v16 = vmul.f32 %v2282_v61, %v848_v5  ;;  %v908_v22 = vpack.c.bf16 %v763_v13, %v763_v13  ;;  %v1220_v5 = vunpack.c.l.b16 %v918_v51 }
 0x134   : > { %v857_v19 = vmul.f32 %v846_v14, %v2560_v15  ;;  %v1219_v4 = vunpack.c.l.b16 %v917_v50  ;;  %v1087_v13 = vunpack.c.l.b16 %v895_v63 }
 0x135   : > { %v850_v26 = vmul.f32 0.5, %v849_v16  ;;  %v1166_v15 = vunpack.c.l.b16 %v908_v22  ;;  %v1088_v16 = vunpack.c.l.b16 %v896_v1  ;;  %v913_v22 = vpack.c.bf16 %v768_v27, %v768_v27 }
 0x136   : > { %v862_v33 = vmul.f32 %v2270_v18, %v857_v19  ;;  %v1217_v19 = vunpack.c.l.b16 %v915_v6 }
 0x137   : > { %v851_v30 = vsub.f32 1.5, %v850_v26  ;;  %v1169_v35 = vpack.c.b16 %v1166_v15, %v1165_v29  ;;  %v1091_v24 = vpack.c.b16 %v1088_v16, %v1087_v13  ;;  %v914_v29 = vpack.c.bf16 %v769_v28, %v769_v28 }
 0x138   : > { %v867_v41 = vadd.f32 %v2271_v32, %v862_v33  ;;  %v1193_v15 = vunpack.c.l.b16 %v913_v22 }
 0x139   : > { %v852_v34 = vmul.f32 %v2282_v61, %v851_v30  ;;  %1180 = vmatpush.bf16.msrb.mxu1 %v1169_v35  ;;  %v766_v30 = vld [vmem:[%s2514_s30 + $0x140] sm:$0xff] }
 0x13a   : > { %v869_v56 = vpack.c.bf16 %v867_v41, %v867_v41  ;;  %v911_v33 = vpack.c.bf16 %v766_v30, %v766_v30 }
 0x13b   : > { %v856_v40 = vsel %vm855_vm8, %v2282_v61, %v852_v34  ;;  %v1141_v61 = vunpack.c.l.b16 %v905_v46  ;;  %v912_v34 = vpack.c.bf16 %v767_v31, %v767_v31 }
 0x13c   : > { %v858_v42 = vmul.f32 %v856_v40, %v2566_v20  ;;  %v771_v20 = vld [vmem:[%s2514_s30 + $0x168] sm:$0xff]  ;;  %v921_v8 = vunpack.c.l.b16 %v869_v56  ;;  %v1191_v36 = vunpack.c.l.b16 %v911_v33 }
 0x13d   : > { %v916_v7 = vpack.c.bf16 %v771_v20, %v771_v20  ;;  %v1144_v11 = vpack.c.b16 %v1142_v62, %v1141_v61  ;;  %v1192_v37 = vunpack.c.l.b16 %v912_v34 }
 0x13e   : > { %v863_v48 = vmul.f32 %v2270_v18, %v858_v42  ;;  %v1222_v18 = vpack.c.b16 %v1220_v5, %v1219_v4 }
 0x13f   : > { %v1218_v21 = vunpack.c.l.b16 %v916_v7  ;;  %v1195_v38 = vpack.c.b16 %v1192_v37, %v1191_v36 }
 0x140   : > { %v868_v57 = vadd.f32 %v2271_v32, %v863_v48  ;;  %v1194_v32 = vunpack.c.l.b16 %v914_v29 }
 0x141   : > { %v1221_v26 = vpack.c.b16 %v1218_v21, %v1217_v19 }
 0x142   : > { %v870_v0 = vpack.c.bf16 %v868_v57, %v868_v57  ;;  %v1196_v35 = vpack.c.b16 %v1194_v32, %v1193_v15 }
 0x144   : > { %v922_v9 = vunpack.c.l.b16 %v870_v0 }
 0x146   : > { %v923_v14 = vpack.c.b16 %v922_v9, %v921_v8 }
 0x148   : > { %2194 = vmatmul.msk.bf16.vlgmr.msra.gmra.mxu0 %vm807_vm1, %v923_v14  ;;  %2195 = vmatmul.msk.bf16.vlgmr.msra.gmra.mxu2 %vm807_vm1, %v923_v14 }
 0x149   : > { %2197 = vmatmul.msk.bf16.vlgmr.msra.gmra.mxu3 %vm807_vm1, %v923_v14  ;;  %2199 = vmatmul.msk.bf16.vlgmr.msra.gmra.mxu1 %vm807_vm1, %v923_v14 }
 0x14a   : > { %1101 = vmatpush.bf16.msra.mxu2 %v1092_v10  ;;  %1153 = vmatpush.bf16.msra.mxu0 %v1144_v11 }
 0x14b   : > { %1231 = vmatpush.bf16.msra.mxu3 %v1222_v18 }
 0x14e   : > { %1102 = vmatpush.bf16.msra.mxu2 %v1091_v24  ;;  %1154 = vmatpush.bf16.msra.mxu0 %v1143_v25 }
 0x14f   : > { %1232 = vmatpush.bf16.msra.mxu3 %v1221_v26 }
 0x158   : > { %2196 = vmatmul.msk.bf16.vlgmr.msrb.gmra.mxu2 %vm807_vm1, %v923_v14  ;;  %2198 = vmatmul.msk.bf16.vlgmr.msrb.gmra.mxu0 %vm807_vm1, %v923_v14 }
 0x159   : > { %2201 = vmatmul.msk.bf16.vlgmr.msrb.gmra.mxu3 %vm807_vm1, %v923_v14  ;;  %2203 = vmatmul.msk.bf16.vlgmr.msrb.gmra.mxu1 %vm807_vm1, %v923_v14 }
 0x15a   : > { %1205 = vmatpush.bf16.msrb.mxu2 %v1196_v35 }
 0x15e   : > { %1206 = vmatpush.bf16.msrb.mxu2 %v1195_v38 }
 0x168   : > { %2200 = vmatmul.msk.bf16.vlgmr.msra.gmra.mxu2 %vm807_vm1, %v923_v14  ;;  %2202 = vmatmul.msk.bf16.vlgmr.msra.gmra.mxu0 %vm807_vm1, %v923_v14 }
 0x169   : > { %2205 = vmatmul.msk.bf16.vlgmr.msra.gmra.mxu3 %vm807_vm1, %v923_v14 }
 0x178   : > { %2204 = vmatmul.msk.bf16.vlgmr.msrb.gmra.mxu2 %vm807_vm1, %v923_v14 }
 0x1c5   : > { %v948_v39 = vpop.f32.mrf.mxu0 }
 0x1c6   : > { %v1078_v40 = vpop.f32.mrf.mxu1  ;;  %v1239_v13 = vpack.c.bf16 %v948_v39, %v948_v39 }
 0x1c7   : > { %v1249_v43 = vpack.c.bf16 %v1078_v40, %v1078_v40 }
 0x1c8   : > { %v1257_v24 = vunpack.c.l.b16 %v1239_v13 }
 0x1c9   : > { %v1293_v46 = vunpack.c.l.b16 %v1249_v43 }
 0x1cb   : > { %v974_v41 = vpop.f32.mrf.mxu2 }
 0x1cc   : > { %v1026_v42 = vpop.f32.mrf.mxu3  ;;  %v1241_v52 = vpack.c.bf16 %v974_v41, %v974_v41 }
 0x1cd   : > { %v950_v23 = vpop.f32.mrf.mxu0  ;;  %v1245_v28 = vpack.c.bf16 %v1026_v42, %v1026_v42 }
 0x1ce   : > { %v1080_v44 = vpop.f32.mrf.mxu1  ;;  %v1288_v58 = vunpack.c.l.b16 %v1241_v52  ;;  %v1240_v7 = vpack.c.bf16 %v950_v23, %v950_v23 }
 0x1cf   : > { %v1250_v45 = vpack.c.bf16 %v1080_v44, %v1080_v44  ;;  %v1348_v34 = vunpack.c.l.b16 %v1245_v28 }
 0x1d0   : > { %v1258_v18 = vunpack.c.l.b16 %v1240_v7 }
 0x1d1   : > { %v1294_v47 = vunpack.c.l.b16 %v1250_v45 }
 0x1d2   : > { %v1259_v27 = vpack.c.b16 %v1258_v18, %v1257_v24 }
 0x1d3   : > { %v1295_v48 = vpack.c.b16 %v1294_v47, %v1293_v46  ;;  %v976_v49 = vpop.f32.mrf.mxu2 }
 0x1d4   : > { %v1242_v50 = vpack.c.bf16 %v976_v49, %v976_v49  ;;  %v1028_v51 = vpop.f32.mrf.mxu3 }
 0x1d5   : > { %v1052_v53 = vpop.f32.mrf.mxu0  ;;  %v1300_v54 = vsel %vm1265_vm9, %v1295_v48, 0  ;;  %v1246_v25 = vpack.c.bf16 %v1028_v51, %v1028_v51 }
 0x1d6   : > { %v1182_v56 = vpop.f32.mrf.mxu1  ;;  %1309 = vmatpush.bf16.xpose.msra.mxu1 %v1300_v54  ;;  %v1289_v57 = vunpack.c.l.b16 %v1242_v50  ;;  %v1247_v60 = vpack.c.bf16 %v1052_v53, %v1052_v53 }
 0x1d7   : > { %v1515_v62 = vpack.c.bf16 %v1182_v56, %v1182_v56  ;;  %v1349_v15 = vunpack.c.l.b16 %v1246_v25 }
 0x1d8   : > { %v1290_v59 = vpack.c.b16 %v1289_v57, %v1288_v58  ;;  %v1262_v3 = vunpack.c.l.b16 %v1247_v60 }
 0x1d9   : > { %v1556_v5 = vunpack.c.l.b16 %v1515_v62  ;;  %v1350_v37 = vpack.c.b16 %v1349_v15, %v1348_v34 }
 0x1db   : > { %v2665_v20 = vpop.f32.mrf.mxu2 }
 0x1dc   : > { %v1130_v61 = vpop.f32.mrf.mxu3  ;;  %v1243_v51 = vpack.c.bf16 %v2665_v20, %v2665_v20 }
 0x1dd   : > { %2207 = vmatmul.msk.bf16.vlgmr.msra.gmra.mxu1 %vm1265_vm9, %v1290_v59  ;;  %v1054_v63 = vpop.f32.mrf.mxu0  ;;  %v1253_v9 = vpack.c.bf16 %v1130_v61, %v1130_v61 }
 0x1de   : > { %v1248_v0 = vpack.c.bf16 %v1054_v63, %v1054_v63  ;;  %v1184_v1 = vpop.f32.mrf.mxu1  ;;  %v1318_v56 = vunpack.c.l.b16 %v1243_v51 }
 0x1df   : > { %v1516_v2 = vpack.c.bf16 %v1184_v1, %v1184_v1  ;;  %v1353_v19 = vunpack.c.l.b16 %v1253_v9 }
 0x1e0   : > { %v1263_v4 = vunpack.c.l.b16 %v1248_v0  ;;  %v1384_v0 = vlaneseq }
 0x1e1   : > { %v1557_v6 = vunpack.c.l.b16 %v1516_v2 }
 0x1e2   : > { %v1264_v8 = vpack.c.b16 %v1263_v4, %v1262_v3  ;;  %v1385_v1 = vshrl.u32 %v1384_v0, 7  ;;  %v1388_v20 = vand.u32 127, %v1384_v0 }
 0x1e3   : > { %v1558_v10 = vpack.c.b16 %v1557_v6, %v1556_v5  ;;  %v1002_v11 = vpop.f32.mrf.mxu2 }
 0x1e4   : > { %v1132_v14 = vpop.f32.mrf.mxu3  ;;  %v1270_v16 = vsel %vm1265_vm9, %v1264_v8, 0  ;;  %v1244_v48 = vpack.c.bf16 %v1002_v11, %v1002_v11  ;;  %v1389_v2 = vsub.s32 %v1388_v20, %v1385_v1  ;;  %v1386_v3 = vadd.s32 8, %v1385_v1 }
 0x1e5   : > { %v1254_v17 = vpack.c.bf16 %v1132_v14, %v1132_v14  ;;  %1570 = vmatpush.bf16.msrb.mxu1 %v1558_v10  ;;  %v1156_v55 = vpop.f32.mrf.mxu0  ;;  %1279 = vmatpush.bf16.xpose.msrb.mxu0 %v1270_v16 }
 0x1e6   : > { %v1513_v30 = vpack.c.bf16 %v1156_v55, %v1156_v55  ;;  %v1319_v54 = vunpack.c.l.b16 %v1244_v48  ;;  %v1392_v4 = vsub.s32 0, %v1389_v2  ;;  %vm1391_vm10 = vcmp.lt.s32.totalorder %v1389_v2, 0 }
 0x1e7   : > { %v1354_v21 = vunpack.c.l.b16 %v1254_v17  ;;  %v1390_v5 = vsub.s32 %v1388_v20, %v1386_v3 }
 0x1e8   : > { %v1528_v35 = vunpack.c.l.b16 %v1513_v30  ;;  %v1320_v57 = vpack.c.b16 %v1319_v54, %v1318_v56  ;;  %v1393_v6 = vsel %vm1391_vm10, %v1392_v4, %v1389_v2 }
 0x1e9   : > { %v1355_v26 = vpack.c.b16 %v1354_v21, %v1353_v19  ;;  %v1395_v8 = vsub.s32 0, %v1390_v5  ;;  %v1397_v9 = vcvt.s32.f32 %v1393_v6  ;;  %vm1394_vm11 = vcmp.lt.s32.totalorder %v1390_v5, 0 }
 0x1eb   : > { %v1104_v22 = vpop.f32.mrf.mxu2  ;;  %v1360_v29 = vsel %vm1265_vm9, %v1355_v26, 0  ;;  %v1396_v10 = vsel %vm1394_vm11, %v1395_v8, %v1390_v5  ;;  %v1399_v11 = vsub.f32 0.0, %v1397_v9 }
 0x1ec   : > { %v1234_v31 = vpop.f32.mrf.mxu3  ;;  %1369 = vmatpush.bf16.xpose.msrb.mxu3 %v1360_v29  ;;  %2206 = vmatmul.msk.bf16.vlgmr.msrb.gmra.mxu0 %vm1265_vm9, %v1259_v27  ;;  %v1251_v38 = vpack.c.bf16 %v1104_v22, %v1104_v22  ;;  %v1398_v14 = vcvt.s32.f32 %v1396_v10 }
 0x1ed   : > { %v1158_v32 = vpop.f32.mrf.mxu0  ;;  %v1519_v40 = vpack.c.bf16 %v1234_v31, %v1234_v31  ;;  %v1407_v13 = vmul.f32 0.00390625, %v1399_v11  ;;  %v1405_v34 = vmul.f32 0.015625, %v1399_v11 }
 0x1ee   : > { %v1514_v33 = vpack.c.bf16 %v1158_v32, %v1158_v32  ;;  %v1323_v44 = vunpack.c.l.b16 %v1251_v38  ;;  %v1400_v19 = vsub.f32 0.0, %v1398_v14 }
 0x1ef   : > { %v1612_v46 = vunpack.c.l.b16 %v1519_v40 }
 0x1f0   : > { %v1529_v36 = vunpack.c.l.b16 %v1514_v33  ;;  %v1402_v25 = vmul.f32 0.25, %v1400_v19  ;;  %v1408_v26 = vmul.f32 0.00390625, %v1400_v19  ;;  %v1403_v33 = vmul.f32 0.0625, %v1399_v11 }
 0x1f1   : > { %v1404_v51 = vmul.f32 0.0625, %v1400_v19 }
 0x1f2   : > { %v1530_v39 = vpack.c.b16 %v1529_v36, %v1528_v35 }
 0x1f3   : > { %2209 = vmatmul.msk.bf16.vlgmr.msrb.gmra.mxu3 %vm1265_vm9, %v1350_v37  ;;  %v1106_v41 = vpop.f32.mrf.mxu2 }
 0x1f4   : > { %v1252_v42 = vpack.c.bf16 %v1106_v41, %v1106_v41  ;;  %v1236_v43 = vpop.f32.mrf.mxu3  ;;  %1542 = vmatpush.bf16.msra.mxu0 %v1530_v39  ;;  %v1406_v41 = vmul.f32 0.015625, %v1400_v19 }
 0x1f5   : > { %v1520_v23 = vpack.c.bf16 %v1236_v43, %v1236_v43 }
 0x1f6   : > { %v1324_v45 = vunpack.c.l.b16 %v1252_v42 }
 0x1f7   : > { %v1613_v47 = vunpack.c.l.b16 %v1520_v23 }
 0x1f8   : > { %v1325_v49 = vpack.c.b16 %v1324_v45, %v1323_v44 }
 0x1f9   : > { %v1614_v50 = vpack.c.b16 %v1613_v47, %v1612_v46  ;;  %v1401_v46 = vmul.f32 0.25, %v1399_v11 }
 0x1fa   : > { %v1330_v52 = vsel %vm1265_vm9, %v1325_v49, 0 }
 0x1fb   : > { %1626 = vmatpush.bf16.msra.mxu3 %v1614_v50  ;;  %v1208_v53 = vpop.f32.mrf.mxu2  ;;  %1339 = vmatpush.bf16.xpose.msra.mxu2 %v1330_v52 }
 0x1fc   : > { %v1517_v58 = vpack.c.bf16 %v1208_v53, %v1208_v53 }
 0x1fe   : > { %v1584_v61 = vunpack.c.l.b16 %v1517_v58 }
 0x202   : > { %2208 = vmatmul.msk.bf16.vlgmr.msra.gmra.mxu2 %vm1265_vm9, %v1320_v57 }
 0x203   : > { %v1210_v59 = vpop.f32.mrf.mxu2 }
 0x204   : > { %v1518_v60 = vpack.c.bf16 %v1210_v59, %v1210_v59 }
 0x206   : > { %v1585_v62 = vunpack.c.l.b16 %v1518_v60 }
 0x208   : > { %v1586_v63 = vpack.c.b16 %v1585_v62, %v1584_v61 }
 0x20a   : > { %1598 = vmatpush.bf16.msrb.mxu2 %v1586_v63 }
 0x25a   : > { %v1311_v29 = vpop.f32.mrf.mxu1 }
 0x25b   : > { %v1378_v31 = vmul.f32 0.25, %v1311_v29 }
 0x25d   : > { %v1411_v37 = vadd.f32 %v1403_v33, %v1378_v31 }
 0x25f   : > { %v1423_v40 = vsel %vm1265_vm9, %v1411_v37, -inf }
 0x262   : > { %v1313_v48 = vpop.f32.mrf.mxu1 }
 0x263   : > { %v1379_v49 = vmul.f32 0.25, %v1313_v48 }
 0x265   : > { %v1412_v52 = vadd.f32 %v1404_v51, %v1379_v49 }
 0x267   : > { %v1426_v53 = vsel %vm1265_vm9, %v1412_v52, -inf }
 0x269   : > { %v1281_v7 = vpop.f32.mrf.mxu0 }
 0x26a   : > { %v1376_v44 = vmul.f32 0.25, %v1281_v7 }
 0x26c   : > { %v1409_v47 = vadd.f32 %v1401_v46, %v1376_v44 }
 0x26e   : > { %v1417_v50 = vsel %vm1265_vm9, %v1409_v47, -inf }
 0x271   : > { %v1283_v55 = vpop.f32.mrf.mxu0 }
 0x272   : > { %v1377_v21 = vmul.f32 0.25, %v1283_v55 }
 0x274   : > { %v1410_v22 = vadd.f32 %v1402_v25, %v1377_v21 }
 0x276   : > { %v1371_v16 = vpop.f32.mrf.mxu3  ;;  %v1420_v32 = vsel %vm1265_vm9, %v1410_v22, -inf }
 0x277   : > { %v1382_v17 = vmul.f32 0.25, %v1371_v16 }
 0x279   : > { %v1415_v18 = vadd.f32 %v1407_v13, %v1382_v17 }
 0x27b   : > { %v1435_v24 = vsel %vm1265_vm9, %v1415_v18, -inf }
 0x27c   : > { %1436 = vmax.xlane.f32.xlu0 %v1435_v24 }
 0x27e   : > { %v1373_v27 = vpop.f32.mrf.mxu3 }
 0x27f   : > { %v1383_v28 = vmul.f32 0.25, %v1373_v27 }
 0x281   : > { %v1416_v30 = vadd.f32 %v1408_v26, %v1383_v28 }
 0x283   : > { %v1438_v15 = vsel %vm1265_vm9, %v1416_v30, -inf }
 0x284   : > { %1439 = vmax.xlane.f32.xlu1 %v1438_v15  ;;  %1421 = vmax.xlane.f32.xlu0 %v1420_v32 }
 0x285   : > { %v1341_v35 = vpop.f32.mrf.mxu2 }
 0x286   : > { %v1380_v36 = vmul.f32 0.25, %v1341_v35 }
 0x288   : > { %v1413_v38 = vadd.f32 %v1405_v34, %v1380_v36 }
 0x28a   : > { %v1429_v39 = vsel %vm1265_vm9, %v1413_v38, -inf }
 0x28b   : > { %1430 = vmax.xlane.f32.xlu2 %v1429_v39 }
 0x28c   : > { %1424 = vmax.xlane.f32.xlu1 %v1423_v40 }
 0x28d   : > { %v1343_v42 = vpop.f32.mrf.mxu2 }
 0x28e   : > { %v1381_v43 = vmul.f32 0.25, %v1343_v42 }
 0x290   : > { %v1414_v23 = vadd.f32 %v1406_v41, %v1381_v43 }
 0x292   : > { %v1432_v45 = vsel %vm1265_vm9, %v1414_v23, -inf }
 0x293   : > { %1433 = vmax.xlane.f32.xlu2 %v1432_v45 }
 0x29b   : > { %1418 = vmax.xlane.f32.xlu2 %v1417_v50 }
 0x2a3   : > { %1427 = vmax.xlane.f32.xlu2 %v1426_v53 }
 0x2ef   : > { %v1437_v54 = vpop.xlane.xlu0 %1436 }
 0x2f0   : > { %v1447_v56 = vsub.f32 %v1415_v18, %v1437_v54 }
 0x2f2   : > { %v1461_v57 = vmul.f32 1.442695, %v1447_v56 }
 0x2f4   : > { %2283 = vpow2.f32 %v1461_v57 }
 0x2f7   : > { %v1422_v58 = vpop.xlane.xlu0 %1421  ;;  %v1440_v63 = vpop.xlane.xlu1 %1439 }
 0x2f8   : > { %v1442_v59 = vsub.f32 %v1410_v22, %v1422_v58  ;;  %v1448_v20 = vsub.f32 %v1416_v30, %v1440_v63 }
 0x2fa   : > { %v2684_v60 = vpop.eup %2283  ;;  %v1451_v61 = vmul.f32 1.442695, %v1442_v59  ;;  %v1463_v5 = vmul.f32 1.442695, %v1448_v20 }
 0x2fb   : > { %v1483_v62 = vsel %vm1265_vm9, %v2684_v60, 0.0 }
 0x2fc   : > { %1484 = vadd.xlane.f32.xlu2 %v1483_v62  ;;  %2285 = vpow2.f32 %v1451_v61 }
 0x2fe   : > { %v1431_v0 = vpop.xlane.xlu2 %1430 }
 0x2ff   : > { %v1445_v1 = vsub.f32 %v1413_v38, %v1431_v0  ;;  %v1425_v6 = vpop.xlane.xlu1 %1424 }
 0x300   : > { %v1443_v10 = vsub.f32 %v1411_v37, %v1425_v6 }
 0x301   : > { %v1457_v2 = vmul.f32 1.442695, %v1445_v1 }
 0x302   : > { %v2688_v3 = vpop.eup %2285  ;;  %v1453_v14 = vmul.f32 1.442695, %v1443_v10 }
 0x303   : > { %2287 = vpow2.f32 %v1457_v2  ;;  %v1468_v4 = vsel %vm1265_vm9, %v2688_v3, 0.0 }
 0x304   : > { %1469 = vadd.xlane.f32.xlu2 %v1468_v4  ;;  %2289 = vpow2.f32 %v1463_v5 }
 0x306   : > { %v1434_v7 = vpop.xlane.xlu2 %1433 }
 0x307   : > { %v1446_v8 = vsub.f32 %v1414_v23, %v1434_v7 }
 0x309   : > { %v2288_v9 = vpop.eup %2287  ;;  %v1459_v11 = vmul.f32 1.442695, %v1446_v8 }
 0x30a   : > { %v1477_v13 = vsel %vm1265_vm9, %v2288_v9, 0.0  ;;  %v2290_v17 = vpop.eup %2289 }
 0x30b   : > { %2291 = vpow2.f32 %v1459_v11  ;;  %1478 = vadd.xlane.f32.xlu0 %v1477_v13  ;;  %v1486_v24 = vsel %vm1265_vm9, %v2290_v17, 0.0  ;;  %v778_v11 = vld [vmem:[%s2519_s19 + $0x20] sm:$0xff]  ;;  %v779_v13 = vld [vmem:[%s2519_s19 + $0x28] sm:$0xff] }
 0x30c   : > { %2293 = vpow2.f32 %v1453_v14  ;;  %v780_v14 = vld [vmem:[%s2519_s19 + $0x30] sm:$0xff] }
 0x30e   : > { %v1419_v16 = vpop.xlane.xlu2 %1418 }
 0x30f   : > { %v1441_v55 = vsub.f32 %v1409_v47, %v1419_v16  ;;  %v1645_v16 = vpack.c.bf16 %v778_v11, %v778_v11 }
 0x311   : > { %v2292_v18 = vpop.eup %2291  ;;  %v1449_v19 = vmul.f32 1.442695, %v1441_v55  ;;  %v781_v55 = vld [vmem:[%s2519_s19 + $0x38] sm:$0xff] }
 0x312   : > { %v1480_v21 = vsel %vm1265_vm9, %v2292_v18, 0.0  ;;  %v2294_v26 = vpop.eup %2293 }
 0x313   : > { %2295 = vpow2.f32 %v1449_v19  ;;  %1481 = vadd.xlane.f32.xlu1 %v1480_v21  ;;  %1487 = vadd.xlane.f32.xlu0 %v1486_v24  ;;  %v1471_v30 = vsel %vm1265_vm9, %v2294_v26, 0.0  ;;  %v1648_v19 = vpack.c.bf16 %v781_v55, %v781_v55  ;;  %v774_v21 = vld [vmem:[%s2519_s19] sm:$0xff]  ;;  %v775_v24 = vld [vmem:[%s2519_s19 + $0x8] sm:$0xff] }
 0x314   : > { %v2272_v55 = vld [vmem:[%s2880_s15] ss:$0 sm:$0xff] }
 0x316   : > { %v1428_v25 = vpop.xlane.xlu2 %1427 }
 0x317   : > { %v1444_v27 = vsub.f32 %v1412_v52, %v1428_v25  ;;  %v1712_v25 = vunpack.c.l.b16 %v1645_v16 }
 0x319   : > { %v2296_v28 = vpop.eup %2295  ;;  %v1455_v22 = vmul.f32 1.442695, %v1444_v27 }
 0x31a   : > { %v1465_v29 = vsel %vm1265_vm9, %v2296_v28, 0.0 }
 0x31b   : > { %2297 = vpow2.f32 %v1455_v22  ;;  %1466 = vadd.xlane.f32.xlu1 %v1465_v29  ;;  %1472 = vadd.xlane.f32.xlu0 %v1471_v30  ;;  %v1741_v22 = vunpack.c.l.b16 %v1648_v19  ;;  %v1642_v29 = vpack.c.bf16 %v775_v24, %v775_v24 }
 0x321   : > { %v2298_v31 = vpop.eup %2297 }
 0x322   : > { %v1474_v15 = vsel %vm1265_vm9, %v2298_v31, 0.0 }
 0x323   : > { %1475 = vadd.xlane.f32.xlu1 %v1474_v15 }
 0x36f   : > { %v1485_v32 = vpop.xlane.xlu2 %1484 }
 0x377   : > { %v1470_v34 = vpop.xlane.xlu2 %1469 }
 0x37e   : > { %v1479_v33 = vpop.xlane.xlu0 %1478 }
 0x37f   : > { %2299 = vrcp.f32 %v1479_v33 }
 0x380   : > { %2301 = vrcp.f32 %v1485_v32  ;;  %v1657_v32 = vunpack.c.l.b16 %v1642_v29 }
 0x385   : > { %v2300_v37 = vpop.eup %2299 }
 0x386   : > { %v1482_v35 = vpop.xlane.xlu1 %1481  ;;  %v1488_v36 = vpop.xlane.xlu0 %1487  ;;  %v1501_v39 = vmul.f32 %v2300_v37, %v2288_v9 }
 0x387   : > { %2303 = vrcp.f32 %v1482_v35  ;;  %v2302_v38 = vpop.eup %2301  ;;  %v777_v35 = vld [vmem:[%s2519_s19 + $0x18] sm:$0xff] }
 0x388   : > { %2305 = vrcp.f32 %v1488_v36  ;;  %v1503_v40 = vmul.f32 %v2302_v38, %v2684_v60  ;;  %v1509_v43 = vpack.c.bf16 %v1501_v39, %v1501_v39  ;;  %v1644_v37 = vpack.c.bf16 %v777_v35, %v777_v35 }
 0x389   : > { %2307 = vrcp.f32 %v1470_v34  ;;  %v776_v34 = vld [vmem:[%s2519_s19 + $0x10] sm:$0xff] }
 0x38a   : > { %v1511_v47 = vpack.c.bf16 %v1503_v40, %v1503_v40  ;;  %v1579_v52 = vunpack.c.l.b16 %v1509_v43  ;;  %v1643_v36 = vpack.c.bf16 %v776_v34, %v776_v34  ;;  %v1685_v39 = vunpack.c.l.b16 %v1644_v37 }
 0x38c   : > { %v1607_v54 = vunpack.c.l.b16 %v1511_v47  ;;  %v1684_v38 = vunpack.c.l.b16 %v1643_v36 }
 0x38d   : > { %v2304_v41 = vpop.eup %2303 }
 0x38e   : > { %v2306_v42 = vpop.eup %2305  ;;  %v1502_v23 = vmul.f32 %v2304_v41, %v2292_v18  ;;  %v1467_v44 = vpop.xlane.xlu1 %1466  ;;  %v1647_v18 = vpack.c.bf16 %v780_v14, %v780_v14  ;;  %v1686_v40 = vpack.c.b16 %v1685_v39, %v1684_v38 }
 0x38f   : > { %v1473_v45 = vpop.xlane.xlu0 %1472  ;;  %v2308_v46 = vpop.eup %2307  ;;  %v1504_v48 = vmul.f32 %v2306_v42, %v2290_v17  ;;  %2309 = vrcp.f32 %v1467_v44  ;;  %v1646_v17 = vpack.c.bf16 %v779_v13, %v779_v13 }
 0x390   : > { %v1510_v49 = vpack.c.bf16 %v1502_v23, %v1502_v23  ;;  %2311 = vrcp.f32 %v1473_v45  ;;  %v1498_v51 = vmul.f32 %v2308_v46, %v2688_v3  ;;  %v1740_v27 = vunpack.c.l.b16 %v1647_v18  ;;  %1698 = vmatpush.bf16.msra.mxu1 %v1686_v40 }
 0x391   : > { %v1512_v50 = vpack.c.bf16 %v1504_v48, %v1504_v48 }
 0x392   : > { %v1580_v53 = vunpack.c.l.b16 %v1510_v49  ;;  %v1506_v60 = vpack.c.bf16 %v1498_v51, %v1498_v51  ;;  %v1742_v15 = vpack.c.b16 %v1741_v22, %v1740_v27 }
 0x393   : > { %v1608_v56 = vunpack.c.l.b16 %v1512_v50 }
 0x394   : > { %v1581_v57 = vpack.c.b16 %v1580_v53, %v1579_v52  ;;  %v1524_v1 = vunpack.c.l.b16 %v1506_v60  ;;  %1754 = vmatpush.bf16.msrb.mxu3 %v1742_v15 }
 0x395   : > { %v2310_v58 = vpop.eup %2309  ;;  %v1609_v59 = vpack.c.b16 %v1608_v56, %v1607_v54 }
 0x396   : > { %v1497_v61 = vmul.f32 %v2310_v58, %v2296_v28  ;;  %v1476_v62 = vpop.xlane.xlu1 %1475  ;;  %2212 = vmatmul.msk.bf16.vlgmr.msrb.gmra.mxu2 %vm1265_vm9, %v1581_v57  ;;  %v2312_v63 = vpop.eup %2311  ;;  %v1641_v28 = vpack.c.bf16 %v774_v21, %v774_v21  ;;  %v2323_v21 = vld [vmem:[#allocation2] sm:$0xff] }
 0x397   : > { %2313 = vrcp.f32 %v1476_v62  ;;  %2213 = vmatmul.msk.bf16.vlgmr.msra.gmra.mxu3 %vm1265_vm9, %v1609_v59  ;;  %v1499_v2 = vmul.f32 %v2312_v63, %v2294_v26  ;;  %v1713_v26 = vunpack.c.l.b16 %v1646_v17 }
 0x398   : > { %v1505_v0 = vpack.c.bf16 %v1497_v61, %v1497_v61 }
 0x399   : > { %v1507_v5 = vpack.c.bf16 %v1499_v2, %v1499_v2  ;;  %v1714_v30 = vpack.c.b16 %v1713_v26, %v1712_v25 }
 0x39a   : > { %v1523_v20 = vunpack.c.l.b16 %v1505_v0 }
 0x39b   : > { %v1551_v8 = vunpack.c.l.b16 %v1507_v5  ;;  %1726 = vmatpush.bf16.msra.mxu2 %v1714_v30 }
 0x39c   : > { %v1525_v3 = vpack.c.b16 %v1524_v1, %v1523_v20 }
 0x39d   : > { %v2314_v4 = vpop.eup %2313 }
 0x39e   : > { %v1500_v6 = vmul.f32 %v2314_v4, %v2298_v31  ;;  %2210 = vmatmul.msk.bf16.vlgmr.msra.gmra.mxu0 %vm1265_vm9, %v1525_v3  ;;  %v1656_v31 = vunpack.c.l.b16 %v1641_v28 }
 0x3a0   : > { %v1508_v7 = vpack.c.bf16 %v1500_v6, %v1500_v6  ;;  %v1658_v33 = vpack.c.b16 %v1657_v32, %v1656_v31 }
 0x3a2   : > { %v1552_v9 = vunpack.c.l.b16 %v1508_v7  ;;  %1670 = vmatpush.bf16.msrb.mxu0 %v1658_v33  ;;  %v2324_v33 = vld [vmem:[#allocation2 + $0x8] sm:$0xff] }
 0x3a4   : > { %v1553_v10 = vpack.c.b16 %v1552_v9, %v1551_v8 }
 0x3a6   : > { %2211 = vmatmul.msk.bf16.vlgmr.msrb.gmra.mxu1 %vm1265_vm9, %v1553_v10 }
 0x419   : > { %v1600_v41 = vpop.f32.mrf.mxu2 }
 0x41a   : > { %v1628_v42 = vpop.f32.mrf.mxu3  ;;  %v1637_v23 = vpack.c.bf16 %v1600_v41, %v1600_v41 }
 0x41b   : > { %v1544_v43 = vpop.f32.mrf.mxu0  ;;  %v1639_v44 = vpack.c.bf16 %v1628_v42, %v1628_v42 }
 0x41c   : > { %v1633_v46 = vpack.c.bf16 %v1544_v43, %v1544_v43  ;;  %v1707_v52 = vunpack.c.l.b16 %v1637_v23 }
 0x41d   : > { %v1735_v56 = vunpack.c.l.b16 %v1639_v44 }
 0x41e   : > { %v1651_v58 = vunpack.c.l.b16 %v1633_v46  ;;  %v787_v46 = vld [vmem:[%s2537_s3 + $0x10] sm:$0xff] }
 0x421   : > { %v1602_v45 = vpop.f32.mrf.mxu2 }
 0x422   : > { %v1638_v47 = vpack.c.bf16 %v1602_v45, %v1602_v45  ;;  %v1630_v48 = vpop.f32.mrf.mxu3 }
 0x423   : > { %v1640_v49 = vpack.c.bf16 %v1630_v48, %v1630_v48  ;;  %v1546_v50 = vpop.f32.mrf.mxu0  ;;  %v1572_v51 = vpop.f32.mrf.mxu1 }
 0x424   : > { %v1708_v53 = vunpack.c.l.b16 %v1638_v47  ;;  %v1634_v54 = vpack.c.bf16 %v1546_v50, %v1546_v50  ;;  %v1635_v63 = vpack.c.bf16 %v1572_v51, %v1572_v51  ;;  %v788_v47 = vld [vmem:[%s2537_s3 + $0x18] sm:$0xff] }
 0x425   : > { %v1736_v57 = vunpack.c.l.b16 %v1640_v49  ;;  %v1838_v49 = vpack.c.bf16 %v788_v47, %v787_v46 }
 0x426   : > { %v1709_v59 = vpack.c.b16 %v1708_v53, %v1707_v52  ;;  %v1652_v60 = vunpack.c.l.b16 %v1634_v54  ;;  %v1679_v20 = vunpack.c.l.b16 %v1635_v63  ;;  %v785_v52 = vld [vmem:[%s2537_s3] sm:$0xff]  ;;  %v786_v53 = vld [vmem:[%s2537_s3 + $0x8] sm:$0xff] }
 0x427   : > { %v1737_v61 = vpack.c.b16 %v1736_v57, %v1735_v56  ;;  %1851 = vmatpush.bf16.msra.mxu0 %v1838_v49  ;;  %v1837_v54 = vpack.c.bf16 %v786_v53, %v785_v52 }
 0x428   : > { %v1653_v62 = vpack.c.b16 %v1652_v60, %v1651_v58  ;;  %2216 = vmatmul.msk.bf16.vlgmr.msra.gmra.mxu2 %vm1265_vm9, %v1709_v59 }
 0x429   : > { %2217 = vmatmul.msk.bf16.vlgmr.msrb.gmra.mxu3 %vm1265_vm9, %v1737_v61 }
 0x42a   : > { %2214 = vmatmul.msk.bf16.vlgmr.msrb.gmra.mxu0 %vm1265_vm9, %v1653_v62 }
 0x42b   : > { %v1574_v0 = vpop.f32.mrf.mxu1  ;;  %1852 = vmatpush.bf16.msra.mxu0 %v1837_v54 }
 0x42c   : > { %v1636_v1 = vpack.c.bf16 %v1574_v0, %v1574_v0 }
 0x42e   : > { %v1680_v2 = vunpack.c.l.b16 %v1636_v1 }
 0x430   : > { %v1681_v3 = vpack.c.b16 %v1680_v2, %v1679_v20 }
 0x432   : > { %2215 = vmatmul.msk.bf16.vlgmr.msra.gmra.mxu1 %vm1265_vm9, %v1681_v3 }
 0x4a7   : > { %v1672_v4 = vpop.f32.mrf.mxu0 }
 0x4a8   : > { %v1761_v8 = vsel %vm807_vm1, %v1672_v4, 0.0 }
 0x4ab   : > { %v1728_v5 = vpop.f32.mrf.mxu2 }
 0x4ac   : > { %v1756_v6 = vpop.f32.mrf.mxu3  ;;  %v1764_v11 = vsel %vm807_vm1, %v1728_v5, 0.0 }
 0x4ad   : > { %v1766_v14 = vsel %vm807_vm1, %v1756_v6, 0.0  ;;  %v2273_v6 = vld [vmem:[%s2881_s17] ss:$0 sm:$0xff] }
 0x4af   : > { %v1700_v7 = vpop.f32.mrf.mxu1  ;;  %v1674_v16 = vpop.f32.mrf.mxu0 }
 0x4b0   : > { %v1762_v9 = vsel %vm807_vm1, %v1700_v7, 0.0  ;;  %v1768_v25 = vsel %vm807_vm1, %v1674_v16, 0.0 }
 0x4b1   : > { %v1763_v10 = vadd.f32 %v1762_v9, %v1761_v8 }
 0x4b3   : > { %v1765_v13 = vadd.f32 %v1764_v11, %v1763_v10  ;;  %v1730_v18 = vpop.f32.mrf.mxu2  ;;  %v2274_v10 = vld [vmem:[%s2882_s13] ss:$0 sm:$0xff] }
 0x4b4   : > { %v1758_v27 = vpop.f32.mrf.mxu3  ;;  %v1771_v29 = vsel %vm807_vm1, %v1730_v18, 0.0  ;;  %v804_v18 = vld [vmem:[%s2543_s27 + $0x70] sm:$0xff] }
 0x4b5   : > { %v1767_v17 = vadd.f32 %v1766_v14, %v1765_v13  ;;  %v1773_v15 = vsel %vm807_vm1, %v1758_v27, 0.0  ;;  %v800_v27 = vld [vmem:[%s2543_s27 + $0x50] sm:$0xff] }
 0x4b7   : > { %v1702_v19 = vpop.f32.mrf.mxu1  ;;  %v1775_v24 = vadd.f32 %v2323_v21, %v1767_v17 }
 0x4b8   : > { %v1769_v26 = vsel %vm807_vm1, %v1702_v19, 0.0  ;;  %v805_v19 = vld [vmem:[%s2543_s27 + $0x78] sm:$0xff] }
 0x4b9   : > { %v1770_v28 = vadd.f32 %v1769_v26, %v1768_v25  ;;  %v2727_v22 = vadd.f32 %v2272_v55, %v1775_v24  ;;  %v1885_v21 = vpack.c.bf16 %v805_v19, %v804_v18  ;;  %v802_v24 = vld [vmem:[%s2543_s27 + $0x60] sm:$0xff]  ;;  %v803_v25 = vld [vmem:[%s2543_s27 + $0x68] sm:$0xff] }
 0x4ba   : > { %v1884_v26 = vpack.c.bf16 %v803_v25, %v802_v24 }
 0x4bb   : > { %v1772_v30 = vadd.f32 %v1771_v29, %v1770_v28  ;;  %v1782_v31 = vsel %vm807_vm1, %v2727_v22, 0.0  ;;  %1886 = vmatpush.bf16.msrb.mxu1 %v1885_v21  ;;  %v801_v28 = vld [vmem:[%s2543_s27 + $0x58] sm:$0xff] }
 0x4bc   : > { %1783 = vadd.xlane.f32.xlu2 %v1782_v31  ;;  %v1883_v29 = vpack.c.bf16 %v801_v28, %v800_v27  ;;  %v799_v31 = vld [vmem:[%s2543_s27 + $0x48] sm:$0xff] }
 0x4bd   : > { %v1774_v32 = vadd.f32 %v1773_v15, %v1772_v30  ;;  %v798_v30 = vld [vmem:[%s2543_s27 + $0x40] sm:$0xff] }
 0x4be   : > { %v1882_v15 = vpack.c.bf16 %v799_v31, %v798_v30 }
 0x4bf   : > { %v1776_v34 = vadd.f32 %v2324_v33, %v1774_v32  ;;  %1887 = vmatpush.bf16.msrb.mxu1 %v1884_v26  ;;  %v796_v32 = vld [vmem:[%s2543_s27 + $0x30] sm:$0xff]  ;;  %v797_v33 = vld [vmem:[%s2543_s27 + $0x38] sm:$0xff] }
 0x4c1   : > { %v2733_v35 = vadd.f32 %v2272_v55, %v1776_v34  ;;  %v1881_v34 = vpack.c.bf16 %v797_v33, %v796_v32 }
 0x4c3   : > { %v1785_v36 = vsel %vm807_vm1, %v2733_v35, 0.0  ;;  %1888 = vmatpush.bf16.msrb.mxu1 %v1883_v29 }
 0x4c4   : > { %1786 = vadd.xlane.f32.xlu0 %v1785_v36  ;;  %v794_v36 = vld [vmem:[%s2543_s27 + $0x20] sm:$0xff] }
 0x4c7   : > { %1889 = vmatpush.bf16.msrb.mxu1 %v1882_v15 }
 0x4cb   : > { %1890 = vmatpush.bf16.msrb.mxu1 %v1881_v34 }
 0x52f   : > { %v1784_v37 = vpop.xlane.xlu2 %1783 }
 0x530   : > { %v1788_v38 = vmul.f32 %v1784_v37, %v2557_v12  ;;  %v795_v37 = vld [vmem:[%s2543_s27 + $0x28] sm:$0xff] }
 0x532   : > { %v1790_v39 = vsub.f32 %v2727_v22, %v1788_v38  ;;  %v1880_v38 = vpack.c.bf16 %v795_v37, %v794_v36 }
 0x534   : > { %v1792_v40 = vmul.f32 %v1790_v39, %v1790_v39  ;;  %1891 = vmatpush.bf16.msrb.mxu1 %v1880_v38 }
 0x536   : > { %v1794_v41 = vsel %vm807_vm1, %v1792_v40, 0.0  ;;  %v793_v40 = vld [vmem:[%s2543_s27 + $0x18] sm:$0xff] }
 0x537   : > { %1795 = vadd.xlane.f32.xlu1 %v1794_v41  ;;  %v1787_v42 = vpop.xlane.xlu0 %1786  ;;  %v2275_v41 = vld [vmem:[%s698_s21] ss:$0 sm:$0xff] }
 0x538   : > { %v1789_v43 = vmul.f32 %v1787_v42, %v2557_v12 }
 0x53a   : > { %v1791_v23 = vsub.f32 %v2733_v35, %v1789_v43 }
 0x53c   : > { %v1793_v44 = vmul.f32 %v1791_v23, %v1791_v23 }
 0x53e   : > { %v1797_v45 = vsel %vm807_vm1, %v1793_v44, 0.0  ;;  %v791_v44 = vld [vmem:[%s2543_s27 + $0x8] sm:$0xff] }
 0x53f   : > { %1798 = vadd.xlane.f32.xlu2 %v1797_v45 }
 0x5aa   : > { %v1796_v48 = vpop.xlane.xlu1 %1795 }
 0x5ab   : > { %v1800_v50 = vmul.f32 %v1796_v48, %v2557_v12 }
 0x5ad   : > { %v1802_v51 = vadd.f32 1e-05, %v1800_v50 }
 0x5af   : > { %2315 = vrsqrt.f32 %v1802_v51  ;;  %vm1810_vm13 = vweird.f32 %v1802_v51 }
 0x5b2   : > { %v1799_v56 = vpop.xlane.xlu2 %1798 }
 0x5b3   : > { %v1801_v57 = vmul.f32 %v1799_v56, %v2557_v12 }
 0x5b5   : > { %v2316_v58 = vpop.eup %2315  ;;  %v1803_v59 = vadd.f32 1e-05, %v1801_v57 }
 0x5b6   : > { %v1805_v60 = vmul.f32 %v2316_v58, %v1802_v51  ;;  %vm1811_vm12 = vweird.f32 %v2316_v58 }
 0x5b7   : > { %2317 = vrsqrt.f32 %v1803_v59  ;;  %vm1812_vm14 = vmor %vm1810_vm13, %vm1811_vm12  ;;  %vm1820_vm0 = vweird.f32 %v1803_v59 }
 0x5b8   : > { %v1806_v61 = vmul.f32 %v2316_v58, %v1805_v60 }
 0x5ba   : > { %v1807_v62 = vmul.f32 0.5, %v1806_v61 }
 0x5bc   : > { %v1808_v63 = vsub.f32 1.5, %v1807_v62 }
 0x5bd   : > { %v2318_v0 = vpop.eup %2317 }
 0x5be   : > { %v1809_v1 = vmul.f32 %v2316_v58, %v1808_v63  ;;  %v1815_v20 = vmul.f32 %v2318_v0, %v1803_v59  ;;  %vm1821_vm15 = vweird.f32 %v2318_v0 }
 0x5bf   : > { %vm1822_vm2 = vmor %vm1820_vm0, %vm1821_vm15 }
 0x5c0   : > { %v1816_v2 = vmul.f32 %v2318_v0, %v1815_v20  ;;  %v1813_v3 = vsel %vm1812_vm14, %v2316_v58, %v1809_v1 }
 0x5c1   : > { %v1824_v7 = vmul.f32 %v1813_v3, %v1790_v39  ;;  %v792_v39 = vld [vmem:[%s2543_s27 + $0x10] sm:$0xff] }
 0x5c2   : > { %v1817_v4 = vmul.f32 0.5, %v1816_v2  ;;  %v1879_v42 = vpack.c.bf16 %v793_v40, %v792_v39 }
 0x5c3   : > { %v1829_v11 = vmul.f32 %v2273_v6, %v1824_v7 }
 0x5c4   : > { %v1818_v5 = vsub.f32 1.5, %v1817_v4  ;;  %1892 = vmatpush.bf16.msrb.mxu1 %v1879_v42  ;;  %v2276_v4 = vld [vmem:[%s706_s23] ss:$0 sm:$0xff] }
 0x5c5   : > { %v1834_v16 = vadd.f32 %v2274_v10, %v1829_v11 }
 0x5c6   : > { %v1819_v8 = vmul.f32 %v2318_v0, %v1818_v5 }
 0x5c8   : > { %v1823_v9 = vsel %vm1822_vm2, %v2318_v0, %v1819_v8 }
 0x5c9   : > { %v1825_v13 = vmul.f32 %v1823_v9, %v1791_v23  ;;  %v790_v23 = vld [vmem:[%s2543_s27] sm:$0xff]  ;;  %s2888_s27 = sld [smem:[#allocation15_spill]] (!%p2219_p8) }
 0x5ca   : > { %v1878_v46 = vpack.c.bf16 %v791_v44, %v790_v23 }
 0x5cb   : > { %v1830_v14 = vmul.f32 %v2273_v6, %v1825_v13 }
 0x5cc   : > { %1893 = vmatpush.bf16.msrb.mxu1 %v1878_v46 }
 0x5cd   : > { %v1835_v17 = vadd.f32 %v2274_v10, %v1830_v14 }
 0x5cf   : > { %v1836_v55 = vpack.c.bf16 %v1835_v17, %v1834_v16 }
 0x5d1   : > { %2218 = vmatmul.msk.bf16.vlgmr.msra.gmra.mxu0 %vm807_vm1, %v1836_v55 }
 0x64e   : > { %v1854_v43 = vpop.f32.mrf.mxu0 }
 0x64f   : > { %v1855_v45 = vadd.f32 %v2275_v41, %v1854_v43 }
 0x651   : > { %v1859_v47 = vmul.f32 %v1855_v45, %v1855_v45 }
 0x653   : > { %v1861_v48 = vmul.f32 %v1859_v47, %v1855_v45 }
 0x655   : > { %v1863_v49 = vmul.f32 0.044715, %v1861_v48 }
 0x656   : > { %v1856_v50 = vpop.f32.mrf.mxu0 }
 0x657   : > { %v1865_v51 = vadd.f32 %v1863_v49, %v1855_v45  ;;  %v1857_v52 = vadd.f32 %v2275_v41, %v1856_v50 }
 0x659   : > { %v1867_v53 = vmul.f32 0.7978846, %v1865_v51  ;;  %v1860_v54 = vmul.f32 %v1857_v52, %v1857_v52 }
 0x65b   : > { %v1862_v56 = vmul.f32 %v1860_v54, %v1857_v52  ;;  %2319 = vtanh.f32 %v1867_v53 }
 0x65d   : > { %v1864_v57 = vmul.f32 0.044715, %v1862_v56 }
 0x65f   : > { %v1866_v58 = vadd.f32 %v1864_v57, %v1857_v52 }
 0x661   : > { %v1868_v59 = vmul.f32 0.7978846, %v1866_v58  ;;  %v2320_v60 = vpop.eup %2319 }
 0x662   : > { %v1871_v61 = vadd.f32 1.0, %v2320_v60 }
 0x663   : > { %2321 = vtanh.f32 %v1868_v59 }
 0x664   : > { %v1873_v63 = vmul.f32 0.5, %v1871_v61 }
 0x666   : > { %v1875_v20 = vmul.f32 %v1873_v63, %v1855_v45 }
 0x669   : > { %v2322_v62 = vpop.eup %2321 }
 0x66a   : > { %v1872_v0 = vadd.f32 1.0, %v2322_v62 }
 0x66c   : > { %v1874_v1 = vmul.f32 0.5, %v1872_v0 }
 0x66e   : > { %v1876_v2 = vmul.f32 %v1874_v1, %v1857_v52 }
 0x670   : > { %v1877_v3 = vpack.c.bf16 %v1876_v2, %v1875_v20 }
 0x672   : > { %1894 = vmatmul.bf16.vlgmr.msrb.gmra.mxu1 %v1877_v3 }
 0x6ef   : > { %v1895_v5 = vpop.f32.mrf.mxu1 }
 0x6f0   : > { %v1900_v6 = vadd.f32 %v1895_v5, %v2727_v22 }
 0x6f2   : > { %v1905_v7 = vadd.f32 %v2276_v4, %v1900_v6 }
 0x6f4   : > { %1907 = vst.msk [vmem:[#allocation2] sm:$0xff] %vm807_vm1, %v1905_v7 }
 0x6f7   : > { %v1897_v8 = vpop.f32.mrf.mxu1 }
 0x6f8   : > { %v1901_v9 = vadd.f32 %v1897_v8, %v2733_v35  ;;  %1912 = sbr.rel (%p2219_p8) target bundleno = 2204 (0x89c), region = 92 }
 0x6fa   : > { %v1906_v10 = vadd.f32 %v2276_v4, %v1901_v9 }
 0x6fc   : > { %1908 = vst.msk [vmem:[#allocation2 + $0x8] sm:$0xff] %vm807_vm1, %v1906_v10 }
 0x6fd   : > { %v1915_v11 = vsel %vm807_vm1, %v1905_v7, 0.0  ;;  %v1918_v13 = vsel %vm807_vm1, %v1906_v10, 0.0  ;;  %v1971_v25 = vld [vmem:[%s2884_s24 + $0x10] sm:$0xff]  ;;  %v1972_v26 = vld [vmem:[%s2885_s12 + $0x18] sm:$0xff]  ;;  %v1969_v28 = vld [vmem:[%s2885_s12] sm:$0xff]  ;;  %vm1997_vm9 = vcmask 64512  }
 0x6fe   : > { %1916 = vadd.xlane.f32.xlu0 %v1915_v11  ;;  %v1975_v27 = vpack.c.bf16 %v1972_v26, %v1971_v25  ;;  %v1970_v29 = vld [vmem:[%s2885_s12 + $0x8] sm:$0xff]  ;;  %v2326_v53 = vld [vmem:[%s2887_s2] ss:$0 sm:$0xff] }
 0x6ff   : > { %v1974_v31 = vpack.c.bf16 %v1970_v29, %v1969_v28  ;;  %v2327_v59 = vld [vmem:[%s2888_s27] ss:$0 sm:$0xff] }
 0x700   : > { %1989 = vmatpush.bf16.msra.mxu0 %v1975_v27 }
 0x704   : > { %1990 = vmatpush.bf16.msra.mxu0 %v1974_v31 }
 0x706   : > { %1919 = vadd.xlane.f32.xlu0 %v1918_v13 }
 0x771   : > { %v1917_v14 = vpop.xlane.xlu0 %1916 }
 0x772   : > { %v1921_v22 = vmul.f32 %v1917_v14, %v2557_v12 }
 0x774   : > { %v1923_v16 = vsub.f32 %v1905_v7, %v1921_v22 }
 0x776   : > { %v1925_v17 = vmul.f32 %v1923_v16, %v1923_v16 }
 0x778   : > { %v1927_v55 = vsel %vm807_vm1, %v1925_v17, 0.0 }
 0x779   : > { %1928 = vadd.xlane.f32.xlu1 %v1927_v55  ;;  %v1920_v35 = vpop.xlane.xlu0 %1919 }
 0x77a   : > { %v1922_v18 = vmul.f32 %v1920_v35, %v2557_v12 }
 0x77c   : > { %v1924_v19 = vsub.f32 %v1906_v10, %v1922_v18 }
 0x77e   : > { %v1926_v21 = vmul.f32 %v1924_v19, %v1924_v19 }
 0x780   : > { %v1930_v24 = vsel %vm807_vm1, %v1926_v21, 0.0 }
 0x781   : > { %1931 = vadd.xlane.f32.xlu1 %v1930_v24 }
 0x7ec   : > { %v1929_v30 = vpop.xlane.xlu1 %1928 }
 0x7ed   : > { %v1933_v15 = vmul.f32 %v1929_v30, %v2557_v12 }
 0x7ef   : > { %v1935_v32 = vadd.f32 1e-05, %v1933_v15 }
 0x7f1   : > { %2328 = vrsqrt.f32 %v1935_v32  ;;  %vm1943_vm4 = vweird.f32 %v1935_v32 }
 0x7f4   : > { %v1932_v33 = vpop.xlane.xlu1 %1931 }
 0x7f5   : > { %v1934_v34 = vmul.f32 %v1932_v33, %v2557_v12  ;;  %v2325_v12 = vld [vmem:[%s2886_s20] ss:$0 sm:$0xff] }
 0x7f7   : > { %v2329_v36 = vpop.eup %2328  ;;  %v1936_v37 = vadd.f32 1e-05, %v1934_v34 }
 0x7f8   : > { %v1938_v38 = vmul.f32 %v2329_v36, %v1935_v32  ;;  %vm1944_vm3 = vweird.f32 %v2329_v36 }
 0x7f9   : > { %2330 = vrsqrt.f32 %v1936_v37  ;;  %vm1945_vm5 = vmor %vm1943_vm4, %vm1944_vm3  ;;  %vm1953_vm7 = vweird.f32 %v1936_v37 }
 0x7fa   : > { %v1939_v39 = vmul.f32 %v2329_v36, %v1938_v38 }
 0x7fc   : > { %v1940_v40 = vmul.f32 0.5, %v1939_v39 }
 0x7fe   : > { %v1941_v41 = vsub.f32 1.5, %v1940_v40 }
 0x7ff   : > { %v2331_v42 = vpop.eup %2330 }
 0x800   : > { %v1942_v43 = vmul.f32 %v2329_v36, %v1941_v41  ;;  %v1948_v23 = vmul.f32 %v2331_v42, %v1936_v37  ;;  %vm1954_vm6 = vweird.f32 %v2331_v42 }
 0x801   : > { %vm1955_vm8 = vmor %vm1953_vm7, %vm1954_vm6 }
 0x802   : > { %v1949_v44 = vmul.f32 %v2331_v42, %v1948_v23  ;;  %v1946_v46 = vsel %vm1945_vm5, %v2329_v36, %v1942_v43 }
 0x803   : > { %v1957_v48 = vmul.f32 %v1946_v46, %v1923_v16 }
 0x804   : > { %v1950_v45 = vmul.f32 0.5, %v1949_v44 }
 0x805   : > { %v1962_v52 = vmul.f32 %v2325_v12, %v1957_v48 }
 0x806   : > { %v1951_v47 = vsub.f32 1.5, %v1950_v45 }
 0x807   : > { %v1967_v56 = vadd.f32 %v2326_v53, %v1962_v52 }
 0x808   : > { %v1952_v49 = vmul.f32 %v2331_v42, %v1951_v47 }
 0x80a   : > { %v1956_v50 = vsel %vm1955_vm8, %v2331_v42, %v1952_v49 }
 0x80b   : > { %v1958_v51 = vmul.f32 %v1956_v50, %v1924_v19 }
 0x80d   : > { %v1963_v54 = vmul.f32 %v2325_v12, %v1958_v51 }
 0x80f   : > { %v1968_v57 = vadd.f32 %v2326_v53, %v1963_v54 }
 0x811   : > { %v1973_v58 = vpack.c.bf16 %v1968_v57, %v1967_v56 }
 0x813   : > { %2220 = vmatmul.msk.bf16.vlgmr.msra.gmra.mxu0 %vm807_vm1, %v1973_v58 }
 0x890   : > { %v1992_v60 = vpop.f32.mrf.mxu0 }
 0x891   : > { %v1993_v61 = vadd.f32 %v2327_v59, %v1992_v60 }
 0x893   : > { %1998 = vst.msk [vmem:[%s2552_s14] sm:$0xff] %vm1997_vm9, %v1993_v61 }
 0x898   : > { %v1994_v62 = vpop.f32.mrf.mxu0 }
 0x899   : > { %v1995_v63 = vadd.f32 %v2327_v59, %v1994_v62 }
 0x89b   : > { %1999 = vst.msk [vmem:[%s2552_s14 + $0x8] sm:$0xff] %vm1997_vm9, %v1995_v63 }
 0x89c PF: > { %s2889_s18 = sld [smem:[#allocation6_spill]] }
 0x89d   : > { %s2890_s21 = sld [smem:[#allocation4_spill]] }
 0x89e   : > { %s2891_s22 = sld [smem:[#allocation5_spill]] }
 0x89f   : > { %s2892_s23 = sld [smem:[#allocation7_spill]] }
 0x8a0   : > { %s2893_s24 = sld [smem:[#allocation8_spill]] }
 0x8a2   : > { %s26_s25 = sadd.s32 1, %s2889_s18  }
 0x8a3   : > { %p23_p9 = scmp.ge.s32.totalorder %s26_s25, 6  }
 0x8a5   :  { %25 = sbr.rel (!%p23_p9) target bundleno = 8 (0x8), region = 155 }

</bundles_post_ra>
